<compile_context>
chip_gen: v6e
topology: v6e:2x2x1
jax: 0.10.0
libtpu: 0.0.40
codegen_flags: <defaults>
</compile_context>

<pallas_src>
import math

import jax
import jax.numpy as jnp
from jax.experimental import pallas as pl
from jax.experimental.pallas import tpu as pltpu

RANDOM_NUM_COUNT = 20   # input noise dim
ART_POINT_COUNTS = 20   # output dim

# (in, out) sizes of the 5 Linear layers of g_net
LAYER_DIMS = [
    (RANDOM_NUM_COUNT, 128),
    (128, 256),
    (256, 256),
    (256, 256),
    (256, ART_POINT_COUNTS),
]

TILE_B_MAX = 2048        # rows per grid step (amortize ~0.35us/step overhead)
TILE_B_MIN = 512         # never shrink tiles below this when splitting for megacore
BATCH_ALIGN = 16         # bf16 sublane packing
MIN_PALLAS_BATCH = 256   # below this, fixed pallas_call cost dominates -> plain jnp


def _round_up(n, m):
    return (n + m - 1) // m * m


def _generator_kernel(x_ref,
                      w1_ref, b1_ref,
                      w2_ref, b2_ref,
                      w3_ref, b3_ref,
                      w4_ref, b4_ref,
                      w5_ref, b5_ref,
                      o_ref):
    """One batch tile of the MLP: 5 bf16 MXU matmuls (f32 accum) + f32 VPU bias/ReLU."""
    # x_ref is already bf16 (cast in the wrapper); K=20 is fed unpadded.
    h = jnp.dot(x_ref[...], w1_ref[...], preferred_element_type=jnp.float32)
    h = jnp.maximum(h + b1_ref[...], 0.0)

    h = jnp.dot(h.astype(jnp.bfloat16), w2_ref[...],
                preferred_element_type=jnp.float32)
    h = jnp.maximum(h + b2_ref[...], 0.0)

    h = jnp.dot(h.astype(jnp.bfloat16), w3_ref[...],
                preferred_element_type=jnp.float32)
    h = jnp.maximum(h + b3_ref[...], 0.0)

    h = jnp.dot(h.astype(jnp.bfloat16), w4_ref[...],
                preferred_element_type=jnp.float32)
    h = jnp.maximum(h + b4_ref[...], 0.0)

    h = jnp.dot(h.astype(jnp.bfloat16), w5_ref[...],
                preferred_element_type=jnp.float32)
    o_ref[...] = (h + b5_ref[...]).astype(o_ref.dtype)


def init_generator_params(key):
    """PyTorch nn.Linear default init: weight, bias ~ U(-1/sqrt(fan_in), +).
    Weights returned as (in, out) f32; biases as (1, out) f32."""
    params = []
    for (fan_in, fan_out) in LAYER_DIMS:
        key, wk, bk = jax.random.split(key, 3)
        bound = 1.0 / math.sqrt(fan_in)
        w = jax.random.uniform(wk, (fan_in, fan_out), jnp.float32,
                               minval=-bound, maxval=bound)
        b = jax.random.uniform(bk, (1, fan_out), jnp.float32,
                               minval=-bound, maxval=bound)
        params.append((w, b))
    return params


def pack_generator_params(params):
    """Cast matmul weights to bf16 (MXU operands); biases stay f32 (VPU adds).
    No feature padding: the 20-wide first-layer K and last-layer N are kept
    unpadded (block dims equal to the full array dims are legal)."""
    return [(w.astype(jnp.bfloat16), b) for (w, b) in params]


def _choose_tile_b(b_aligned):
    """Biggest tile that amortizes per-step overhead, while keeping >=4 (or 2)
    grid steps whenever tiles can stay >= TILE_B_MIN (v7x megacore sharding)."""
    tile_b = min(TILE_B_MAX, b_aligned)
    for steps in (4, 2):
        cand = _round_up(pl.cdiv(b_aligned, steps), BATCH_ALIGN)
        if cand >= TILE_B_MIN:
            return min(tile_b, cand)
    return tile_b


def _reference_forward(x, packed_params):
    """Pure-JAX reference mirroring the kernel math (bf16 operands, f32 accum).
    Also used as the small-batch fallback path."""
    h = x.astype(jnp.bfloat16)
    n = len(packed_params)
    for i, (w, b) in enumerate(packed_params):
        h = jnp.dot(h, w, preferred_element_type=jnp.float32) + b
        if i < n - 1:
            h = jnp.maximum(h, 0.0).astype(jnp.bfloat16)
    return h


def generator_forward(x, packed_params):
    """x: (B, RANDOM_NUM_COUNT) f32 -> (B, ART_POINT_COUNTS) f32."""
    batch = x.shape[0]
    assert x.shape[1] == RANDOM_NUM_COUNT

    if batch < MIN_PALLAS_BATCH:
        # A single tiny tile is pure fixed cost -> plain jnp (same math).
        return _reference_forward(x, packed_params)

    # bf16 input straight from the wrapper: halves input DMA bytes and drops
    # one in-kernel (tile_b, 20) VPU cast. Numerically identical (the MXU
    # consumed bf16 operands already; accumulation stays f32).
    x_bf16 = x.astype(jnp.bfloat16)

    b_aligned = _round_up(batch, BATCH_ALIGN)
    tile_b = _choose_tile_b(b_aligned)
    b_pad = _round_up(b_aligned, tile_b)
    if b_pad != batch:
        x_bf16 = jnp.pad(x_bf16, ((0, b_pad - batch), (0, 0)))
    grid = (b_pad // tile_b,)

    flat_args = [x_bf16]
    in_specs = [pl.BlockSpec((tile_b, RANDOM_NUM_COUNT), lambda i: (i, 0))]
    for (w, b) in packed_params:
        flat_args.extend([w, b])
        # Weights/biases: full-array blocks, same block every step -> resident
        # in VMEM for the whole grid (default buffering accepted per review).
        in_specs.append(pl.BlockSpec(w.shape, lambda i: (0, 0)))
        in_specs.append(pl.BlockSpec(b.shape, lambda i: (0, 0)))

    flops = 2 * b_pad * sum(int(w.shape[0]) * int(w.shape[1])
                            for w, _ in packed_params)
    bytes_accessed = (x_bf16.size * 2 + b_pad * ART_POINT_COUNTS * 4
                      + sum(w.size * 2 + b.size * 4 for w, b in packed_params))

    # TODO(synk): on v6e, benchmark a bf16 (or lane-dense padded) output store
    # against this unpadded f32 masked store; byte savings vs fixed vst.msk cost.
    out_padded = pl.pallas_call(
        _generator_kernel,
        out_shape=jax.ShapeDtypeStruct((b_pad, ART_POINT_COUNTS), jnp.float32),
        grid=grid,
        in_specs=in_specs,
        out_specs=pl.BlockSpec((tile_b, ART_POINT_COUNTS), lambda i: (i, 0)),
        compiler_params=pltpu.CompilerParams(
            dimension_semantics=("parallel",),      # shard batch over v7x's 2 TCs
            vmem_limit_bytes=32 * 1024 * 1024,      # ~10 MiB actual footprint @2048
        ),
        cost_estimate=pl.CostEstimate(
            flops=flops, transcendentals=0, bytes_accessed=bytes_accessed),
    )(*flat_args)

    return out_padded[:batch, :]


if __name__ == "__main__":
    key = jax.random.PRNGKey(0)
    pkey, xkey = jax.random.split(key)

    params = init_generator_params(pkey)
    packed = pack_generator_params(params)

    # Large enough to take the Pallas path (>= MIN_PALLAS_BATCH) but still tiny
    # data (512 x 20 f32 = 40 KB).
    batch = 512
    x = jax.random.normal(xkey, (batch, RANDOM_NUM_COUNT), dtype=jnp.float32)

    out = generator_forward(x, packed)
    out = jax.block_until_ready(out)

    ref = _reference_forward(x, packed)
    assert out.shape == (batch, ART_POINT_COUNTS)
    assert jnp.allclose(out, ref, atol=1e-3, rtol=1e-3)

    # Small-batch fallback path (plain jnp, same bf16/f32 math) sanity check.
    out_small = jax.block_until_ready(generator_forward(x[:8], packed))
    assert out_small.shape == (8, ART_POINT_COUNTS)
    assert jnp.allclose(out_small, ref[:8], atol=1e-3, rtol=1e-3)

    print("KERNEL_OK")
</pallas_src>

<mosaic_0001>
module attributes {stable_mosaic.version = 11 : i64} {
  func.func @_generator_kernel(%arg0: i32, %arg1: memref<512x20xbf16, #tpu.memory_space<vmem>>, %arg2: memref<20x128xbf16, #tpu.memory_space<vmem>>, %arg3: memref<1x128xf32, #tpu.memory_space<vmem>>, %arg4: memref<128x256xbf16, #tpu.memory_space<vmem>>, %arg5: memref<1x256xf32, #tpu.memory_space<vmem>>, %arg6: memref<256x256xbf16, #tpu.memory_space<vmem>>, %arg7: memref<1x256xf32, #tpu.memory_space<vmem>>, %arg8: memref<256x256xbf16, #tpu.memory_space<vmem>>, %arg9: memref<1x256xf32, #tpu.memory_space<vmem>>, %arg10: memref<256x20xbf16, #tpu.memory_space<vmem>>, %arg11: memref<1x20xf32, #tpu.memory_space<vmem>>, %arg12: memref<512x20xf32, #tpu.memory_space<vmem>>) attributes {dimension_semantics = [#tpu.dimension_semantics<parallel>], iteration_bounds = array<i64: 1>, scalar_prefetch = 0 : i64, scratch_operands = 0 : i64, tpu.core_type = #tpu.core_type<tc>, window_params = [{transform_indices = @transform_0, window_bounds = array<i64: 512, 20>}, {pipeline_mode = #tpu.pipeline_mode<synchronous>, transform_indices = @transform_1, window_bounds = array<i64: 20, 128>}, {pipeline_mode = #tpu.pipeline_mode<synchronous>, transform_indices = @transform_2, window_bounds = array<i64: 1, 128>}, {pipeline_mode = #tpu.pipeline_mode<synchronous>, transform_indices = @transform_3, window_bounds = array<i64: 128, 256>}, {pipeline_mode = #tpu.pipeline_mode<synchronous>, transform_indices = @transform_4, window_bounds = array<i64: 1, 256>}, {pipeline_mode = #tpu.pipeline_mode<synchronous>, transform_indices = @transform_5, window_bounds = array<i64: 256, 256>}, {pipeline_mode = #tpu.pipeline_mode<synchronous>, transform_indices = @transform_6, window_bounds = array<i64: 1, 256>}, {pipeline_mode = #tpu.pipeline_mode<synchronous>, transform_indices = @transform_7, window_bounds = array<i64: 256, 256>}, {pipeline_mode = #tpu.pipeline_mode<synchronous>, transform_indices = @transform_8, window_bounds = array<i64: 1, 256>}, {pipeline_mode = #tpu.pipeline_mode<synchronous>, transform_indices = @transform_9, window_bounds = array<i64: 256, 20>}, {pipeline_mode = #tpu.pipeline_mode<synchronous>, transform_indices = @transform_10, window_bounds = array<i64: 1, 20>}, {transform_indices = @transform_11, window_bounds = array<i64: 512, 20>}]} {
    %c0 = arith.constant 0 : index
    %c0_0 = arith.constant 0 : index
    %0 = vector.load %arg1[%c0, %c0_0] : memref<512x20xbf16, #tpu.memory_space<vmem>>, vector<512x20xbf16>
    %c0_1 = arith.constant 0 : index
    %c0_2 = arith.constant 0 : index
    %1 = vector.load %arg2[%c0_1, %c0_2] : memref<20x128xbf16, #tpu.memory_space<vmem>>, vector<20x128xbf16>
    %cst = arith.constant dense<0.000000e+00> : vector<512x128xf32>
    %2 = tpu.matmul %0, %1, %cst {dimension_numbers = #tpu.dot_dimension_numbers<[1], [0], [0], [1], [0, 0, 1, 1], [], []>} : vector<512x20xbf16>, vector<20x128xbf16>, vector<512x128xf32> -> vector<512x128xf32>
    %c0_3 = arith.constant 0 : index
    %c0_4 = arith.constant 0 : index
    %3 = vector.load %arg3[%c0_3, %c0_4] : memref<1x128xf32, #tpu.memory_space<vmem>>, vector<1x128xf32>
    %4 = vector.broadcast %3 : vector<1x128xf32> to vector<512x128xf32>
    %5 = arith.addf %2, %4 : vector<512x128xf32>
    %cst_5 = arith.constant 0.000000e+00 : f32
    %6 = vector.broadcast %cst_5 : f32 to vector<512x128xf32>
    %7 = arith.maximumf %5, %6 : vector<512x128xf32>
    %8 = arith.truncf %7 : vector<512x128xf32> to vector<512x128xbf16>
    %c0_6 = arith.constant 0 : index
    %c0_7 = arith.constant 0 : index
    %9 = vector.load %arg4[%c0_6, %c0_7] : memref<128x256xbf16, #tpu.memory_space<vmem>>, vector<128x256xbf16>
    %cst_8 = arith.constant dense<0.000000e+00> : vector<512x256xf32>
    %10 = tpu.matmul %8, %9, %cst_8 {dimension_numbers = #tpu.dot_dimension_numbers<[1], [0], [0], [1], [0, 0, 1, 1], [], []>} : vector<512x128xbf16>, vector<128x256xbf16>, vector<512x256xf32> -> vector<512x256xf32>
    %c0_9 = arith.constant 0 : index
    %c0_10 = arith.constant 0 : index
    %11 = vector.load %arg5[%c0_9, %c0_10] : memref<1x256xf32, #tpu.memory_space<vmem>>, vector<1x256xf32>
    %12 = vector.broadcast %11 : vector<1x256xf32> to vector<512x256xf32>
    %13 = arith.addf %10, %12 : vector<512x256xf32>
    %cst_11 = arith.constant 0.000000e+00 : f32
    %14 = vector.broadcast %cst_11 : f32 to vector<512x256xf32>
    %15 = arith.maximumf %13, %14 : vector<512x256xf32>
    %16 = arith.truncf %15 : vector<512x256xf32> to vector<512x256xbf16>
    %c0_12 = arith.constant 0 : index
    %c0_13 = arith.constant 0 : index
    %17 = vector.load %arg6[%c0_12, %c0_13] : memref<256x256xbf16, #tpu.memory_space<vmem>>, vector<256x256xbf16>
    %cst_14 = arith.constant dense<0.000000e+00> : vector<512x256xf32>
    %18 = tpu.matmul %16, %17, %cst_14 {dimension_numbers = #tpu.dot_dimension_numbers<[1], [0], [0], [1], [0, 0, 1, 1], [], []>} : vector<512x256xbf16>, vector<256x256xbf16>, vector<512x256xf32> -> vector<512x256xf32>
    %c0_15 = arith.constant 0 : index
    %c0_16 = arith.constant 0 : index
    %19 = vector.load %arg7[%c0_15, %c0_16] : memref<1x256xf32, #tpu.memory_space<vmem>>, vector<1x256xf32>
    %20 = vector.broadcast %19 : vector<1x256xf32> to vector<512x256xf32>
    %21 = arith.addf %18, %20 : vector<512x256xf32>
    %cst_17 = arith.constant 0.000000e+00 : f32
    %22 = vector.broadcast %cst_17 : f32 to vector<512x256xf32>
    %23 = arith.maximumf %21, %22 : vector<512x256xf32>
    %24 = arith.truncf %23 : vector<512x256xf32> to vector<512x256xbf16>
    %c0_18 = arith.constant 0 : index
    %c0_19 = arith.constant 0 : index
    %25 = vector.load %arg8[%c0_18, %c0_19] : memref<256x256xbf16, #tpu.memory_space<vmem>>, vector<256x256xbf16>
    %cst_20 = arith.constant dense<0.000000e+00> : vector<512x256xf32>
    %26 = tpu.matmul %24, %25, %cst_20 {dimension_numbers = #tpu.dot_dimension_numbers<[1], [0], [0], [1], [0, 0, 1, 1], [], []>} : vector<512x256xbf16>, vector<256x256xbf16>, vector<512x256xf32> -> vector<512x256xf32>
    %c0_21 = arith.constant 0 : index
    %c0_22 = arith.constant 0 : index
    %27 = vector.load %arg9[%c0_21, %c0_22] : memref<1x256xf32, #tpu.memory_space<vmem>>, vector<1x256xf32>
    %28 = vector.broadcast %27 : vector<1x256xf32> to vector<512x256xf32>
    %29 = arith.addf %26, %28 : vector<512x256xf32>
    %cst_23 = arith.constant 0.000000e+00 : f32
    %30 = vector.broadcast %cst_23 : f32 to vector<512x256xf32>
    %31 = arith.maximumf %29, %30 : vector<512x256xf32>
    %32 = arith.truncf %31 : vector<512x256xf32> to vector<512x256xbf16>
    %c0_24 = arith.constant 0 : index
    %c0_25 = arith.constant 0 : index
    %33 = vector.load %arg10[%c0_24, %c0_25] : memref<256x20xbf16, #tpu.memory_space<vmem>>, vector<256x20xbf16>
    %cst_26 = arith.constant dense<0.000000e+00> : vector<512x20xf32>
    %34 = tpu.matmul %32, %33, %cst_26 {dimension_numbers = #tpu.dot_dimension_numbers<[1], [0], [0], [1], [0, 0, 1, 1], [], []>} : vector<512x256xbf16>, vector<256x20xbf16>, vector<512x20xf32> -> vector<512x20xf32>
    %c0_27 = arith.constant 0 : index
    %c0_28 = arith.constant 0 : index
    %35 = vector.load %arg11[%c0_27, %c0_28] : memref<1x20xf32, #tpu.memory_space<vmem>>, vector<1x20xf32>
    %36 = vector.broadcast %35 : vector<1x20xf32> to vector<512x20xf32>
    %37 = arith.addf %34, %36 : vector<512x20xf32>
    %c0_29 = arith.constant 0 : index
    %c0_30 = arith.constant 0 : index
    %38 = vector.load %arg12[%c0_29, %c0_30] : memref<512x20xf32, #tpu.memory_space<vmem>>, vector<512x20xf32>
    tpu.vector_store %arg12[%c0_29, %c0_30], %37 {strides = array<i32>} : memref<512x20xf32, #tpu.memory_space<vmem>>, vector<512x20xf32>,
    return
  }
  func.func @transform_0(%arg0: i32) -> (i32, i32) {
    %c0_i32 = arith.constant 0 : i32
    %c0_i32_0 = arith.constant 0 : i32
    return %arg0, %c0_i32 : i32, i32
  }
  func.func @transform_1(%arg0: i32) -> (i32, i32) {
    %c0_i32 = arith.constant 0 : i32
    %c0_i32_0 = arith.constant 0 : i32
    %c0_i32_1 = arith.constant 0 : i32
    return %c0_i32, %c0_i32_0 : i32, i32
  }
  func.func @transform_2(%arg0: i32) -> (i32, i32) {
    %c0_i32 = arith.constant 0 : i32
    %c0_i32_0 = arith.constant 0 : i32
    %c0_i32_1 = arith.constant 0 : i32
    return %c0_i32, %c0_i32_0 : i32, i32
  }
  func.func @transform_3(%arg0: i32) -> (i32, i32) {
    %c0_i32 = arith.constant 0 : i32
    %c0_i32_0 = arith.constant 0 : i32
    %c0_i32_1 = arith.constant 0 : i32
    return %c0_i32, %c0_i32_0 : i32, i32
  }
  func.func @transform_4(%arg0: i32) -> (i32, i32) {
    %c0_i32 = arith.constant 0 : i32
    %c0_i32_0 = arith.constant 0 : i32
    %c0_i32_1 = arith.constant 0 : i32
    return %c0_i32, %c0_i32_0 : i32, i32
  }
  func.func @transform_5(%arg0: i32) -> (i32, i32) {
    %c0_i32 = arith.constant 0 : i32
    %c0_i32_0 = arith.constant 0 : i32
    %c0_i32_1 = arith.constant 0 : i32
    return %c0_i32, %c0_i32_0 : i32, i32
  }
  func.func @transform_6(%arg0: i32) -> (i32, i32) {
    %c0_i32 = arith.constant 0 : i32
    %c0_i32_0 = arith.constant 0 : i32
    %c0_i32_1 = arith.constant 0 : i32
    return %c0_i32, %c0_i32_0 : i32, i32
  }
  func.func @transform_7(%arg0: i32) -> (i32, i32) {
    %c0_i32 = arith.constant 0 : i32
    %c0_i32_0 = arith.constant 0 : i32
    %c0_i32_1 = arith.constant 0 : i32
    return %c0_i32, %c0_i32_0 : i32, i32
  }
  func.func @transform_8(%arg0: i32) -> (i32, i32) {
    %c0_i32 = arith.constant 0 : i32
    %c0_i32_0 = arith.constant 0 : i32
    %c0_i32_1 = arith.constant 0 : i32
    return %c0_i32, %c0_i32_0 : i32, i32
  }
  func.func @transform_9(%arg0: i32) -> (i32, i32) {
    %c0_i32 = arith.constant 0 : i32
    %c0_i32_0 = arith.constant 0 : i32
    %c0_i32_1 = arith.constant 0 : i32
    return %c0_i32, %c0_i32_0 : i32, i32
  }
  func.func @transform_10(%arg0: i32) -> (i32, i32) {
    %c0_i32 = arith.constant 0 : i32
    %c0_i32_0 = arith.constant 0 : i32
    %c0_i32_1 = arith.constant 0 : i32
    return %c0_i32, %c0_i32_0 : i32, i32
  }
  func.func @transform_11(%arg0: i32) -> (i32, i32) {
    %c0_i32 = arith.constant 0 : i32
    %c0_i32_0 = arith.constant 0 : i32
    return %arg0, %c0_i32 : i32, i32
  }
}

</mosaic_0001>

<bundles_post_ra>
// kernel: tpu_custom_call.1
= control target key start
LH: loop header
LB: loop body
LE: loop exit
PB: predicated region body
PF: predicated region fallthrough
CT: control target
= control target key end

     0   :  { %16 = vsyncpa [#allocation3], 0  ;;  %s3894_s17 = smov [#allocation2]   ;;  %s5225_s0 = inlined_call_operand.vmem [shape: bf16[512,20], index: 0, kind: input, shape index: {}]   ;;  %s5226_s1 = inlined_call_operand.vmem [shape: bf16[20,128], index: 1, kind: input, shape index: {}]   ;;  %s5227_s2 = inlined_call_operand.vmem [shape: f32[1,128], index: 2, kind: input, shape index: {}]   ;;  %s5228_s3 = inlined_call_operand.vmem [shape: bf16[128,256], index: 3, kind: input, shape index: {}]   ;;  %s5229_s4 = inlined_call_operand.vmem [shape: f32[1,256], index: 4, kind: input, shape index: {}]   ;;  %s5230_s5 = inlined_call_operand.vmem [shape: bf16[256,256], index: 5, kind: input, shape index: {}]   ;;  %s5231_s6 = inlined_call_operand.vmem [shape: f32[1,256], index: 6, kind: input, shape index: {}]   ;;  %s5232_s7 = inlined_call_operand.hbm [shape: bf16[256,256], index: 7, kind: input, shape index: {}]   ;;  %s5233_s8 = inlined_call_operand.vmem [shape: f32[1,256], index: 8, kind: input, shape index: {}]   ;;  %s5234_s9 = inlined_call_operand.vmem [shape: bf16[256,20], index: 9, kind: input, shape index: {}]   ;;  %s5235_s10 = inlined_call_operand.vmem [shape: f32[1,20], index: 10, kind: input, shape index: {}]   ;;  %s5236_s11 = inlined_call_operand.vmem [shape: f32[512,20], index: 11, kind: output, shape index: {}]  }
   0x1   :  { %s36_s18 = sshll.u32 %s3894_s17, 4  ;;  %s37_s18 = int_to_ptr.vmem [resolvable:$true] %s36_s18 }
   0x2   :  { %s3880_s19 = scalar_lea.vmem %s37_s18, 4096  ;;  %p3885_p1 = scmp.lt.s32.totalorder %s37_s18, %s37_s18 }
   0x3   :  { %p3881_p0 = scmp.ne.s32.totalorder %s37_s18, %s3880_s19  ;;  %p3886_p2 = scmp.lt.s32.totalorder %s3880_s19, %s3880_s19 }
   0x5   :  { %p3887_p3 = por %p3886_p2, %p3885_p1 }
   0x7   :  { %p3888_p4 = pnand %p3887_p3, %p3881_p0 }
   0x9   :  { %3891 = shalt.err (!%p3888_p4)
}
   0xa   :  { %s3895_s20 = smov 128   ;;  %s3896_s21 = smov 8  }
   0xb   :  { %42 = dma.hbm_to_vmem [thread:$0]  %s5232_s7, 4096, %s37_s18, [#allocation3], %s3895_s20, %s3895_s20, %s3896_s21  }
   0xc   :  { %3892 = dma.done.wait [#allocation3], 4096  }
   0xd   :  { %3893 = vsyncadd [#allocation3], 4294963200  ;;  %vm393_vm0 = vcmask 1041408   ;;  %vm296_vm1 = vcmask 162816   ;;  %v3703_v1 = vld [vmem:[%s5226_s1] sm:$0xff]   ;;  %v3705_v4 = vld [vmem:[%s5225_s0 + $0x8] sm:$0xff]  }
   0xe   :  { %v3702_v0 = vld [vmem:[%s5226_s1 + $0x8] ss:$0 sps:$4 sm:$0x33]   ;;  %v3704_v3 = vld [vmem:[%s5225_s0] sm:$0xff]   ;;  %v3706_v5 = vld [vmem:[%s5225_s0 + $0x10] sm:$0xff]   ;;  %v3897_v51 = vmov 0  }
   0xf   :  { %3696 = vmatprep.subr.msk.bf16.mxu0 %vm393_vm0, %v3702_v0  ;;  %v395_v2 = vsel %vm393_vm0, %v3702_v0, 0  ;;  %3697 = vmatprep.subr.msk.bf16.mxu1 %vm393_vm0, %v3702_v0  ;;  %v3707_v6 = vld [vmem:[%s5225_s0 + $0x18] sm:$0xff]   ;;  %v3708_v7 = vld [vmem:[%s5225_s0 + $0x20] sm:$0xff]   ;;  %v3721_v9 = vld [vmem:[%s5225_s0 + $0x88] sm:$0xff]  }
  0x10   :  { %3625 = vmatpush3.bf16.msra.mxu0 %v395_v2  ;;  %3694 = vmatpush3.bf16.msra.mxu1 %v395_v2  ;;  %v3720_v8 = vld [vmem:[%s5225_s0 + $0x80] sm:$0xff]   ;;  %v3709_v10 = vld [vmem:[%s5225_s0 + $0x28] sm:$0xff]   ;;  %v3722_v11 = vld [vmem:[%s5225_s0 + $0x90] sm:$0xff]  }
  0x11   :  { %3626 = vmatprep.subr.bf16.mxu0 %v3703_v1  ;;  %3628 = vmatprep.mubr.msk.bf16.mxu0 %vm296_vm1, %v3704_v3  ;;  %v3710_v12 = vld [vmem:[%s5225_s0 + $0x30] sm:$0xff]   ;;  %v3723_v15 = vld [vmem:[%s5225_s0 + $0x98] sm:$0xff]   ;;  %v3729_v16 = vld [vmem:[%s5228_s3 + $0x64] ss:$8 sps:$4 sm:$0xff]  }
  0x12   :  { %3693 = vmatprep.subr.bf16.mxu1 %v3703_v1  ;;  %3660 = vmatprep.mubr.msk.bf16.mxu1 %vm296_vm1, %v3720_v8  ;;  %v3724_v13 = vld [vmem:[%s5228_s3 + $0x70] ss:$8 sps:$4 sm:$0xff]   ;;  %v3726_v14 = vld [vmem:[%s5228_s3 + $0x74] ss:$8 sps:$4 sm:$0xff]   ;;  %v3727_v17 = vld [vmem:[%s5228_s3 + $0x60] ss:$8 sps:$4 sm:$0xff]  }
  0x13   :  { %v3730_v18 = vld [vmem:[%s5225_s0 + $0xa0] sm:$0xff]   ;;  %v3734_v19 = vld [vmem:[%s5228_s3 + $0x54] ss:$8 sps:$4 sm:$0xff]   ;;  %v3732_v22 = vld [vmem:[%s5228_s3 + $0x50] ss:$8 sps:$4 sm:$0xff]  }
  0x14   :  { %3627 = vmatpush3.bf16.msra.mxu0 %v3703_v1  ;;  %3695 = vmatpush3.bf16.msra.mxu1 %v3703_v1  ;;  %v3711_v20 = vld [vmem:[%s5225_s0 + $0x38] sm:$0xff]   ;;  %v3712_v21 = vld [vmem:[%s5225_s0 + $0x40] sm:$0xff]   ;;  %v3731_v24 = vld [vmem:[%s5225_s0 + $0xa8] sm:$0xff]  }
  0x15   :  { %890 = vmatprep.subr.bf16.mxu1 %v3726_v14  ;;  %v3739_v23 = vld [vmem:[%s5228_s3 + $0x44] ss:$8 sps:$4 sm:$0xff]   ;;  %v3735_v25 = vld [vmem:[%s5225_s0 + $0xb0] sm:$0xff]   ;;  %v3737_v26 = vld [vmem:[%s5228_s3 + $0x40] ss:$8 sps:$4 sm:$0xff]  }
  0x16   :  { %v3744_v27 = vld [vmem:[%s5228_s3 + $0x34] ss:$8 sps:$4 sm:$0xff]   ;;  %v3713_v28 = vld [vmem:[%s5225_s0 + $0x48] sm:$0xff]   ;;  %v3742_v30 = vld [vmem:[%s5228_s3 + $0x30] ss:$8 sps:$4 sm:$0xff]  }
  0x17   :  { %3629 = vmatmul.mubr.msk.bf16.vlgmr.msra.gmra.mxu0 %vm296_vm1, %v3705_v4  ;;  %3661 = vmatmul.mubr.msk.bf16.vlgmr.msra.gmra.mxu1 %vm296_vm1, %v3721_v9  ;;  %v3714_v29 = vld [vmem:[%s5225_s0 + $0x50] sm:$0xff]   ;;  %v3749_v31 = vld [vmem:[%s5228_s3 + $0x24] ss:$8 sps:$4 sm:$0xff]   ;;  %v3736_v32 = vld [vmem:[%s5225_s0 + $0xb8] sm:$0xff]  }
  0x18   :  { %3632 = vmatprep.mubr.msk.bf16.mxu0 %vm296_vm1, %v3706_v5  ;;  %3664 = vmatprep.mubr.msk.bf16.mxu1 %vm296_vm1, %v3722_v11  ;;  %v3740_v33 = vld [vmem:[%s5225_s0 + $0xc0] sm:$0xff]   ;;  %v3754_v35 = vld [vmem:[%s5228_s3 + $0x14] ss:$8 sps:$4 sm:$0xff]   ;;  %v3752_v37 = vld [vmem:[%s5228_s3 + $0x10] ss:$8 sps:$4 sm:$0xff]  }
  0x19   :  { %891 = vmatpush1.bf16.msra.mxu1 %v3724_v13  ;;  %v3747_v34 = vld [vmem:[%s5228_s3 + $0x20] ss:$8 sps:$4 sm:$0xff]   ;;  %v3715_v36 = vld [vmem:[%s5225_s0 + $0x58] sm:$0xff]   ;;  %v3745_v40 = vld [vmem:[%s5225_s0 + $0xd0] sm:$0xff]  }
  0x1a   :  { %892 = vmatprep.subr.bf16.mxu1 %v3729_v16  ;;  %v3716_v38 = vld [vmem:[%s5225_s0 + $0x60] sm:$0xff]   ;;  %v3741_v39 = vld [vmem:[%s5225_s0 + $0xc8] sm:$0xff]   ;;  %v3718_v42 = vld [vmem:[%s5225_s0 + $0x70] sm:$0xff]  }
  0x1b   :  { %v3717_v41 = vld [vmem:[%s5225_s0 + $0x68] sm:$0xff]   ;;  %v3746_v43 = vld [vmem:[%s5225_s0 + $0xd8] sm:$0xff]   ;;  %v3750_v44 = vld [vmem:[%s5225_s0 + $0xe0] sm:$0xff]  }
  0x1c   :  { %v3719_v45 = vld [vmem:[%s5225_s0 + $0x78] sm:$0xff]   ;;  %v3751_v46 = vld [vmem:[%s5225_s0 + $0xe8] sm:$0xff]   ;;  %v3755_v47 = vld [vmem:[%s5225_s0 + $0xf0] sm:$0xff]  }
  0x1d   :  { %893 = vmatpush1.bf16.msra.mxu1 %v3727_v17  ;;  %v3756_v48 = vld [vmem:[%s5225_s0 + $0xf8] sm:$0xff]   ;;  %v3759_v49 = vld [vmem:[%s5228_s3 + $0x4] ss:$8 sps:$4 sm:$0xff]   ;;  %v3757_v50 = vld [vmem:[%s5228_s3] ss:$8 sps:$4 sm:$0xff]  }
  0x1e   :  { %894 = vmatprep.subr.bf16.mxu1 %v3734_v19  ;;  %v4147_v54 = vld [vmem:[%s5227_s2] ss:$0 sm:$0xff]  ;;  %v3762_v11 = vld [vmem:[%s5230_s5 + $0x74] ss:$8 sps:$4 sm:$0xff]  }
  0x1f   :  { %3633 = vmatmul.mubr.msk.bf16.gmra.mxu0 %vm296_vm1, %v3707_v6  ;;  %3665 = vmatmul.mubr.msk.bf16.gmra.mxu1 %vm296_vm1, %v3723_v15  ;;  %v3763_v19 = vld [vmem:[%s5230_s5 + $0x60] ss:$8 sps:$4 sm:$0xff]  }
  0x20   :  { %3636 = vmatprep.mubr.msk.bf16.mxu0 %vm296_vm1, %v3708_v7  ;;  %3668 = vmatprep.mubr.msk.bf16.mxu1 %vm296_vm1, %v3730_v18 }
  0x21   :  { %895 = vmatpush1.bf16.msra.mxu1 %v3732_v22  ;;  %1639 = vmatprep.subr.bf16.mxu0 %v3762_v11  ;;  %v3796_v11 = vld [vmem:[%s5230_s5 + $0xd0] ss:$8 sps:$4 sm:$0xff]  }
  0x22   :  { %896 = vmatprep.subr.bf16.mxu1 %v3739_v23 }
  0x25   :  { %897 = vmatpush1.bf16.msra.mxu1 %v3737_v26 }
  0x26   :  { %898 = vmatprep.subr.bf16.mxu1 %v3744_v27 }
  0x27   :  { %3637 = vmatmul.mubr.msk.bf16.gmra.mxu0 %vm296_vm1, %v3709_v10  ;;  %3669 = vmatmul.mubr.msk.bf16.gmra.mxu1 %vm296_vm1, %v3731_v24  ;;  %v3760_v10 = vld [vmem:[%s5230_s5 + $0x70] ss:$8 sps:$4 sm:$0xff]  }
  0x28   :  { %3640 = vmatprep.mubr.msk.bf16.mxu0 %vm296_vm1, %v3710_v12  ;;  %3672 = vmatprep.mubr.msk.bf16.mxu1 %vm296_vm1, %v3735_v25  ;;  %v3766_v25 = vld [vmem:[%s5230_s5 + $0x50] ss:$8 sps:$4 sm:$0xff]  }
  0x29   :  { %899 = vmatpush1.bf16.msra.mxu1 %v3742_v30  ;;  %1640 = vmatpush1.bf16.msra.mxu0 %v3760_v10  ;;  %v3769_v30 = vld [vmem:[%s5230_s5 + $0x40] ss:$8 sps:$4 sm:$0xff]  }
  0x2a   :  { %900 = vmatprep.subr.bf16.mxu1 %v3749_v31  ;;  %v3771_v31 = vld [vmem:[%s5230_s5 + $0x44] ss:$8 sps:$4 sm:$0xff]  }
  0x2d   :  { %901 = vmatpush1.bf16.msra.mxu1 %v3747_v34 }
  0x2e   :  { %902 = vmatprep.subr.bf16.mxu1 %v3754_v35 }
  0x2f   :  { %3641 = vmatmul.mubr.msk.bf16.gmra.mxu0 %vm296_vm1, %v3711_v20  ;;  %3673 = vmatmul.mubr.msk.bf16.gmra.mxu1 %vm296_vm1, %v3736_v32  ;;  %v3765_v20 = vld [vmem:[%s5230_s5 + $0x64] ss:$8 sps:$4 sm:$0xff]   ;;  %v3772_v32 = vld [vmem:[#allocation2 + $0x70] ss:$8 sps:$4 sm:$0xff]  }
  0x30   :  { %3644 = vmatprep.mubr.msk.bf16.mxu0 %vm296_vm1, %v3712_v21  ;;  %3676 = vmatprep.mubr.msk.bf16.mxu1 %vm296_vm1, %v3740_v33  ;;  %v3768_v21 = vld [vmem:[%s5230_s5 + $0x54] ss:$8 sps:$4 sm:$0xff]  }
  0x31   :  { %903 = vmatpush1.bf16.msra.mxu1 %v3752_v37  ;;  %1641 = vmatprep.subr.bf16.mxu0 %v3765_v20  ;;  %v3774_v33 = vld [vmem:[#allocation2 + $0x74] ss:$8 sps:$4 sm:$0xff]  }
  0x32   :  { %904 = vmatprep.subr.bf16.mxu1 %v3759_v49  ;;  %1642 = vmatpush1.bf16.msra.mxu0 %v3763_v19  ;;  %v3781_v49 = vld [vmem:[%s5230_s5 + $0x10] ss:$8 sps:$4 sm:$0xff]   ;;  %v3804_v19 = vld [vmem:[#allocation2 + $0x54] ss:$8 sps:$4 sm:$0xff]  }
  0x33   :  { %1643 = vmatprep.subr.bf16.mxu0 %v3768_v21 }
  0x35   :  { %905 = vmatpush1.bf16.msra.mxu1 %v3757_v50 }
  0x36   :  { %1644 = vmatpush1.bf16.msra.mxu0 %v3766_v25  ;;  %2388 = vmatprep.subr.bf16.mxu1 %v3774_v33 }
  0x37   :  { %3645 = vmatmul.mubr.msk.bf16.gmra.mxu0 %vm296_vm1, %v3713_v28  ;;  %3677 = vmatmul.mubr.msk.bf16.gmra.mxu1 %vm296_vm1, %v3741_v39 }
  0x38   :  { %3648 = vmatprep.mubr.msk.bf16.mxu0 %vm296_vm1, %v3714_v29  ;;  %3680 = vmatprep.mubr.msk.bf16.mxu1 %vm296_vm1, %v3745_v40 }
  0x39   :  { %1645 = vmatprep.subr.bf16.mxu0 %v3771_v31 }
  0x3a   :  { %1646 = vmatpush1.bf16.msra.mxu0 %v3769_v30  ;;  %v3808_v30 = vld [vmem:[%s5230_s5 + $0xa0] ss:$8 sps:$4 sm:$0xff]  }
  0x3f   :  { %3649 = vmatmul.mubr.msk.bf16.gmra.mxu0 %vm296_vm1, %v3715_v36  ;;  %3681 = vmatmul.mubr.msk.bf16.gmra.mxu1 %vm296_vm1, %v3746_v43  ;;  %v3777_v36 = vld [vmem:[%s5230_s5 + $0x34] ss:$8 sps:$4 sm:$0xff]   ;;  %v3778_v43 = vld [vmem:[%s5230_s5 + $0x20] ss:$8 sps:$4 sm:$0xff]  }
  0x40   :  { %3652 = vmatprep.mubr.msk.bf16.mxu0 %vm296_vm1, %v3716_v38  ;;  %3684 = vmatprep.mubr.msk.bf16.mxu1 %vm296_vm1, %v3750_v44  ;;  %v3775_v38 = vld [vmem:[%s5230_s5 + $0x30] ss:$8 sps:$4 sm:$0xff]   ;;  %v3780_v44 = vld [vmem:[%s5230_s5 + $0x24] ss:$8 sps:$4 sm:$0xff]  }
  0x41   :  { %1647 = vmatprep.subr.bf16.mxu0 %v3777_v36 }
  0x42   :  { %1648 = vmatpush1.bf16.msra.mxu0 %v3775_v38 }
  0x43   :  { %1649 = vmatprep.subr.bf16.mxu0 %v3780_v44 }
  0x46   :  { %1650 = vmatpush1.bf16.msra.mxu0 %v3778_v43 }
  0x47   :  { %3653 = vmatmul.mubr.msk.bf16.gmra.mxu0 %vm296_vm1, %v3717_v41  ;;  %3685 = vmatmul.mubr.msk.bf16.gmra.mxu1 %vm296_vm1, %v3751_v46 }
  0x48   :  { %3656 = vmatprep.mubr.msk.bf16.mxu0 %vm296_vm1, %v3718_v42  ;;  %3688 = vmatprep.mubr.msk.bf16.mxu1 %vm296_vm1, %v3755_v47 }
  0x4f   :  { %3657 = vmatmul.mubr.msk.bf16.gmra.mxu0 %vm296_vm1, %v3719_v45  ;;  %3689 = vmatmul.mubr.msk.bf16.gmra.mxu1 %vm296_vm1, %v3756_v48  ;;  %v3783_v45 = vld [vmem:[%s5230_s5 + $0x14] ss:$8 sps:$4 sm:$0xff]  }
  0x50   :  { %922 = vmatprep.mubr.bf16.mxu1 %v3897_v51  ;;  %1651 = vmatprep.subr.bf16.mxu0 %v3783_v45 }
  0x51   :  { %1652 = vmatpush1.bf16.msra.mxu0 %v3781_v49 }
  0xd7   :  { %v3630_v52 = vpop.f32.mrf.mxu0 }
  0xd8   :  { %v440_v2 = vadd.f32 %v3630_v52, %v4147_v54 }
  0xd9   :  { %v431_v53 = vpop.f32.mrf.mxu0 }
  0xda   :  { %v432_v56 = vadd.f32 %v4147_v54, %v431_v53  ;;  %v688_v5 = vmax.f32 %v440_v2, 0.0 }
  0xdb   :  { %v3631_v55 = vpop.f32.mrf.mxu0 }
  0xdc   :  { %v686_v60 = vmax.f32 %v432_v56, 0.0  ;;  %v443_v63 = vadd.f32 %v3631_v55, %v4147_v54  ;;  %v3784_v56 = vld [vmem:[%s5230_s5] ss:$8 sps:$4 sm:$0xff]  }
  0xdd   :  { %v434_v57 = vpop.f32.mrf.mxu0 }
  0xde   :  { %v435_v58 = vadd.f32 %v4147_v54, %v434_v57  ;;  %v689_v3 = vmax.f32 %v443_v63, 0.0  ;;  %v3786_v57 = vld [vmem:[%s5230_s5 + $0x4] ss:$8 sps:$4 sm:$0xff]  }
  0xdf   :  { %v3634_v59 = vpop.f32.mrf.mxu0  ;;  %1653 = vmatprep.subr.bf16.mxu0 %v3786_v57 }
  0xe0   :  { %v687_v61 = vmax.f32 %v435_v58, 0.0  ;;  %v751_v6 = vpack.c.bf16 %v689_v3, %v688_v5  ;;  %v456_v15 = vadd.f32 %v3634_v59, %v4147_v54  ;;  %v3787_v58 = vld [vmem:[#allocation2 + $0x60] ss:$8 sps:$4 sm:$0xff]   ;;  %v3789_v59 = vld [vmem:[#allocation2 + $0x64] ss:$8 sps:$4 sm:$0xff]   ;;  %1654 = vmatpush1.bf16.msra.mxu0 %v3784_v56 }
  0xe1   :  { %v447_v62 = vpop.f32.mrf.mxu0  ;;  %v3793_v5 = vld [vmem:[%s5230_s5 + $0xe0] ss:$8 sps:$4 sm:$0xff]  }
  0xe2   :  { %v750_v0 = vpack.c.bf16 %v687_v61, %v686_v60  ;;  %v448_v7 = vadd.f32 %v4147_v54, %v447_v62  ;;  %v692_v22 = vmax.f32 %v456_v15, 0.0  ;;  %v3792_v62 = vld [vmem:[%s5230_s5 + $0xf4] ss:$8 sps:$4 sm:$0xff]  }
  0xe3   :  { %v3635_v1 = vpop.f32.mrf.mxu0  ;;  %1655 = vmatprep.subr.bf16.mxu0 %v3792_v62 }
  0xe4   :  { %923 = vmatmul.mubr.bf16.vlgmr.msra.gmra.mxu1 %v750_v0  ;;  %v690_v12 = vmax.f32 %v448_v7, 0.0  ;;  %v459_v16 = vadd.f32 %v3635_v1, %v4147_v54  ;;  %v3790_v0 = vld [vmem:[%s5230_s5 + $0xf0] ss:$8 sps:$4 sm:$0xff]   ;;  %v3798_v7 = vld [vmem:[%s5230_s5 + $0xd4] ss:$8 sps:$4 sm:$0xff]  }
  0xe5   :  { %932 = vmatprep.mubr.bf16.mxu1 %v3897_v51  ;;  %v450_v4 = vpop.f32.mrf.mxu0  ;;  %2389 = vmatpush1.bf16.msra.mxu1 %v3772_v32 }
  0xe6   :  { %v451_v8 = vadd.f32 %v4147_v54, %v450_v4  ;;  %v693_v23 = vmax.f32 %v459_v16, 0.0  ;;  %2390 = vmatprep.subr.bf16.mxu1 %v3789_v59  ;;  %1656 = vmatpush2.bf16.msra.mxu0 %v3790_v0  ;;  %v3799_v16 = vld [vmem:[%s5230_s5 + $0xc0] ss:$8 sps:$4 sm:$0xff]  }
  0xe7   :  { %v3638_v9 = vpop.f32.mrf.mxu0 }
  0xe8   :  { %v691_v13 = vmax.f32 %v451_v8, 0.0  ;;  %v753_v26 = vpack.c.bf16 %v693_v23, %v692_v22  ;;  %v472_v39 = vadd.f32 %v3638_v9, %v4147_v54  ;;  %v3807_v22 = vld [vmem:[%s5230_s5 + $0xb4] ss:$8 sps:$4 sm:$0xff]  }
  0xe9   :  { %v463_v14 = vpop.f32.mrf.mxu0  ;;  %2391 = vmatpush1.bf16.msra.mxu1 %v3787_v58 }
  0xea   :  { %v752_v17 = vpack.c.bf16 %v691_v13, %v690_v12  ;;  %v464_v27 = vadd.f32 %v4147_v54, %v463_v14  ;;  %v696_v46 = vmax.f32 %v472_v39, 0.0  ;;  %2392 = vmatprep.subr.bf16.mxu1 %v3804_v19  ;;  %v4270_v39 = vpop.f32.mrf.mxu1 }
  0xeb   :  { %v3639_v18 = vpop.f32.mrf.mxu0 }
  0xec   :  { %933 = vmatmul.mubr.bf16.gmra.mxu1 %v751_v6  ;;  %v694_v34 = vmax.f32 %v464_v27, 0.0  ;;  %v475_v40 = vadd.f32 %v3639_v18, %v4147_v54  ;;  %v3795_v6 = vld [vmem:[%s5230_s5 + $0xe4] ss:$8 sps:$4 sm:$0xff]   ;;  %v3802_v18 = vld [vmem:[#allocation2 + $0x50] ss:$8 sps:$4 sm:$0xff]   ;;  %v4279_v45 = vpop.f32.mrf.mxu1 }
  0xed   :  { %942 = vmatprep.mubr.bf16.mxu1 %v3897_v51  ;;  %v466_v24 = vpop.f32.mrf.mxu0  ;;  %1657 = vmatprep.subr.bf16.mxu0 %v3795_v6  ;;  %v3820_v6 = vld [vmem:[#allocation2 + $0x30] ss:$8 sps:$4 sm:$0xff]  }
  0xee   :  { %v467_v28 = vadd.f32 %v4147_v54, %v466_v24  ;;  %v697_v47 = vmax.f32 %v475_v40, 0.0  ;;  %1658 = vmatpush2.bf16.msra.mxu0 %v3793_v5  ;;  %v3805_v24 = vld [vmem:[%s5230_s5 + $0xb0] ss:$8 sps:$4 sm:$0xff]   ;;  %2393 = vmatpush1.bf16.msra.mxu1 %v3802_v18 }
  0xef   :  { %v3642_v29 = vpop.f32.mrf.mxu0  ;;  %1659 = vmatprep.subr.bf16.mxu0 %v3798_v7  ;;  %v3822_v7 = vld [vmem:[#allocation2 + $0x34] ss:$8 sps:$4 sm:$0xff]  }
  0xf0   :  { %v695_v35 = vmax.f32 %v467_v28, 0.0  ;;  %v755_v50 = vpack.c.bf16 %v697_v47, %v696_v46  ;;  %v488_v1 = vadd.f32 %v3642_v29, %v4147_v54  ;;  %v3810_v29 = vld [vmem:[%s5230_s5 + $0xa4] ss:$8 sps:$4 sm:$0xff]   ;;  %v3817_v47 = vld [vmem:[#allocation2 + $0x40] ss:$8 sps:$4 sm:$0xff]  }
  0xf1   :  { %v479_v37 = vpop.f32.mrf.mxu0 }
  0xf2   :  { %v754_v41 = vpack.c.bf16 %v695_v35, %v694_v34  ;;  %v480_v52 = vadd.f32 %v4147_v54, %v479_v37  ;;  %v700_v8 = vmax.f32 %v488_v1, 0.0  ;;  %1660 = vmatpush2.bf16.msra.mxu0 %v3796_v11  ;;  %v3813_v34 = vld [vmem:[%s5230_s5 + $0x94] ss:$8 sps:$4 sm:$0xff]   ;;  %v3811_v35 = vld [vmem:[%s5230_s5 + $0x90] ss:$8 sps:$4 sm:$0xff]  }
  0xf3   :  { %v3643_v42 = vpop.f32.mrf.mxu0 }
  0xf4   :  { %943 = vmatmul.mubr.bf16.gmra.mxu1 %v752_v17  ;;  %v698_v60 = vmax.f32 %v480_v52, 0.0  ;;  %v491_v2 = vadd.f32 %v3643_v42, %v4147_v54  ;;  %v3801_v17 = vld [vmem:[%s5230_s5 + $0xc4] ss:$8 sps:$4 sm:$0xff]   ;;  %v3814_v42 = vld [vmem:[%s5230_s5 + $0x80] ss:$8 sps:$4 sm:$0xff]  }
  0xf5   :  { %952 = vmatprep.mubr.bf16.mxu1 %v3897_v51  ;;  %v482_v48 = vpop.f32.mrf.mxu0  ;;  %1661 = vmatprep.subr.bf16.mxu0 %v3801_v17 }
  0xf6   :  { %v483_v53 = vadd.f32 %v4147_v54, %v482_v48  ;;  %v701_v9 = vmax.f32 %v491_v2, 0.0  ;;  %1662 = vmatpush2.bf16.msra.mxu0 %v3799_v16  ;;  %v3819_v48 = vld [vmem:[#allocation2 + $0x44] ss:$8 sps:$4 sm:$0xff]  }
  0xf7   :  { %v3646_v55 = vpop.f32.mrf.mxu0  ;;  %1663 = vmatprep.subr.bf16.mxu0 %v3807_v22  ;;  %2394 = vmatprep.subr.bf16.mxu1 %v3819_v48 }
  0xf8   :  { %v699_v61 = vmax.f32 %v483_v53, 0.0  ;;  %v757_v12 = vpack.c.bf16 %v701_v9, %v700_v8  ;;  %v504_v25 = vadd.f32 %v3646_v55, %v4147_v54  ;;  %v4284_v53 = vpop.f32.mrf.mxu1  ;;  %2395 = vmatpush1.bf16.msra.mxu1 %v3817_v47 }
  0xf9   :  { %v495_v63 = vpop.f32.mrf.mxu0  ;;  %2396 = vmatprep.subr.bf16.mxu1 %v3822_v7 }
  0xfa   :  { %v756_v3 = vpack.c.bf16 %v699_v61, %v698_v60  ;;  %v496_v13 = vadd.f32 %v4147_v54, %v495_v63  ;;  %1664 = vmatpush2.bf16.msra.mxu0 %v3805_v24  ;;  %v704_v31 = vmax.f32 %v504_v25, 0.0  ;;  %v562_v58 = vpop.f32.mrf.mxu1  ;;  %v3823_v24 = vld [vmem:[#allocation2 + $0x20] ss:$8 sps:$4 sm:$0xff]   ;;  %v3825_v25 = vld [vmem:[#allocation2 + $0x24] ss:$8 sps:$4 sm:$0xff]  }
  0xfb   :  { %v3647_v4 = vpop.f32.mrf.mxu0  ;;  %1665 = vmatprep.subr.bf16.mxu0 %v3810_v29 }
  0xfc   :  { %953 = vmatmul.mubr.bf16.gmra.mxu1 %v753_v26  ;;  %v702_v20 = vmax.f32 %v496_v13, 0.0  ;;  %v507_v26 = vadd.f32 %v3647_v4, %v4147_v54  ;;  %v4287_v60 = vpop.f32.mrf.mxu1 }
  0xfd   :  { %962 = vmatprep.mubr.bf16.mxu1 %v3897_v51  ;;  %v498_v10 = vpop.f32.mrf.mxu0  ;;  %2397 = vmatpush1.bf16.msra.mxu1 %v3820_v6 }
  0xfe   :  { %v499_v14 = vadd.f32 %v4147_v54, %v498_v10  ;;  %v705_v32 = vmax.f32 %v507_v26, 0.0  ;;  %1666 = vmatpush2.bf16.msra.mxu0 %v3808_v30  ;;  %v4291_v1 = vpop.f32.mrf.mxu1  ;;  %2398 = vmatprep.subr.bf16.mxu1 %v3825_v25 }
  0xff   :  { %v3650_v15 = vpop.f32.mrf.mxu0  ;;  %1667 = vmatprep.subr.bf16.mxu0 %v3813_v34  ;;  %v560_v34 = vadd.f32 %v4147_v54, %v4279_v45 }
 0x100   :  { %v703_v21 = vmax.f32 %v499_v14, 0.0  ;;  %v759_v36 = vpack.c.bf16 %v705_v32, %v704_v31  ;;  %v520_v49 = vadd.f32 %v3650_v15, %v4147_v54  ;;  %v4294_v5 = vpop.f32.mrf.mxu1 }
 0x101   :  { %v511_v23 = vpop.f32.mrf.mxu0  ;;  %2399 = vmatpush1.bf16.msra.mxu1 %v3823_v24 }
 0x102   :  { %v758_v27 = vpack.c.bf16 %v703_v21, %v702_v20  ;;  %v512_v37 = vadd.f32 %v4147_v54, %v511_v23  ;;  %1668 = vmatpush2.bf16.msra.mxu0 %v3811_v35  ;;  %v708_v56 = vmax.f32 %v520_v49, 0.0  ;;  %v563_v35 = vadd.f32 %v4147_v54, %v562_v58  ;;  %v3829_v58 = vld [vmem:[#allocation2] ss:$8 sps:$4 sm:$0xff]  }
 0x103   :  { %v3651_v28 = vpop.f32.mrf.mxu0 }
 0x104   :  { %963 = vmatmul.mubr.bf16.gmra.mxu1 %v754_v41  ;;  %v3816_v41 = vld [vmem:[%s5230_s5 + $0x84] ss:$8 sps:$4 sm:$0xff]   ;;  %v706_v43 = vmax.f32 %v512_v37, 0.0  ;;  %v718_v37 = vmax.f32 %v560_v34, 0.0 }
 0x105   :  { %972 = vmatprep.mubr.bf16.mxu1 %v3897_v51  ;;  %v514_v33 = vpop.f32.mrf.mxu0  ;;  %1669 = vmatprep.subr.bf16.mxu0 %v3816_v41  ;;  %v3826_v41 = vld [vmem:[#allocation2 + $0x10] ss:$8 sps:$4 sm:$0xff]  }
 0x106   :  { %v515_v38 = vadd.f32 %v4147_v54, %v514_v33  ;;  %1670 = vmatpush2.bf16.msra.mxu0 %v3814_v42  ;;  %v3828_v42 = vld [vmem:[#allocation2 + $0x14] ss:$8 sps:$4 sm:$0xff]  }
 0x107   :  { %v3654_v40 = vpop.f32.mrf.mxu0  ;;  %3068 = vmatprep.subr.bf16.mxu0 %v3897_v51  ;;  %2400 = vmatprep.subr.bf16.mxu1 %v3828_v42 }
 0x108   :  { %v707_v44 = vmax.f32 %v515_v38, 0.0  ;;  %v536_v8 = vadd.f32 %v3654_v40, %v4147_v54  ;;  %v719_v38 = vmax.f32 %v563_v35, 0.0  ;;  %2401 = vmatpush1.bf16.msra.mxu1 %v3826_v41 }
 0x109   :  { %v527_v46 = vpop.f32.mrf.mxu0 }
 0x10a   :  { %v760_v52 = vpack.c.bf16 %v707_v44, %v706_v43  ;;  %v528_v62 = vadd.f32 %v4147_v54, %v527_v46  ;;  %v712_v13 = vmax.f32 %v536_v8, 0.0  ;;  %v568_v43 = vadd.f32 %v4270_v39, %v4147_v54 }
 0x10b   :  { %v3655_v55 = vpop.f32.mrf.mxu0  ;;  %v571_v44 = vadd.f32 %v4284_v53, %v4147_v54  ;;  %v766_v45 = vpack.c.bf16 %v719_v38, %v718_v37 }
 0x10c   :  { %973 = vmatmul.mubr.bf16.gmra.mxu1 %v755_v50  ;;  %v523_v50 = vadd.f32 %v3651_v28, %v4147_v54  ;;  %v710_v2 = vmax.f32 %v528_v62, 0.0  ;;  %v539_v9 = vadd.f32 %v3655_v55, %v4147_v54  ;;  %v720_v47 = vmax.f32 %v568_v43, 0.0 }
 0x10d   :  { %982 = vmatprep.mubr.bf16.mxu1 %v3897_v51  ;;  %v530_v59 = vpop.f32.mrf.mxu0  ;;  %v721_v48 = vmax.f32 %v571_v44, 0.0  ;;  %v587_v62 = vadd.f32 %v4294_v5, %v4147_v54 }
 0x10e   :  { %v709_v57 = vmax.f32 %v523_v50, 0.0  ;;  %v531_v63 = vadd.f32 %v4147_v54, %v530_v59  ;;  %v713_v14 = vmax.f32 %v539_v9, 0.0  ;;  %v3831_v59 = vld [vmem:[#allocation2 + $0x4] ss:$8 sps:$4 sm:$0xff]  }
 0x10f   :  { %v3658_v0 = vpop.f32.mrf.mxu0  ;;  %v767_v50 = vpack.c.bf16 %v721_v48, %v720_v47  ;;  %2402 = vmatprep.subr.bf16.mxu1 %v3831_v59  ;;  %v3840_v47 = vld [vmem:[#allocation2 + $0xd4] ss:$8 sps:$4 sm:$0xff]  }
 0x110   :  { %v761_v61 = vpack.c.bf16 %v709_v57, %v708_v56  ;;  %v763_v17 = vpack.c.bf16 %v713_v14, %v712_v13  ;;  %v552_v26 = vadd.f32 %v3658_v0, %v4147_v54  ;;  %2403 = vmatpush1.bf16.msra.mxu1 %v3829_v58 }
 0x111   :  { %v543_v4 = vpop.f32.mrf.mxu0 }
 0x112   :  { %v544_v18 = vadd.f32 %v4147_v54, %v543_v4  ;;  %v716_v30 = vmax.f32 %v552_v26, 0.0  ;;  %v3835_v26 = vld [vmem:[#allocation2 + $0xe0] ss:$8 sps:$4 sm:$0xff]  }
 0x113   :  { %v3659_v11 = vpop.f32.mrf.mxu0 }
 0x114   :  { %983 = vmatmul.mubr.bf16.gmra.mxu1 %v756_v3  ;;  %v711_v3 = vmax.f32 %v531_v63, 0.0  ;;  %v714_v21 = vmax.f32 %v544_v18, 0.0 }
 0x115   :  { %992 = vmatprep.mubr.bf16.mxu1 %v3897_v51  ;;  %v546_v16 = vpop.f32.mrf.mxu0 }
 0x116   :  { %v762_v10 = vpack.c.bf16 %v711_v3, %v710_v2  ;;  %v547_v19 = vadd.f32 %v4147_v54, %v546_v16  ;;  %v725_v2 = vmax.f32 %v587_v62, 0.0 }
 0x118   :  { %v715_v22 = vmax.f32 %v547_v19, 0.0 }
 0x11a   :  { %v764_v28 = vpack.c.bf16 %v715_v22, %v714_v21 }
 0x11c   :  { %993 = vmatmul.mubr.bf16.gmra.mxu1 %v757_v12  ;;  %v578_v12 = vpop.f32.mrf.mxu1 }
 0x11d   :  { %1002 = vmatprep.mubr.bf16.mxu1 %v3897_v51  ;;  %v579_v39 = vadd.f32 %v4147_v54, %v578_v12 }
 0x11e   :  { %v4299_v15 = vpop.f32.mrf.mxu1 }
 0x11f   :  { %v723_v56 = vmax.f32 %v579_v39, 0.0  ;;  %v600_v12 = vadd.f32 %v4299_v15, %v4147_v54 }
 0x120   :  { %v4303_v20 = vpop.f32.mrf.mxu1 }
 0x121   :  { %v592_v6 = vadd.f32 %v4147_v54, %v4303_v20 }
 0x122   :  { %v4306_v23 = vpop.f32.mrf.mxu1 }
 0x123   :  { %v726_v5 = vmax.f32 %v592_v6, 0.0  ;;  %v603_v13 = vadd.f32 %v4306_v23, %v4147_v54 }
 0x124   :  { %1003 = vmatmul.mubr.bf16.gmra.mxu1 %v758_v27  ;;  %v555_v27 = vadd.f32 %v3659_v11, %v4147_v54  ;;  %v594_v29 = vpop.f32.mrf.mxu1  ;;  %v3834_v11 = vld [vmem:[#allocation2 + $0xf4] ss:$8 sps:$4 sm:$0xff]  }
 0x125   :  { %1012 = vmatprep.mubr.bf16.mxu1 %v3897_v51  ;;  %2404 = vmatprep.subr.bf16.mxu1 %v3834_v11  ;;  %v729_v18 = vmax.f32 %v603_v13, 0.0 }
 0x126   :  { %v717_v31 = vmax.f32 %v555_v27, 0.0  ;;  %v4311_v32 = vpop.f32.mrf.mxu1  ;;  %v3837_v27 = vld [vmem:[#allocation2 + $0xe4] ss:$8 sps:$4 sm:$0xff]  }
 0x128   :  { %v765_v33 = vpack.c.bf16 %v717_v31, %v716_v30 }
 0x12c   :  { %1013 = vmatmul.mubr.bf16.gmra.mxu1 %v759_v36  ;;  %v4316_v36 = vpop.f32.mrf.mxu1 }
 0x12d   :  { %1022 = vmatprep.mubr.bf16.mxu1 %v3897_v51  ;;  %v608_v21 = vadd.f32 %v4147_v54, %v4316_v36 }
 0x12e   :  { %v4319_v40 = vpop.f32.mrf.mxu1 }
 0x12f   :  { %v730_v23 = vmax.f32 %v608_v21, 0.0 }
 0x130   :  { %v610_v46 = vpop.f32.mrf.mxu1 }
 0x131   :  { %v611_v15 = vadd.f32 %v4147_v54, %v610_v46  ;;  %v3838_v46 = vld [vmem:[#allocation2 + $0xd0] ss:$8 sps:$4 sm:$0xff]  }
 0x132   :  { %v4326_v49 = vpop.f32.mrf.mxu1 }
 0x133   :  { %v731_v24 = vmax.f32 %v611_v15, 0.0  ;;  %v632_v48 = vadd.f32 %v4326_v49, %v4147_v54 }
 0x134   :  { %1023 = vmatmul.mubr.bf16.gmra.mxu1 %v760_v52  ;;  %v576_v52 = vadd.f32 %v4147_v54, %v4291_v1  ;;  %v4331_v55 = vpop.f32.mrf.mxu1 }
 0x135   :  { %1032 = vmatprep.mubr.bf16.mxu1 %v3897_v51  ;;  %v772_v30 = vpack.c.bf16 %v731_v24, %v730_v23  ;;  %v624_v37 = vadd.f32 %v4147_v54, %v4331_v55  ;;  %v736_v49 = vmax.f32 %v632_v48, 0.0  ;;  %v3841_v23 = vld [vmem:[#allocation2 + $0xc0] ss:$8 sps:$4 sm:$0xff]   ;;  %v3843_v24 = vld [vmem:[#allocation2 + $0xc4] ss:$8 sps:$4 sm:$0xff]  }
 0x136   :  { %v722_v53 = vmax.f32 %v576_v52, 0.0  ;;  %v4334_v57 = vpop.f32.mrf.mxu1 }
 0x137   :  { %v734_v41 = vmax.f32 %v624_v37, 0.0 }
 0x138   :  { %v768_v63 = vpack.c.bf16 %v723_v56, %v722_v53  ;;  %v626_v0 = vpop.f32.mrf.mxu1  ;;  %v798_v53 = vld [vmem:[%s5229_s4] sm:$0x3] }
 0x13a   :  { %v4341_v3 = vpop.f32.mrf.mxu1 }
 0x13c   :  { %1033 = vmatmul.mubr.bf16.gmra.mxu1 %v761_v61  ;;  %v584_v61 = vadd.f32 %v4287_v60, %v4147_v54  ;;  %v595_v60 = vadd.f32 %v4147_v54, %v594_v29  ;;  %v4346_v7 = vpop.f32.mrf.mxu1  ;;  %v619_v29 = vadd.f32 %v4319_v40, %v4147_v54  ;;  %v800_v40 = vlaneseq }
 0x13d   :  { %1042 = vmatprep.mubr.bf16.mxu1 %v3897_v51 }
 0x13e   :  { %v724_v1 = vmax.f32 %v584_v61, 0.0  ;;  %v727_v8 = vmax.f32 %v595_v60, 0.0  ;;  %v4349_v9 = vpop.f32.mrf.mxu1  ;;  %v733_v34 = vmax.f32 %v619_v29, 0.0  ;;  %v801_v44 = vshrl.u32 %v800_v40, 7 }
 0x140   :  { %v769_v4 = vpack.c.bf16 %v725_v2, %v724_v1  ;;  %v770_v14 = vpack.c.bf16 %v727_v8, %v726_v5  ;;  %v4355_v16 = vpop.f32.mrf.mxu1  ;;  %v4393_v55 = vsub.s32 0, %v801_v44  ;;  %v640_v2 = vadd.f32 %v4147_v54, %v4346_v7 }
 0x142   :  { %v4358_v19 = vpop.f32.mrf.mxu1  ;;  %v4403_v59 = vrot.slane %v798_v53, %v4393_v55  ;;  %v738_v13 = vmax.f32 %v640_v2, 0.0 }
 0x144   :  { %1043 = vmatmul.mubr.bf16.gmra.mxu1 %v762_v10  ;;  %v3832_v10 = vld [vmem:[#allocation2 + $0xf0] ss:$8 sps:$4 sm:$0xff]   ;;  %v4363_v22 = vpop.f32.mrf.mxu1 }
 0x145   :  { %1052 = vmatprep.mubr.bf16.mxu1 %v3897_v51  ;;  %2405 = vmatpush2.bf16.msra.mxu1 %v3832_v10 }
 0x146   :  { %v4366_v25 = vpop.f32.mrf.mxu1  ;;  %2406 = vmatprep.subr.bf16.mxu1 %v3837_v27  ;;  %v651_v27 = vadd.f32 %v4349_v9, %v4147_v54 }
 0x148   :  { %v4372_v31 = vpop.f32.mrf.mxu1  ;;  %v741_v40 = vmax.f32 %v651_v27, 0.0 }
 0x149   :  { %2407 = vmatpush2.bf16.msra.mxu1 %v3835_v26  ;;  %v648_v26 = vadd.f32 %v4341_v3, %v4147_v54 }
 0x14a   :  { %v4375_v35 = vpop.f32.mrf.mxu1  ;;  %2408 = vmatprep.subr.bf16.mxu1 %v3840_v47 }
 0x14b   :  { %v740_v3 = vmax.f32 %v648_v26, 0.0 }
 0x14c   :  { %1053 = vmatmul.mubr.bf16.gmra.mxu1 %v763_v17  ;;  %v728_v17 = vmax.f32 %v600_v12, 0.0  ;;  %v4380_v38 = vpop.f32.mrf.mxu1 }
 0x14d   :  { %1062 = vmatprep.mubr.bf16.mxu1 %v3897_v51  ;;  %2409 = vmatpush2.bf16.msra.mxu1 %v3838_v46 }
 0x14e   :  { %v771_v20 = vpack.c.bf16 %v729_v18, %v728_v17  ;;  %v4383_v43 = vpop.f32.mrf.mxu1  ;;  %2410 = vmatprep.subr.bf16.mxu1 %v3843_v24 }
 0x150   :  { %v4391_v39 = vpop.f32.mrf.mxu1 }
 0x151   :  { %2411 = vmatpush2.bf16.msra.mxu1 %v3841_v23 }
 0x154   :  { %1063 = vmatmul.mubr.bf16.gmra.mxu1 %v764_v28  ;;  %v616_v28 = vadd.f32 %v4311_v32, %v4147_v54  ;;  %v627_v32 = vadd.f32 %v4147_v54, %v626_v0 }
 0x155   :  { %1072 = vmatprep.mubr.bf16.mxu1 %v3897_v51 }
 0x156   :  { %v735_v42 = vmax.f32 %v627_v32, 0.0 }
 0x158   :  { %v774_v52 = vpack.c.bf16 %v735_v42, %v734_v41 }
 0x15c   :  { %1073 = vmatmul.mubr.bf16.gmra.mxu1 %v765_v33  ;;  %v732_v33 = vmax.f32 %v616_v28, 0.0 }
 0x15d   :  { %1082 = vmatprep.mubr.bf16.mxu1 %v3897_v51 }
 0x15e   :  { %v773_v36 = vpack.c.bf16 %v733_v34, %v732_v33 }
 0x164   :  { %1083 = vmatmul.mubr.bf16.gmra.mxu1 %v766_v45  ;;  %v4385_v45 = vsub.s32 1, %v801_v44 }
 0x165   :  { %1092 = vmatprep.mubr.bf16.mxu1 %v3897_v51 }
 0x166   :  { %v4399_v58 = vrot.slane %v798_v53, %v4385_v45  ;;  %v659_v53 = vadd.f32 %v4147_v54, %v4372_v31 }
 0x168   :  { %v743_v2 = vmax.f32 %v659_v53, 0.0 }
 0x16c   :  { %1093 = vmatmul.mubr.bf16.gmra.mxu1 %v767_v50  ;;  %v635_v50 = vadd.f32 %v4334_v57, %v4147_v54 }
 0x16d   :  { %1102 = vmatprep.mubr.bf16.mxu1 %v3897_v51 }
 0x16e   :  { %v737_v57 = vmax.f32 %v635_v50, 0.0  ;;  %v777_v50 = vpack.c.bf16 %v741_v40, %v740_v3 }
 0x170   :  { %v775_v1 = vpack.c.bf16 %v737_v57, %v736_v49 }
 0x174   :  { %1103 = vmatmul.mubr.bf16.gmra.mxu1 %v768_v63 }
 0x175   :  { %1112 = vmatprep.mubr.bf16.mxu1 %v3897_v51 }
 0x17c   :  { %1113 = vmatmul.mubr.bf16.gmra.mxu1 %v769_v4  ;;  %v643_v4 = vadd.f32 %v4147_v54, %v4355_v16 }
 0x17d   :  { %1122 = vmatprep.mubr.bf16.mxu1 %v3897_v51 }
 0x184   :  { %1123 = vmatmul.mubr.bf16.gmra.mxu1 %v770_v14  ;;  %v739_v14 = vmax.f32 %v643_v4, 0.0 }
 0x185   :  { %1132 = vmatprep.mubr.bf16.mxu1 %v3897_v51 }
 0x186   :  { %v776_v28 = vpack.c.bf16 %v739_v14, %v738_v13  ;;  %v667_v13 = vadd.f32 %v4366_v25, %v4147_v54 }
 0x188   :  { %v745_v23 = vmax.f32 %v667_v13, 0.0 }
 0x18c   :  { %1133 = vmatmul.mubr.bf16.gmra.mxu1 %v771_v20 }
 0x18d   :  { %1142 = vmatprep.mubr.bf16.mxu1 %v3897_v51 }
 0x194   :  { %1143 = vmatmul.mubr.bf16.gmra.mxu1 %v772_v30 }
 0x195   :  { %1152 = vmatprep.mubr.bf16.mxu1 %v3897_v51 }
 0x19c   :  { %1153 = vmatmul.mubr.bf16.gmra.mxu1 %v773_v36 }
 0x19d   :  { %1162 = vmatprep.mubr.bf16.mxu1 %v3897_v51 }
 0x1a4   :  { %v924_v56 = vpop.f32.mrf.mxu1  ;;  %1163 = vmatmul.mubr.bf16.gmra.mxu1 %v774_v52  ;;  %v656_v52 = vadd.f32 %v4147_v54, %v4363_v22 }
 0x1a5   :  { %1172 = vmatprep.mubr.bf16.mxu1 %v3897_v51  ;;  %v925_v6 = vadd.f32 %v924_v56, %v4403_v59 }
 0x1a6   :  { %v926_v61 = vpop.f32.mrf.mxu1 }
 0x1a7   :  { %v927_v63 = vadd.f32 %v926_v61, %v4399_v58  ;;  %v1243_v17 = vmax.f32 %v925_v6, 0.0 }
 0x1a8   :  { %v928_v62 = vpop.f32.mrf.mxu1 }
 0x1a9   :  { %v929_v0 = vadd.f32 %v928_v62, %v4403_v59  ;;  %v1244_v11 = vmax.f32 %v927_v63, 0.0 }
 0x1aa   :  { %v930_v60 = vpop.f32.mrf.mxu1 }
 0x1ab   :  { %v931_v5 = vadd.f32 %v930_v60, %v4399_v58  ;;  %v1245_v8 = vmax.f32 %v929_v0, 0.0 }
 0x1ac   :  { %v934_v10 = vpop.f32.mrf.mxu1  ;;  %1173 = vmatmul.mubr.bf16.gmra.mxu1 %v775_v1  ;;  %v742_v1 = vmax.f32 %v656_v52, 0.0 }
 0x1ad   :  { %v1246_v12 = vmax.f32 %v931_v5, 0.0  ;;  %1182 = vmatprep.mubr.bf16.mxu1 %v3897_v51  ;;  %v1371_v20 = vpack.c.bf16 %v1245_v8, %v1243_v17  ;;  %v935_v29 = vadd.f32 %v934_v10, %v4403_v59  ;;  %v3844_v10 = vld [vmem:[#allocation2 + $0xb0] ss:$8 sps:$4 sm:$0xff]  }
 0x1ae   :  { %v936_v18 = vpop.f32.mrf.mxu1  ;;  %v778_v14 = vpack.c.bf16 %v743_v2, %v742_v1 }
 0x1af   :  { %v1372_v7 = vpack.c.bf16 %v1246_v12, %v1244_v11  ;;  %v937_v16 = vadd.f32 %v936_v18, %v4399_v58  ;;  %v1247_v41 = vmax.f32 %v935_v29, 0.0  ;;  %v3846_v11 = vld [vmem:[#allocation2 + $0xb4] ss:$8 sps:$4 sm:$0xff]   ;;  %v664_v12 = vadd.f32 %v4358_v19, %v4147_v54 }
 0x1b0   :  { %v938_v21 = vpop.f32.mrf.mxu1  ;;  %2412 = vmatprep.subr.bf16.mxu1 %v3846_v11 }
 0x1b1   :  { %v939_v15 = vadd.f32 %v938_v21, %v4403_v59  ;;  %1671 = vmatprep.mubr.bf16.mxu0 %v1372_v7  ;;  %v1248_v37 = vmax.f32 %v937_v16, 0.0  ;;  %2413 = vmatpush2.bf16.msra.mxu1 %v3844_v10  ;;  %v744_v19 = vmax.f32 %v664_v12, 0.0 }
 0x1b2   :  { %v940_v30 = vpop.f32.mrf.mxu1  ;;  %1672 = vmatmul.mubr.bf16.vlgmr.msra.gmra.mxu0 %v1371_v20 }
 0x1b3   :  { %v941_v33 = vadd.f32 %v940_v30, %v4399_v58  ;;  %v1249_v34 = vmax.f32 %v939_v15, 0.0 }
 0x1b4   :  { %v944_v36 = vpop.f32.mrf.mxu1  ;;  %1183 = vmatmul.mubr.bf16.gmra.mxu1 %v776_v28 }
 0x1b5   :  { %v1250_v32 = vmax.f32 %v941_v33, 0.0  ;;  %1192 = vmatprep.mubr.bf16.mxu1 %v3897_v51  ;;  %v1373_v44 = vpack.c.bf16 %v1249_v34, %v1247_v41  ;;  %v945_v56 = vadd.f32 %v944_v36, %v4403_v59  ;;  %v779_v33 = vpack.c.bf16 %v745_v23, %v744_v19 }
 0x1b6   :  { %v946_v9 = vpop.f32.mrf.mxu1  ;;  %v672_v34 = vadd.f32 %v4147_v54, %v4380_v38  ;;  %v675_v36 = vadd.f32 %v4147_v54, %v4391_v39 }
 0x1b7   :  { %v1374_v42 = vpack.c.bf16 %v1250_v32, %v1248_v37  ;;  %v947_v47 = vadd.f32 %v946_v9, %v4399_v58  ;;  %v1251_v4 = vmax.f32 %v945_v56, 0.0  ;;  %v3847_v56 = vld [vmem:[%s5234_s9 + $0x38] sm:$0xff]  }
 0x1b8   :  { %v948_v46 = vpop.f32.mrf.mxu1  ;;  %3069 = vmatpush1.bf16.msra.mxu0 %v3847_v56 }
 0x1b9   :  { %v949_v48 = vadd.f32 %v948_v46, %v4403_v59  ;;  %1681 = vmatprep.mubr.bf16.mxu0 %v1374_v42  ;;  %v1252_v63 = vmax.f32 %v947_v47, 0.0  ;;  %v747_v46 = vmax.f32 %v675_v36, 0.0  ;;  %3070 = vmatprep.subr.bf16.mxu0 %v3897_v51 }
 0x1ba   :  { %v950_v49 = vpop.f32.mrf.mxu1  ;;  %1682 = vmatmul.mubr.bf16.gmra.mxu0 %v1373_v44  ;;  %v746_v44 = vmax.f32 %v672_v34, 0.0 }
 0x1bb   :  { %v951_v57 = vadd.f32 %v950_v49, %v4399_v58  ;;  %v1253_v61 = vmax.f32 %v949_v48, 0.0  ;;  %v3848_v49 = vld [vmem:[#allocation2 + $0xa0] ss:$8 sps:$4 sm:$0xff]  }
 0x1bc   :  { %v954_v62 = vpop.f32.mrf.mxu1  ;;  %1193 = vmatmul.mubr.bf16.gmra.mxu1 %v777_v50 }
 0x1bd   :  { %v1254_v0 = vmax.f32 %v951_v57, 0.0  ;;  %1202 = vmatprep.mubr.bf16.mxu1 %v3897_v51  ;;  %v1375_v60 = vpack.c.bf16 %v1253_v61, %v1251_v4  ;;  %v955_v17 = vadd.f32 %v954_v62, %v4403_v59  ;;  %v3850_v57 = vld [vmem:[#allocation2 + $0xa4] ss:$8 sps:$4 sm:$0xff]   ;;  %v680_v61 = vadd.f32 %v4375_v35, %v4147_v54 }
 0x1be   :  { %v956_v22 = vpop.f32.mrf.mxu1  ;;  %v683_v62 = vadd.f32 %v4383_v43, %v4147_v54  ;;  %2414 = vmatprep.subr.bf16.mxu1 %v3850_v57 }
 0x1bf   :  { %v1376_v6 = vpack.c.bf16 %v1254_v0, %v1252_v63  ;;  %v957_v5 = vadd.f32 %v956_v22, %v4399_v58  ;;  %v1255_v24 = vmax.f32 %v955_v17, 0.0  ;;  %v780_v63 = vpack.c.bf16 %v747_v46, %v746_v44  ;;  %2415 = vmatpush2.bf16.msra.mxu1 %v3848_v49 }
 0x1c0   :  { %v958_v31 = vpop.f32.mrf.mxu1  ;;  %v748_v54 = vmax.f32 %v680_v61, 0.0  ;;  %v749_v35 = vmax.f32 %v683_v62, 0.0 }
 0x1c1   :  { %v959_v8 = vadd.f32 %v958_v31, %v4403_v59  ;;  %1691 = vmatprep.mubr.bf16.mxu0 %v1376_v6  ;;  %v1256_v16 = vmax.f32 %v957_v5, 0.0 }
 0x1c2   :  { %v960_v18 = vpop.f32.mrf.mxu1  ;;  %1692 = vmatmul.mubr.bf16.gmra.mxu0 %v1375_v60  ;;  %v781_v13 = vpack.c.bf16 %v749_v35, %v748_v54 }
 0x1c3   :  { %v961_v7 = vadd.f32 %v960_v18, %v4399_v58  ;;  %v1257_v20 = vmax.f32 %v959_v8, 0.0 }
 0x1c4   :  { %v964_v21 = vpop.f32.mrf.mxu1  ;;  %1203 = vmatmul.mubr.bf16.gmra.mxu1 %v778_v14 }
 0x1c5   :  { %v1258_v15 = vmax.f32 %v961_v7, 0.0  ;;  %1212 = vmatprep.mubr.bf16.mxu1 %v3897_v51  ;;  %v1377_v27 = vpack.c.bf16 %v1257_v20, %v1255_v24  ;;  %v965_v37 = vadd.f32 %v964_v21, %v4403_v59 }
 0x1c6   :  { %v966_v25 = vpop.f32.mrf.mxu1 }
 0x1c7   :  { %v1378_v26 = vpack.c.bf16 %v1258_v15, %v1256_v16  ;;  %v967_v29 = vadd.f32 %v966_v25, %v4399_v58  ;;  %v1259_v47 = vmax.f32 %v965_v37, 0.0 }
 0x1c8   :  { %v968_v28 = vpop.f32.mrf.mxu1 }
 0x1c9   :  { %v969_v30 = vadd.f32 %v968_v28, %v4403_v59  ;;  %1701 = vmatprep.mubr.bf16.mxu0 %v1378_v26  ;;  %v1260_v9 = vmax.f32 %v967_v29, 0.0  ;;  %v3851_v28 = vld [vmem:[%s5234_s9 + $0x30] sm:$0xff]  }
 0x1ca   :  { %v970_v32 = vpop.f32.mrf.mxu1  ;;  %1702 = vmatmul.mubr.bf16.gmra.mxu0 %v1377_v27  ;;  %v3852_v29 = vld [vmem:[#allocation2 + $0x90] ss:$8 sps:$4 sm:$0xff]  }
 0x1cb   :  { %v971_v3 = vadd.f32 %v970_v32, %v4399_v58  ;;  %v1261_v40 = vmax.f32 %v969_v30, 0.0  ;;  %v3854_v30 = vld [vmem:[#allocation2 + $0x94] ss:$8 sps:$4 sm:$0xff]   ;;  %3071 = vmatpush1.bf16.msra.mxu0 %v3851_v28 }
 0x1cc   :  { %v974_v41 = vpop.f32.mrf.mxu1  ;;  %1213 = vmatmul.mubr.bf16.gmra.mxu1 %v779_v33  ;;  %2416 = vmatprep.subr.bf16.mxu1 %v3854_v30 }
 0x1cd   :  { %v1262_v42 = vmax.f32 %v971_v3, 0.0  ;;  %1222 = vmatprep.mubr.bf16.mxu1 %v3897_v51  ;;  %v1379_v50 = vpack.c.bf16 %v1261_v40, %v1259_v47  ;;  %v975_v0 = vadd.f32 %v974_v41, %v4403_v59  ;;  %2417 = vmatpush2.bf16.msra.mxu1 %v3852_v29 }
 0x1ce   :  { %v976_v38 = vpop.f32.mrf.mxu1  ;;  %3072 = vmatprep.subr.bf16.mxu0 %v3897_v51 }
 0x1cf   :  { %v1380_v48 = vpack.c.bf16 %v1262_v42, %v1260_v9  ;;  %v977_v52 = vadd.f32 %v976_v38, %v4399_v58  ;;  %v1263_v43 = vmax.f32 %v975_v0, 0.0 }
 0x1d0   :  { %v978_v39 = vpop.f32.mrf.mxu1 }
 0x1d1   :  { %v979_v53 = vadd.f32 %v978_v39, %v4403_v59  ;;  %1711 = vmatprep.mubr.bf16.mxu0 %v1380_v48  ;;  %v1264_v6 = vmax.f32 %v977_v52, 0.0 }
 0x1d2   :  { %v980_v1 = vpop.f32.mrf.mxu1  ;;  %1712 = vmatmul.mubr.bf16.gmra.mxu0 %v1379_v50 }
 0x1d3   :  { %v981_v2 = vadd.f32 %v980_v1, %v4399_v58  ;;  %v1265_v4 = vmax.f32 %v979_v53, 0.0 }
 0x1d4   :  { %v984_v22 = vpop.f32.mrf.mxu1  ;;  %1223 = vmatmul.mubr.bf16.gmra.mxu1 %v780_v63 }
 0x1d5   :  { %v1266_v60 = vmax.f32 %v981_v2, 0.0  ;;  %1232 = vmatprep.mubr.bf16.mxu1 %v3897_v51  ;;  %v1381_v8 = vpack.c.bf16 %v1265_v4, %v1263_v43  ;;  %v985_v14 = vadd.f32 %v984_v22, %v4403_v59  ;;  %v3855_v4 = vld [vmem:[%s5234_s9 + $0x28] sm:$0xff]  }
 0x1d6   :  { %v986_v31 = vpop.f32.mrf.mxu1  ;;  %v3856_v22 = vld [vmem:[#allocation2 + $0x80] ss:$8 sps:$4 sm:$0xff]   ;;  %3073 = vmatpush1.bf16.msra.mxu0 %v3855_v4 }
 0x1d7   :  { %v1382_v5 = vpack.c.bf16 %v1266_v60, %v1264_v6  ;;  %v987_v11 = vadd.f32 %v986_v31, %v4399_v58  ;;  %v1267_v15 = vmax.f32 %v985_v14, 0.0  ;;  %v3858_v6 = vld [vmem:[#allocation2 + $0x84] ss:$8 sps:$4 sm:$0xff]   ;;  %3074 = vmatprep.subr.bf16.mxu0 %v3897_v51 }
 0x1d8   :  { %v988_v10 = vpop.f32.mrf.mxu1  ;;  %2418 = vmatprep.subr.bf16.mxu1 %v3858_v6 }
 0x1d9   :  { %v989_v12 = vadd.f32 %v988_v10, %v4403_v59  ;;  %1721 = vmatprep.mubr.bf16.mxu0 %v1382_v5  ;;  %v1268_v21 = vmax.f32 %v987_v11, 0.0  ;;  %2419 = vmatpush2.bf16.msra.mxu1 %v3856_v22 }
 0x1da   :  { %v990_v17 = vpop.f32.mrf.mxu1  ;;  %1722 = vmatmul.mubr.bf16.gmra.mxu0 %v1381_v8 }
 0x1db   :  { %v991_v18 = vadd.f32 %v990_v17, %v4399_v58  ;;  %v1269_v7 = vmax.f32 %v989_v12, 0.0 }
 0x1dc   :  { %v994_v20 = vpop.f32.mrf.mxu1  ;;  %1233 = vmatmul.mubr.bf16.gmra.mxu1 %v781_v13 }
 0x1dd   :  { %v1270_v16 = vmax.f32 %v991_v18, 0.0  ;;  %v1383_v24 = vpack.c.bf16 %v1269_v7, %v1267_v15  ;;  %v995_v33 = vadd.f32 %v994_v20, %v4403_v59 }
 0x1de   :  { %v996_v19 = vpop.f32.mrf.mxu1 }
 0x1df   :  { %v1384_v23 = vpack.c.bf16 %v1270_v16, %v1268_v21  ;;  %v997_v26 = vadd.f32 %v996_v19, %v4399_v58  ;;  %v1271_v41 = vmax.f32 %v995_v33, 0.0 }
 0x1e0   :  { %v998_v25 = vpop.f32.mrf.mxu1 }
 0x1e1   :  { %v999_v27 = vadd.f32 %v998_v25, %v4403_v59  ;;  %1731 = vmatprep.mubr.bf16.mxu0 %v1384_v23  ;;  %v1272_v3 = vmax.f32 %v997_v26, 0.0 }
 0x1e2   :  { %v1000_v34 = vpop.f32.mrf.mxu1  ;;  %1732 = vmatmul.mubr.bf16.gmra.mxu0 %v1383_v24 }
 0x1e3   :  { %v1001_v36 = vadd.f32 %v1000_v34, %v4399_v58  ;;  %v1273_v37 = vmax.f32 %v999_v27, 0.0 }
 0x1e4   :  { %v1004_v32 = vpop.f32.mrf.mxu1 }
 0x1e5   :  { %v1274_v40 = vmax.f32 %v1001_v36, 0.0  ;;  %v1385_v44 = vpack.c.bf16 %v1273_v37, %v1271_v41  ;;  %v1005_v48 = vadd.f32 %v1004_v32, %v4403_v59  ;;  %v3859_v37 = vld [vmem:[%s5234_s9 + $0x20] sm:$0xff]  }
 0x1e6   :  { %v1006_v9 = vpop.f32.mrf.mxu1  ;;  %3075 = vmatpush1.bf16.msra.mxu0 %v3859_v37 }
 0x1e7   :  { %v1386_v42 = vpack.c.bf16 %v1274_v40, %v1272_v3  ;;  %v1007_v47 = vadd.f32 %v1006_v9, %v4399_v58  ;;  %v1275_v57 = vmax.f32 %v1005_v48, 0.0  ;;  %3076 = vmatprep.subr.bf16.mxu0 %v3897_v51 }
 0x1e8   :  { %v1008_v46 = vpop.f32.mrf.mxu1 }
 0x1e9   :  { %v1009_v38 = vadd.f32 %v1008_v46, %v4403_v59  ;;  %1741 = vmatprep.mubr.bf16.mxu0 %v1386_v42  ;;  %v1276_v56 = vmax.f32 %v1007_v47, 0.0 }
 0x1ea   :  { %v1010_v50 = vpop.f32.mrf.mxu1  ;;  %1742 = vmatmul.mubr.bf16.gmra.mxu0 %v1385_v44 }
 0x1eb   :  { %v1011_v39 = vadd.f32 %v1010_v50, %v4399_v58  ;;  %v1277_v52 = vmax.f32 %v1009_v38, 0.0 }
 0x1ec   :  { %v1014_v53 = vpop.f32.mrf.mxu1 }
 0x1ed   :  { %v1278_v49 = vmax.f32 %v1011_v39, 0.0  ;;  %v1387_v63 = vpack.c.bf16 %v1277_v52, %v1275_v57  ;;  %v1015_v60 = vadd.f32 %v1014_v53, %v4403_v59 }
 0x1ee   :  { %v1016_v61 = vpop.f32.mrf.mxu1 }
 0x1ef   :  { %v1388_v62 = vpack.c.bf16 %v1278_v49, %v1276_v56  ;;  %v1017_v1 = vadd.f32 %v1016_v61, %v4399_v58  ;;  %v1279_v10 = vmax.f32 %v1015_v60, 0.0 }
 0x1f0   :  { %v1018_v0 = vpop.f32.mrf.mxu1 }
 0x1f1   :  { %v1019_v2 = vadd.f32 %v1018_v0, %v4403_v59  ;;  %1751 = vmatprep.mubr.bf16.mxu0 %v1388_v62  ;;  %v1280_v5 = vmax.f32 %v1017_v1, 0.0 }
 0x1f2   :  { %v1020_v54 = vpop.f32.mrf.mxu1  ;;  %1752 = vmatmul.mubr.bf16.gmra.mxu0 %v1387_v63 }
 0x1f3   :  { %v1021_v35 = vadd.f32 %v1020_v54, %v4399_v58  ;;  %v1281_v43 = vmax.f32 %v1019_v2, 0.0  ;;  %v3860_v54 = vld [vmem:[%s5234_s9 + $0x18] sm:$0xff]  }
 0x1f4   :  { %v1024_v31 = vpop.f32.mrf.mxu1  ;;  %3077 = vmatpush1.bf16.msra.mxu0 %v3860_v54 }
 0x1f5   :  { %v1282_v8 = vmax.f32 %v1021_v35, 0.0  ;;  %v1389_v13 = vpack.c.bf16 %v1281_v43, %v1279_v10  ;;  %v1025_v7 = vadd.f32 %v1024_v31, %v4403_v59  ;;  %3078 = vmatprep.subr.bf16.mxu0 %v3897_v51 }
 0x1f6   :  { %v1026_v11 = vpop.f32.mrf.mxu1 }
 0x1f7   :  { %v1390_v12 = vpack.c.bf16 %v1282_v8, %v1280_v5  ;;  %v1027_v17 = vadd.f32 %v1026_v11, %v4399_v58  ;;  %v1283_v24 = vmax.f32 %v1025_v7, 0.0 }
 0x1f8   :  { %v1028_v14 = vpop.f32.mrf.mxu1 }
 0x1f9   :  { %v1029_v18 = vadd.f32 %v1028_v14, %v4403_v59  ;;  %1761 = vmatprep.mubr.bf16.mxu0 %v1390_v12  ;;  %v1284_v19 = vmax.f32 %v1027_v17, 0.0 }
 0x1fa   :  { %v1030_v20 = vpop.f32.mrf.mxu1  ;;  %1762 = vmatmul.mubr.bf16.gmra.mxu0 %v1389_v13 }
 0x1fb   :  { %v1031_v21 = vadd.f32 %v1030_v20, %v4399_v58  ;;  %v1285_v16 = vmax.f32 %v1029_v18, 0.0 }
 0x1fc   :  { %v1034_v15 = vpop.f32.mrf.mxu1 }
 0x1fd   :  { %v1286_v23 = vmax.f32 %v1031_v21, 0.0  ;;  %v1391_v27 = vpack.c.bf16 %v1285_v16, %v1283_v24  ;;  %v1035_v33 = vadd.f32 %v1034_v15, %v4403_v59 }
 0x1fe   :  { %v1036_v25 = vpop.f32.mrf.mxu1 }
 0x1ff   :  { %v1392_v26 = vpack.c.bf16 %v1286_v23, %v1284_v19  ;;  %v1037_v29 = vadd.f32 %v1036_v25, %v4399_v58  ;;  %v1287_v9 = vmax.f32 %v1035_v33, 0.0 }
 0x200   :  { %v1038_v28 = vpop.f32.mrf.mxu1 }
 0x201   :  { %v1039_v30 = vadd.f32 %v1038_v28, %v4403_v59  ;;  %1771 = vmatprep.mubr.bf16.mxu0 %v1392_v26  ;;  %v1288_v40 = vmax.f32 %v1037_v29, 0.0 }
 0x202   :  { %v1040_v34 = vpop.f32.mrf.mxu1  ;;  %1772 = vmatmul.mubr.bf16.gmra.mxu0 %v1391_v27 }
 0x203   :  { %v1041_v36 = vadd.f32 %v1040_v34, %v4399_v58  ;;  %v1289_v32 = vmax.f32 %v1039_v30, 0.0 }
 0x204   :  { %v1044_v3 = vpop.f32.mrf.mxu1 }
 0x205   :  { %v1290_v41 = vmax.f32 %v1041_v36, 0.0  ;;  %v1393_v46 = vpack.c.bf16 %v1289_v32, %v1287_v9  ;;  %v1045_v50 = vadd.f32 %v1044_v3, %v4403_v59  ;;  %v3861_v36 = vld [vmem:[%s5234_s9 + $0x10] sm:$0xff]  }
 0x206   :  { %v1046_v42 = vpop.f32.mrf.mxu1  ;;  %3079 = vmatpush1.bf16.msra.mxu0 %v3861_v36 }
 0x207   :  { %v1394_v44 = vpack.c.bf16 %v1290_v41, %v1288_v40  ;;  %v1047_v38 = vadd.f32 %v1046_v42, %v4399_v58  ;;  %v1291_v61 = vmax.f32 %v1045_v50, 0.0  ;;  %3080 = vmatprep.subr.bf16.mxu0 %v3897_v51 }
 0x208   :  { %v1048_v47 = vpop.f32.mrf.mxu1 }
 0x209   :  { %v1049_v48 = vadd.f32 %v1048_v47, %v4403_v59  ;;  %1781 = vmatprep.mubr.bf16.mxu0 %v1394_v44  ;;  %v1292_v49 = vmax.f32 %v1047_v38, 0.0 }
 0x20a   :  { %v1050_v39 = vpop.f32.mrf.mxu1  ;;  %1782 = vmatmul.mubr.bf16.gmra.mxu0 %v1393_v46 }
 0x20b   :  { %v1051_v52 = vadd.f32 %v1050_v39, %v4399_v58  ;;  %v1293_v53 = vmax.f32 %v1049_v48, 0.0 }
 0x20c   :  { %v1054_v56 = vpop.f32.mrf.mxu1 }
 0x20d   :  { %v1294_v57 = vmax.f32 %v1051_v52, 0.0  ;;  %v1395_v0 = vpack.c.bf16 %v1293_v53, %v1291_v61  ;;  %v1055_v22 = vadd.f32 %v1054_v56, %v4403_v59 }
 0x20e   :  { %v1056_v62 = vpop.f32.mrf.mxu1 }
 0x20f   :  { %v1396_v63 = vpack.c.bf16 %v1294_v57, %v1292_v49  ;;  %v1057_v2 = vadd.f32 %v1056_v62, %v4399_v58  ;;  %v1295_v8 = vmax.f32 %v1055_v22, 0.0 }
 0x210   :  { %v1058_v1 = vpop.f32.mrf.mxu1 }
 0x211   :  { %v1059_v4 = vadd.f32 %v1058_v1, %v4403_v59  ;;  %1791 = vmatprep.mubr.bf16.mxu0 %v1396_v63  ;;  %v1296_v31 = vmax.f32 %v1057_v2, 0.0 }
 0x212   :  { %v1060_v6 = vpop.f32.mrf.mxu1  ;;  %1792 = vmatmul.mubr.bf16.gmra.mxu0 %v1395_v0 }
 0x213   :  { %v1061_v60 = vadd.f32 %v1060_v6, %v4399_v58  ;;  %v1297_v35 = vmax.f32 %v1059_v4, 0.0 }
 0x214   :  { %v1064_v43 = vpop.f32.mrf.mxu1 }
 0x215   :  { %v1298_v5 = vmax.f32 %v1061_v60, 0.0  ;;  %v1397_v12 = vpack.c.bf16 %v1297_v35, %v1295_v8  ;;  %v1065_v18 = vadd.f32 %v1064_v43, %v4403_v59  ;;  %v3862_v60 = vld [vmem:[%s5234_s9 + $0x8] sm:$0xff]  }
 0x216   :  { %v1066_v10 = vpop.f32.mrf.mxu1  ;;  %3081 = vmatpush1.bf16.msra.mxu0 %v3862_v60 }
 0x217   :  { %v1398_v11 = vpack.c.bf16 %v1298_v5, %v1296_v31  ;;  %v1067_v14 = vadd.f32 %v1066_v10, %v4399_v58  ;;  %v1299_v23 = vmax.f32 %v1065_v18, 0.0  ;;  %3082 = vmatprep.subr.bf16.mxu0 %v3897_v51 }
 0x218   :  { %v1068_v13 = vpop.f32.mrf.mxu1 }
 0x219   :  { %v1069_v17 = vadd.f32 %v1068_v13, %v4403_v59  ;;  %1801 = vmatprep.mubr.bf16.mxu0 %v1398_v11  ;;  %v1300_v15 = vmax.f32 %v1067_v14, 0.0 }
 0x21a   :  { %v1070_v7 = vpop.f32.mrf.mxu1  ;;  %1802 = vmatmul.mubr.bf16.gmra.mxu0 %v1397_v12 }
 0x21b   :  { %v1071_v20 = vadd.f32 %v1070_v7, %v4399_v58  ;;  %v1301_v21 = vmax.f32 %v1069_v17, 0.0 }
 0x21c   :  { %v1074_v16 = vpop.f32.mrf.mxu1 }
 0x21d   :  { %v1302_v19 = vmax.f32 %v1071_v20, 0.0  ;;  %v1399_v26 = vpack.c.bf16 %v1301_v21, %v1299_v23  ;;  %v1075_v30 = vadd.f32 %v1074_v16, %v4403_v59 }
 0x21e   :  { %v1076_v24 = vpop.f32.mrf.mxu1 }
 0x21f   :  { %v1400_v25 = vpack.c.bf16 %v1302_v19, %v1300_v15  ;;  %v1077_v28 = vadd.f32 %v1076_v24, %v4399_v58  ;;  %v1303_v41 = vmax.f32 %v1075_v30, 0.0 }
 0x220   :  { %v1078_v27 = vpop.f32.mrf.mxu1 }
 0x221   :  { %v1079_v29 = vadd.f32 %v1078_v27, %v4403_v59  ;;  %1811 = vmatprep.mubr.bf16.mxu0 %v1400_v25  ;;  %v1304_v3 = vmax.f32 %v1077_v28, 0.0 }
 0x222   :  { %v1080_v33 = vpop.f32.mrf.mxu1  ;;  %1812 = vmatmul.mubr.bf16.gmra.mxu0 %v1399_v26 }
 0x223   :  { %v1081_v34 = vadd.f32 %v1080_v33, %v4399_v58  ;;  %v1305_v37 = vmax.f32 %v1079_v29, 0.0 }
 0x224   :  { %v1084_v32 = vpop.f32.mrf.mxu1 }
 0x225   :  { %v1306_v40 = vmax.f32 %v1081_v34, 0.0  ;;  %v1401_v44 = vpack.c.bf16 %v1305_v37, %v1303_v41  ;;  %v1085_v48 = vadd.f32 %v1084_v32, %v4403_v59  ;;  %v3863_v34 = vld [vmem:[%s5234_s9] sm:$0xff]  }
 0x226   :  { %v1086_v9 = vpop.f32.mrf.mxu1  ;;  %3083 = vmatpush1.bf16.msra.mxu0 %v3863_v34 }
 0x227   :  { %v1402_v42 = vpack.c.bf16 %v1306_v40, %v1304_v3  ;;  %v1087_v47 = vadd.f32 %v1086_v9, %v4399_v58  ;;  %v1307_v57 = vmax.f32 %v1085_v48, 0.0  ;;  %3084 = vmatprep.subr.bf16.mxu0 %v3897_v51 }
 0x228   :  { %v1088_v46 = vpop.f32.mrf.mxu1 }
 0x229   :  { %v1089_v38 = vadd.f32 %v1088_v46, %v4403_v59  ;;  %1821 = vmatprep.mubr.bf16.mxu0 %v1402_v42  ;;  %v1308_v56 = vmax.f32 %v1087_v47, 0.0 }
 0x22a   :  { %v1090_v50 = vpop.f32.mrf.mxu1  ;;  %1822 = vmatmul.mubr.bf16.gmra.mxu0 %v1401_v44 }
 0x22b   :  { %v1091_v39 = vadd.f32 %v1090_v50, %v4399_v58  ;;  %v1309_v52 = vmax.f32 %v1089_v38, 0.0 }
 0x22c   :  { %v1094_v53 = vpop.f32.mrf.mxu1 }
 0x22d   :  { %v1310_v49 = vmax.f32 %v1091_v39, 0.0  ;;  %v1403_v63 = vpack.c.bf16 %v1309_v52, %v1307_v57  ;;  %v1095_v4 = vadd.f32 %v1094_v53, %v4403_v59 }
 0x22e   :  { %v1096_v61 = vpop.f32.mrf.mxu1 }
 0x22f   :  { %v1404_v62 = vpack.c.bf16 %v1310_v49, %v1308_v56  ;;  %v1097_v1 = vadd.f32 %v1096_v61, %v4399_v58  ;;  %v1311_v5 = vmax.f32 %v1095_v4, 0.0 }
 0x230   :  { %v1098_v0 = vpop.f32.mrf.mxu1 }
 0x231   :  { %v1099_v2 = vadd.f32 %v1098_v0, %v4403_v59  ;;  %1831 = vmatprep.mubr.bf16.mxu0 %v1404_v62  ;;  %v1312_v43 = vmax.f32 %v1097_v1, 0.0 }
 0x232   :  { %v1100_v22 = vpop.f32.mrf.mxu1  ;;  %1832 = vmatmul.mubr.bf16.gmra.mxu0 %v1403_v63 }
 0x233   :  { %v1101_v6 = vadd.f32 %v1100_v22, %v4399_v58  ;;  %v1313_v54 = vmax.f32 %v1099_v2, 0.0 }
 0x234   :  { %v1104_v35 = vpop.f32.mrf.mxu1 }
 0x235   :  { %v1314_v31 = vmax.f32 %v1101_v6, 0.0  ;;  %v1405_v11 = vpack.c.bf16 %v1313_v54, %v1311_v5  ;;  %v1105_v17 = vadd.f32 %v1104_v35, %v4403_v59  ;;  %v3864_v6 = vld [vmem:[%s5234_s9 + $0x78] sm:$0xff]  }
 0x236   :  { %v1106_v8 = vpop.f32.mrf.mxu1  ;;  %3085 = vmatpush2.bf16.msra.mxu0 %v3864_v6 }
 0x237   :  { %v1406_v10 = vpack.c.bf16 %v1314_v31, %v1312_v43  ;;  %v1107_v13 = vadd.f32 %v1106_v8, %v4399_v58  ;;  %v1315_v19 = vmax.f32 %v1105_v17, 0.0  ;;  %3086 = vmatprep.subr.bf16.mxu0 %v3897_v51 }
 0x238   :  { %v1108_v12 = vpop.f32.mrf.mxu1 }
 0x239   :  { %v1109_v14 = vadd.f32 %v1108_v12, %v4403_v59  ;;  %1841 = vmatprep.mubr.bf16.mxu0 %v1406_v10  ;;  %v1316_v16 = vmax.f32 %v1107_v13, 0.0 }
 0x23a   :  { %v1110_v18 = vpop.f32.mrf.mxu1  ;;  %1842 = vmatmul.mubr.bf16.gmra.mxu0 %v1405_v11 }
 0x23b   :  { %v1111_v7 = vadd.f32 %v1110_v18, %v4399_v58  ;;  %v1317_v20 = vmax.f32 %v1109_v14, 0.0 }
 0x23c   :  { %v1114_v21 = vpop.f32.mrf.mxu1 }
 0x23d   :  { %v1318_v15 = vmax.f32 %v1111_v7, 0.0  ;;  %v1407_v25 = vpack.c.bf16 %v1317_v20, %v1315_v19  ;;  %v1115_v29 = vadd.f32 %v1114_v21, %v4403_v59 }
 0x23e   :  { %v1116_v23 = vpop.f32.mrf.mxu1 }
 0x23f   :  { %v1408_v24 = vpack.c.bf16 %v1318_v15, %v1316_v16  ;;  %v1117_v27 = vadd.f32 %v1116_v23, %v4399_v58  ;;  %v1319_v40 = vmax.f32 %v1115_v29, 0.0 }
 0x240   :  { %v1118_v26 = vpop.f32.mrf.mxu1 }
 0x241   :  { %v1119_v28 = vadd.f32 %v1118_v26, %v4403_v59  ;;  %1851 = vmatprep.mubr.bf16.mxu0 %v1408_v24  ;;  %v1320_v32 = vmax.f32 %v1117_v27, 0.0 }
 0x242   :  { %v1120_v30 = vpop.f32.mrf.mxu1  ;;  %1852 = vmatmul.mubr.bf16.gmra.mxu0 %v1407_v25 }
 0x243   :  { %v1121_v33 = vadd.f32 %v1120_v30, %v4399_v58  ;;  %v1321_v36 = vmax.f32 %v1119_v28, 0.0 }
 0x244   :  { %v1124_v37 = vpop.f32.mrf.mxu1 }
 0x245   :  { %v1322_v3 = vmax.f32 %v1121_v33, 0.0  ;;  %v1409_v42 = vpack.c.bf16 %v1321_v36, %v1319_v40  ;;  %v1125_v38 = vadd.f32 %v1124_v37, %v4403_v59  ;;  %v3865_v33 = vld [vmem:[%s5234_s9 + $0x70] sm:$0xff]  }
 0x246   :  { %v1126_v41 = vpop.f32.mrf.mxu1  ;;  %3087 = vmatpush2.bf16.msra.mxu0 %v3865_v33 }
 0x247   :  { %v1410_v9 = vpack.c.bf16 %v1322_v3, %v1320_v32  ;;  %v1127_v46 = vadd.f32 %v1126_v41, %v4399_v58  ;;  %v1323_v49 = vmax.f32 %v1125_v38, 0.0  ;;  %3088 = vmatprep.subr.bf16.mxu0 %v3897_v51 }
 0x248   :  { %v1128_v44 = vpop.f32.mrf.mxu1 }
 0x249   :  { %v1129_v47 = vadd.f32 %v1128_v44, %v4403_v59  ;;  %1861 = vmatprep.mubr.bf16.mxu0 %v1410_v9  ;;  %v1324_v53 = vmax.f32 %v1127_v46, 0.0 }
 0x24a   :  { %v1130_v48 = vpop.f32.mrf.mxu1  ;;  %1862 = vmatmul.mubr.bf16.gmra.mxu0 %v1409_v42 }
 0x24b   :  { %v1131_v50 = vadd.f32 %v1130_v48, %v4399_v58  ;;  %v1325_v39 = vmax.f32 %v1129_v47, 0.0 }
 0x24c   :  { %v1134_v52 = vpop.f32.mrf.mxu1 }
 0x24d   :  { %v1326_v56 = vmax.f32 %v1131_v50, 0.0  ;;  %v1411_v62 = vpack.c.bf16 %v1325_v39, %v1323_v49  ;;  %v1135_v2 = vadd.f32 %v1134_v52, %v4403_v59 }
 0x24e   :  { %v1136_v57 = vpop.f32.mrf.mxu1 }
 0x24f   :  { %v1412_v61 = vpack.c.bf16 %v1326_v56, %v1324_v53  ;;  %v1137_v0 = vadd.f32 %v1136_v57, %v4399_v58  ;;  %v1327_v31 = vmax.f32 %v1135_v2, 0.0 }
 0x250   :  { %v1138_v63 = vpop.f32.mrf.mxu1 }
 0x251   :  { %v1139_v1 = vadd.f32 %v1138_v63, %v4403_v59  ;;  %1871 = vmatprep.mubr.bf16.mxu0 %v1412_v61  ;;  %v1328_v35 = vmax.f32 %v1137_v0, 0.0 }
 0x252   :  { %v1140_v4 = vpop.f32.mrf.mxu1  ;;  %1872 = vmatmul.mubr.bf16.gmra.mxu0 %v1411_v62 }
 0x253   :  { %v1141_v22 = vadd.f32 %v1140_v4, %v4399_v58  ;;  %v1329_v60 = vmax.f32 %v1139_v1, 0.0  ;;  %v1467_v4 = vld [vmem:[%s5231_s6] sm:$0x3] }
 0x254   :  { %v1144_v54 = vpop.f32.mrf.mxu1 }
 0x255   :  { %v1330_v43 = vmax.f32 %v1141_v22, 0.0  ;;  %v1413_v10 = vpack.c.bf16 %v1329_v60, %v1327_v31  ;;  %v1145_v14 = vadd.f32 %v1144_v54, %v4403_v59  ;;  %v3866_v60 = vld [vmem:[%s5234_s9 + $0x68] sm:$0xff]  }
 0x256   :  { %v1146_v5 = vpop.f32.mrf.mxu1  ;;  %3089 = vmatpush2.bf16.msra.mxu0 %v3866_v60 }
 0x257   :  { %v1414_v8 = vpack.c.bf16 %v1330_v43, %v1328_v35  ;;  %v1147_v12 = vadd.f32 %v1146_v5, %v4399_v58  ;;  %v1331_v15 = vmax.f32 %v1145_v14, 0.0  ;;  %v4586_v43 = vrot.slane %v1467_v4, %v4385_v45  ;;  %3090 = vmatprep.subr.bf16.mxu0 %v3897_v51 }
 0x258   :  { %v1148_v11 = vpop.f32.mrf.mxu1 }
 0x259   :  { %v1149_v13 = vadd.f32 %v1148_v11, %v4403_v59  ;;  %1881 = vmatprep.mubr.bf16.mxu0 %v1414_v8  ;;  %v1332_v21 = vmax.f32 %v1147_v12, 0.0 }
 0x25a   :  { %v1150_v17 = vpop.f32.mrf.mxu1  ;;  %1882 = vmatmul.mubr.bf16.gmra.mxu0 %v1413_v10  ;;  %v4589_v10 = vrot.slane %v1467_v4, %v4393_v55 }
 0x25b   :  { %v1151_v18 = vadd.f32 %v1150_v17, %v4399_v58  ;;  %v1333_v7 = vmax.f32 %v1149_v13, 0.0 }
 0x25c   :  { %v1154_v20 = vpop.f32.mrf.mxu1 }
 0x25d   :  { %v1334_v16 = vmax.f32 %v1151_v18, 0.0  ;;  %v1415_v24 = vpack.c.bf16 %v1333_v7, %v1331_v15  ;;  %v1155_v28 = vadd.f32 %v1154_v20, %v4403_v59 }
 0x25e   :  { %v1156_v19 = vpop.f32.mrf.mxu1 }
 0x25f   :  { %v1416_v23 = vpack.c.bf16 %v1334_v16, %v1332_v21  ;;  %v1157_v26 = vadd.f32 %v1156_v19, %v4399_v58  ;;  %v1335_v3 = vmax.f32 %v1155_v28, 0.0 }
 0x260   :  { %v1158_v25 = vpop.f32.mrf.mxu1 }
 0x261   :  { %v1159_v27 = vadd.f32 %v1158_v25, %v4403_v59  ;;  %1891 = vmatprep.mubr.bf16.mxu0 %v1416_v23  ;;  %v1336_v37 = vmax.f32 %v1157_v26, 0.0 }
 0x262   :  { %v1160_v29 = vpop.f32.mrf.mxu1  ;;  %1892 = vmatmul.mubr.bf16.gmra.mxu0 %v1415_v24 }
 0x263   :  { %v1161_v30 = vadd.f32 %v1160_v29, %v4399_v58  ;;  %v1337_v34 = vmax.f32 %v1159_v27, 0.0 }
 0x264   :  { %v1164_v36 = vpop.f32.mrf.mxu1 }
 0x265   :  { %v1338_v32 = vmax.f32 %v1161_v30, 0.0  ;;  %v1417_v9 = vpack.c.bf16 %v1337_v34, %v1335_v3  ;;  %v1165_v47 = vadd.f32 %v1164_v36, %v4403_v59 }
 0x266   :  { %v1166_v40 = vpop.f32.mrf.mxu1 }
 0x267   :  { %v1418_v41 = vpack.c.bf16 %v1338_v32, %v1336_v37  ;;  %v1167_v44 = vadd.f32 %v1166_v40, %v4399_v58  ;;  %v1339_v56 = vmax.f32 %v1165_v47, 0.0 }
 0x268   :  { %v1168_v42 = vpop.f32.mrf.mxu1 }
 0x269   :  { %v1169_v46 = vadd.f32 %v1168_v42, %v4403_v59  ;;  %1901 = vmatprep.mubr.bf16.mxu0 %v1418_v41  ;;  %v1340_v52 = vmax.f32 %v1167_v44, 0.0 }
 0x26a   :  { %v1170_v38 = vpop.f32.mrf.mxu1  ;;  %1902 = vmatmul.mubr.bf16.gmra.mxu0 %v1417_v9 }
 0x26b   :  { %v1171_v48 = vadd.f32 %v1170_v38, %v4399_v58  ;;  %v1341_v50 = vmax.f32 %v1169_v46, 0.0 }
 0x26c   :  { %v1174_v39 = vpop.f32.mrf.mxu1 }
 0x26d   :  { %v1342_v53 = vmax.f32 %v1171_v48, 0.0  ;;  %v1419_v61 = vpack.c.bf16 %v1341_v50, %v1339_v56  ;;  %v1175_v1 = vadd.f32 %v1174_v39, %v4403_v59 }
 0x26e   :  { %v1176_v49 = vpop.f32.mrf.mxu1 }
 0x26f   :  { %v1420_v57 = vpack.c.bf16 %v1342_v53, %v1340_v52  ;;  %v1177_v63 = vadd.f32 %v1176_v49, %v4399_v58  ;;  %v1343_v11 = vmax.f32 %v1175_v1, 0.0 }
 0x270   :  { %v1178_v62 = vpop.f32.mrf.mxu1 }
 0x271   :  { %v1179_v0 = vadd.f32 %v1178_v62, %v4403_v59  ;;  %1911 = vmatprep.mubr.bf16.mxu0 %v1420_v57  ;;  %v1344_v5 = vmax.f32 %v1177_v63, 0.0 }
 0x272   :  { %v1180_v2 = vpop.f32.mrf.mxu1  ;;  %v1673_v22 = vpop.f32.mrf.mxu0  ;;  %1912 = vmatmul.mubr.bf16.gmra.mxu0 %v1419_v61 }
 0x273   :  { %v1181_v6 = vadd.f32 %v1180_v2, %v4399_v58  ;;  %v1345_v54 = vmax.f32 %v1179_v0, 0.0  ;;  %v1674_v16 = vadd.f32 %v1673_v22, %v4589_v10  ;;  %v3867_v2 = vld [vmem:[%s5234_s9 + $0x60] sm:$0xff]  }
 0x274   :  { %v1184_v35 = vpop.f32.mrf.mxu1  ;;  %v1675_v31 = vpop.f32.mrf.mxu0  ;;  %3091 = vmatpush2.bf16.msra.mxu0 %v3867_v2  ;;  %v3868_v2 = vld [vmem:[%s5234_s9 + $0x58] sm:$0xff]  }
 0x275   :  { %v1346_v8 = vmax.f32 %v1181_v6, 0.0  ;;  %v1421_v18 = vpack.c.bf16 %v1345_v54, %v1343_v11  ;;  %v1676_v7 = vadd.f32 %v1675_v31, %v4586_v43  ;;  %v1185_v26 = vadd.f32 %v1184_v35, %v4403_v59  ;;  %3092 = vmatprep.subr.bf16.mxu0 %v3897_v51 }
 0x276   :  { %v1186_v12 = vpop.f32.mrf.mxu1  ;;  %v1677_v13 = vpop.f32.mrf.mxu0  ;;  %v1992_v36 = vmax.f32 %v1674_v16, 0.0 }
 0x277   :  { %v1678_v14 = vadd.f32 %v1677_v13, %v4589_v10  ;;  %v1422_v17 = vpack.c.bf16 %v1346_v8, %v1344_v5  ;;  %v1187_v23 = vadd.f32 %v1186_v12, %v4399_v58  ;;  %v1993_v30 = vmax.f32 %v1676_v7, 0.0 }
 0x278   :  { %v1188_v20 = vpop.f32.mrf.mxu1  ;;  %v1679_v21 = vpop.f32.mrf.mxu0  ;;  %v1347_v42 = vmax.f32 %v1185_v26, 0.0  ;;  %3093 = vmatpush2.bf16.msra.mxu0 %v3868_v2 }
 0x279   :  { %v1189_v15 = vadd.f32 %v1188_v20, %v4403_v59  ;;  %v1680_v19 = vadd.f32 %v1679_v21, %v4586_v43  ;;  %1921 = vmatprep.mubr.bf16.mxu0 %v1422_v17  ;;  %v1994_v27 = vmax.f32 %v1678_v14, 0.0  ;;  %v1348_v3 = vmax.f32 %v1187_v23, 0.0  ;;  %3094 = vmatprep.subr.bf16.mxu0 %v3897_v51 }
 0x27a   :  { %v1190_v24 = vpop.f32.mrf.mxu1  ;;  %v1683_v25 = vpop.f32.mrf.mxu0  ;;  %1922 = vmatmul.mubr.bf16.gmra.mxu0 %v1421_v18 }
 0x27b   :  { %v1995_v28 = vmax.f32 %v1680_v19, 0.0  ;;  %v1191_v29 = vadd.f32 %v1190_v24, %v4399_v58  ;;  %v1349_v37 = vmax.f32 %v1189_v15, 0.0  ;;  %v2120_v44 = vpack.c.bf16 %v1994_v27, %v1992_v36 }
 0x27c   :  { %v1194_v33 = vpop.f32.mrf.mxu1  ;;  %v1685_v34 = vpop.f32.mrf.mxu0  ;;  %v1684_v52 = vadd.f32 %v1683_v25, %v4589_v10 }
 0x27d   :  { %v1350_v32 = vmax.f32 %v1191_v29, 0.0  ;;  %v2121_v9 = vpack.c.bf16 %v1995_v28, %v1993_v30  ;;  %v1686_v47 = vadd.f32 %v1685_v34, %v4586_v43  ;;  %v1423_v39 = vpack.c.bf16 %v1349_v37, %v1347_v42 }
 0x27e   :  { %v1196_v40 = vpop.f32.mrf.mxu1  ;;  %v1687_v41 = vpop.f32.mrf.mxu0  ;;  %v1195_v62 = vadd.f32 %v1194_v33, %v4403_v59  ;;  %v1996_v60 = vmax.f32 %v1684_v52, 0.0 }
 0x27f   :  { %v1688_v46 = vadd.f32 %v1687_v41, %v4589_v10  ;;  %2420 = vmatprep.mubr.bf16.mxu1 %v2121_v9  ;;  %v1424_v50 = vpack.c.bf16 %v1350_v32, %v1348_v3  ;;  %v1197_v49 = vadd.f32 %v1196_v40, %v4399_v58  ;;  %v1997_v4 = vmax.f32 %v1686_v47, 0.0 }
 0x280   :  { %v1198_v38 = vpop.f32.mrf.mxu1  ;;  %v1689_v48 = vpop.f32.mrf.mxu0  ;;  %2421 = vmatmul.mubr.bf16.vlgmr.msra.gmra.mxu1 %v2120_v44  ;;  %v1351_v12 = vmax.f32 %v1195_v62, 0.0 }
 0x281   :  { %v1199_v53 = vadd.f32 %v1198_v38, %v4403_v59  ;;  %v1690_v56 = vadd.f32 %v1689_v48, %v4586_v43  ;;  %1931 = vmatprep.mubr.bf16.mxu0 %v1424_v50  ;;  %v1998_v63 = vmax.f32 %v1688_v46, 0.0  ;;  %v1352_v31 = vmax.f32 %v1197_v49, 0.0 }
 0x282   :  { %v1200_v57 = vpop.f32.mrf.mxu1  ;;  %v1693_v61 = vpop.f32.mrf.mxu0  ;;  %1932 = vmatmul.mubr.bf16.gmra.mxu0 %v1423_v39 }
 0x283   :  { %v1999_v0 = vmax.f32 %v1690_v56, 0.0  ;;  %v1201_v1 = vadd.f32 %v1200_v57, %v4399_v58  ;;  %v1353_v54 = vmax.f32 %v1199_v53, 0.0  ;;  %v2122_v13 = vpack.c.bf16 %v1998_v63, %v1996_v60 }
 0x284   :  { %v1204_v22 = vpop.f32.mrf.mxu1  ;;  %v1695_v6 = vpop.f32.mrf.mxu0  ;;  %v1694_v16 = vadd.f32 %v1693_v61, %v4589_v10 }
 0x285   :  { %v1354_v35 = vmax.f32 %v1201_v1, 0.0  ;;  %v2123_v11 = vpack.c.bf16 %v1999_v0, %v1997_v4  ;;  %v1696_v17 = vadd.f32 %v1695_v6, %v4586_v43  ;;  %v1425_v21 = vpack.c.bf16 %v1353_v54, %v1351_v12 }
 0x286   :  { %v1206_v5 = vpop.f32.mrf.mxu1  ;;  %v1697_v8 = vpop.f32.mrf.mxu0  ;;  %v1205_v26 = vadd.f32 %v1204_v22, %v4403_v59  ;;  %v2000_v36 = vmax.f32 %v1694_v16, 0.0 }
 0x287   :  { %v1698_v14 = vadd.f32 %v1697_v8, %v4589_v10  ;;  %2430 = vmatprep.mubr.bf16.mxu1 %v2123_v11  ;;  %v1426_v20 = vpack.c.bf16 %v1354_v35, %v1352_v31  ;;  %v1207_v23 = vadd.f32 %v1206_v5, %v4399_v58  ;;  %v2001_v30 = vmax.f32 %v1696_v17, 0.0 }
 0x288   :  { %v1208_v18 = vpop.f32.mrf.mxu1  ;;  %v1699_v7 = vpop.f32.mrf.mxu0  ;;  %2431 = vmatmul.mubr.bf16.gmra.mxu1 %v2122_v13  ;;  %v1355_v42 = vmax.f32 %v1205_v26, 0.0 }
 0x289   :  { %v1209_v15 = vadd.f32 %v1208_v18, %v4403_v59  ;;  %v1700_v19 = vadd.f32 %v1699_v7, %v4586_v43  ;;  %1941 = vmatprep.mubr.bf16.mxu0 %v1426_v20  ;;  %v2002_v27 = vmax.f32 %v1698_v14, 0.0  ;;  %v1356_v3 = vmax.f32 %v1207_v23, 0.0 }
 0x28a   :  { %v1210_v24 = vpop.f32.mrf.mxu1  ;;  %v1703_v25 = vpop.f32.mrf.mxu0  ;;  %1942 = vmatmul.mubr.bf16.gmra.mxu0 %v1425_v21 }
 0x28b   :  { %v2003_v28 = vmax.f32 %v1700_v19, 0.0  ;;  %v1211_v29 = vadd.f32 %v1210_v24, %v4399_v58  ;;  %v1357_v37 = vmax.f32 %v1209_v15, 0.0  ;;  %v2124_v44 = vpack.c.bf16 %v2002_v27, %v2000_v36 }
 0x28c   :  { %v1214_v33 = vpop.f32.mrf.mxu1  ;;  %v1705_v34 = vpop.f32.mrf.mxu0  ;;  %v1704_v52 = vadd.f32 %v1703_v25, %v4589_v10 }
 0x28d   :  { %v1358_v32 = vmax.f32 %v1211_v29, 0.0  ;;  %v2125_v9 = vpack.c.bf16 %v2003_v28, %v2001_v30  ;;  %v1706_v47 = vadd.f32 %v1705_v34, %v4586_v43  ;;  %v1427_v39 = vpack.c.bf16 %v1357_v37, %v1355_v42 }
 0x28e   :  { %v1216_v40 = vpop.f32.mrf.mxu1  ;;  %v1707_v41 = vpop.f32.mrf.mxu0  ;;  %v1215_v62 = vadd.f32 %v1214_v33, %v4403_v59  ;;  %v2004_v60 = vmax.f32 %v1704_v52, 0.0 }
 0x28f   :  { %v1708_v46 = vadd.f32 %v1707_v41, %v4589_v10  ;;  %2440 = vmatprep.mubr.bf16.mxu1 %v2125_v9  ;;  %v1428_v50 = vpack.c.bf16 %v1358_v32, %v1356_v3  ;;  %v1217_v49 = vadd.f32 %v1216_v40, %v4399_v58  ;;  %v2005_v4 = vmax.f32 %v1706_v47, 0.0 }
 0x290   :  { %v1218_v38 = vpop.f32.mrf.mxu1  ;;  %v1709_v48 = vpop.f32.mrf.mxu0  ;;  %2441 = vmatmul.mubr.bf16.gmra.mxu1 %v2124_v44  ;;  %v1359_v12 = vmax.f32 %v1215_v62, 0.0 }
 0x291   :  { %v1219_v53 = vadd.f32 %v1218_v38, %v4403_v59  ;;  %v1710_v56 = vadd.f32 %v1709_v48, %v4586_v43  ;;  %1951 = vmatprep.mubr.bf16.mxu0 %v1428_v50  ;;  %v2006_v63 = vmax.f32 %v1708_v46, 0.0  ;;  %v1360_v31 = vmax.f32 %v1217_v49, 0.0 }
 0x292   :  { %v1220_v57 = vpop.f32.mrf.mxu1  ;;  %v1713_v61 = vpop.f32.mrf.mxu0  ;;  %1952 = vmatmul.mubr.bf16.gmra.mxu0 %v1427_v39 }
 0x293   :  { %v2007_v0 = vmax.f32 %v1710_v56, 0.0  ;;  %v1221_v1 = vadd.f32 %v1220_v57, %v4399_v58  ;;  %v1361_v54 = vmax.f32 %v1219_v53, 0.0  ;;  %v2126_v13 = vpack.c.bf16 %v2006_v63, %v2004_v60 }
 0x294   :  { %v1224_v22 = vpop.f32.mrf.mxu1  ;;  %v1715_v6 = vpop.f32.mrf.mxu0  ;;  %v1714_v16 = vadd.f32 %v1713_v61, %v4589_v10 }
 0x295   :  { %v1362_v35 = vmax.f32 %v1221_v1, 0.0  ;;  %v2127_v11 = vpack.c.bf16 %v2007_v0, %v2005_v4  ;;  %v1716_v17 = vadd.f32 %v1715_v6, %v4586_v43  ;;  %v1429_v21 = vpack.c.bf16 %v1361_v54, %v1359_v12  ;;  %v3869_v4 = vld [vmem:[%s5234_s9 + $0x50] sm:$0xff]  }
 0x296   :  { %v1226_v5 = vpop.f32.mrf.mxu1  ;;  %v1717_v8 = vpop.f32.mrf.mxu0  ;;  %v1225_v26 = vadd.f32 %v1224_v22, %v4403_v59  ;;  %v2008_v36 = vmax.f32 %v1714_v16, 0.0  ;;  %3095 = vmatpush2.bf16.msra.mxu0 %v3869_v4 }
 0x297   :  { %v1718_v14 = vadd.f32 %v1717_v8, %v4589_v10  ;;  %2450 = vmatprep.mubr.bf16.mxu1 %v2127_v11  ;;  %v1430_v20 = vpack.c.bf16 %v1362_v35, %v1360_v31  ;;  %v1227_v23 = vadd.f32 %v1226_v5, %v4399_v58  ;;  %v2009_v30 = vmax.f32 %v1716_v17, 0.0  ;;  %3096 = vmatprep.subr.bf16.mxu0 %v3897_v51 }
 0x298   :  { %v1228_v18 = vpop.f32.mrf.mxu1  ;;  %v1719_v7 = vpop.f32.mrf.mxu0  ;;  %2451 = vmatmul.mubr.bf16.gmra.mxu1 %v2126_v13  ;;  %v1363_v42 = vmax.f32 %v1225_v26, 0.0 }
 0x299   :  { %v1229_v15 = vadd.f32 %v1228_v18, %v4403_v59  ;;  %v1720_v19 = vadd.f32 %v1719_v7, %v4586_v43  ;;  %1961 = vmatprep.mubr.bf16.mxu0 %v1430_v20  ;;  %v2010_v27 = vmax.f32 %v1718_v14, 0.0  ;;  %v1364_v3 = vmax.f32 %v1227_v23, 0.0 }
 0x29a   :  { %v1230_v24 = vpop.f32.mrf.mxu1  ;;  %v1723_v25 = vpop.f32.mrf.mxu0  ;;  %1962 = vmatmul.mubr.bf16.gmra.mxu0 %v1429_v21 }
 0x29b   :  { %v2011_v28 = vmax.f32 %v1720_v19, 0.0  ;;  %v1231_v29 = vadd.f32 %v1230_v24, %v4399_v58  ;;  %v1365_v37 = vmax.f32 %v1229_v15, 0.0  ;;  %v2128_v44 = vpack.c.bf16 %v2010_v27, %v2008_v36 }
 0x29c   :  { %v1234_v33 = vpop.f32.mrf.mxu1  ;;  %v1725_v34 = vpop.f32.mrf.mxu0  ;;  %v1724_v38 = vadd.f32 %v1723_v25, %v4589_v10 }
 0x29d   :  { %v1366_v32 = vmax.f32 %v1231_v29, 0.0  ;;  %v2129_v9 = vpack.c.bf16 %v2011_v28, %v2009_v30  ;;  %v1726_v46 = vadd.f32 %v1725_v34, %v4586_v43  ;;  %v1431_v52 = vpack.c.bf16 %v1365_v37, %v1363_v42 }
 0x29e   :  { %v1236_v40 = vpop.f32.mrf.mxu1  ;;  %v1727_v41 = vpop.f32.mrf.mxu0  ;;  %v1235_v57 = vadd.f32 %v1234_v33, %v4403_v59  ;;  %v2012_v22 = vmax.f32 %v1724_v38, 0.0 }
 0x29f   :  { %v1728_v47 = vadd.f32 %v1727_v41, %v4589_v10  ;;  %2460 = vmatprep.mubr.bf16.mxu1 %v2129_v9  ;;  %v1432_v39 = vpack.c.bf16 %v1366_v32, %v1364_v3  ;;  %v1237_v53 = vadd.f32 %v1236_v40, %v4399_v58  ;;  %v2013_v63 = vmax.f32 %v1726_v46, 0.0  ;;  %v3870_v32 = vld [vmem:[%s5234_s9 + $0x48] sm:$0xff]  }
 0x2a0   :  { %v1238_v48 = vpop.f32.mrf.mxu1  ;;  %v1729_v50 = vpop.f32.mrf.mxu0  ;;  %2461 = vmatmul.mubr.bf16.gmra.mxu1 %v2128_v44  ;;  %3097 = vmatpush2.bf16.msra.mxu0 %v3870_v32 }
 0x2a1   :  { %v1239_v56 = vadd.f32 %v1238_v48, %v4403_v59  ;;  %v1730_v49 = vadd.f32 %v1729_v50, %v4586_v43  ;;  %1971 = vmatprep.mubr.bf16.mxu0 %v1432_v39  ;;  %v2014_v0 = vmax.f32 %v1728_v47, 0.0  ;;  %v1368_v60 = vmax.f32 %v1237_v53, 0.0  ;;  %3098 = vmatprep.subr.bf16.mxu0 %v3897_v51 }
 0x2a2   :  { %v1240_v61 = vpop.f32.mrf.mxu1  ;;  %v1733_v62 = vpop.f32.mrf.mxu0  ;;  %1972 = vmatmul.mubr.bf16.gmra.mxu0 %v1431_v52  ;;  %v1367_v59 = vmax.f32 %v1235_v57, 0.0 }
 0x2a3   :  { %v2015_v1 = vmax.f32 %v1730_v49, 0.0  ;;  %v1241_v2 = vadd.f32 %v1240_v61, %v4399_v58  ;;  %v1369_v54 = vmax.f32 %v1239_v56, 0.0  ;;  %v2130_v8 = vpack.c.bf16 %v2014_v0, %v2012_v22 }
 0x2a4   :  { %v1735_v6 = vpop.f32.mrf.mxu0  ;;  %v1734_v17 = vadd.f32 %v1733_v62, %v4589_v10 }
 0x2a5   :  { %v1370_v35 = vmax.f32 %v1241_v2, 0.0  ;;  %v2131_v31 = vpack.c.bf16 %v2015_v1, %v2013_v63  ;;  %v1736_v11 = vadd.f32 %v1735_v6, %v4586_v43  ;;  %v1433_v14 = vpack.c.bf16 %v1369_v54, %v1367_v59  ;;  %v3871_v54 = vld [vmem:[%s5234_s9 + $0x40] sm:$0xff]  }
 0x2a6   :  { %v1737_v5 = vpop.f32.mrf.mxu0  ;;  %v2016_v19 = vmax.f32 %v1734_v17, 0.0  ;;  %3099 = vmatpush2.bf16.msra.mxu0 %v3871_v54 }
 0x2a7   :  { %v1738_v58 = vadd.f32 %v1737_v5, %v4589_v10  ;;  %2470 = vmatprep.mubr.bf16.mxu1 %v2131_v31  ;;  %v1434_v12 = vpack.c.bf16 %v1370_v35, %v1368_v60  ;;  %v2017_v20 = vmax.f32 %v1736_v11, 0.0 }
 0x2a8   :  { %v1739_v13 = vpop.f32.mrf.mxu0  ;;  %2471 = vmatmul.mubr.bf16.gmra.mxu1 %v2130_v8 }
 0x2a9   :  { %v1740_v18 = vadd.f32 %v1739_v13, %v4586_v43  ;;  %1981 = vmatprep.mubr.bf16.mxu0 %v1434_v12  ;;  %v2018_v21 = vmax.f32 %v1738_v58, 0.0 }
 0x2aa   :  { %v1743_v7 = vpop.f32.mrf.mxu0  ;;  %1982 = vmatmul.mubr.bf16.gmra.mxu0 %v1433_v14 }
 0x2ab   :  { %v2019_v16 = vmax.f32 %v1740_v18, 0.0  ;;  %v2132_v25 = vpack.c.bf16 %v2018_v21, %v2016_v19  ;;  %v1744_v29 = vadd.f32 %v1743_v7, %v4589_v10 }
 0x2ac   :  { %v1745_v15 = vpop.f32.mrf.mxu0 }
 0x2ad   :  { %v2133_v23 = vpack.c.bf16 %v2019_v16, %v2017_v20  ;;  %v1746_v26 = vadd.f32 %v1745_v15, %v4586_v43  ;;  %v2020_v40 = vmax.f32 %v1744_v29, 0.0 }
 0x2ae   :  { %v1747_v24 = vpop.f32.mrf.mxu0 }
 0x2af   :  { %v1748_v27 = vadd.f32 %v1747_v24, %v4589_v10  ;;  %2480 = vmatprep.mubr.bf16.mxu1 %v2133_v23  ;;  %v2021_v34 = vmax.f32 %v1746_v26, 0.0 }
 0x2b0   :  { %v1749_v28 = vpop.f32.mrf.mxu0  ;;  %2481 = vmatmul.mubr.bf16.gmra.mxu1 %v2132_v25 }
 0x2b1   :  { %v1750_v30 = vadd.f32 %v1749_v28, %v4586_v43  ;;  %v2022_v36 = vmax.f32 %v1748_v27, 0.0 }
 0x2b2   :  { %v1753_v33 = vpop.f32.mrf.mxu0 }
 0x2b3   :  { %v2023_v37 = vmax.f32 %v1750_v30, 0.0  ;;  %v2134_v42 = vpack.c.bf16 %v2022_v36, %v2020_v40  ;;  %v1754_v38 = vadd.f32 %v1753_v33, %v4589_v10 }
 0x2b4   :  { %v1755_v3 = vpop.f32.mrf.mxu0 }
 0x2b5   :  { %v2135_v41 = vpack.c.bf16 %v2023_v37, %v2021_v34  ;;  %v1756_v44 = vadd.f32 %v1755_v3, %v4586_v43  ;;  %v2024_v49 = vmax.f32 %v1754_v38, 0.0 }
 0x2b6   :  { %v1757_v9 = vpop.f32.mrf.mxu0 }
 0x2b7   :  { %v1758_v46 = vadd.f32 %v1757_v9, %v4589_v10  ;;  %2490 = vmatprep.mubr.bf16.mxu1 %v2135_v41  ;;  %v2025_v39 = vmax.f32 %v1756_v44, 0.0 }
 0x2b8   :  { %v1759_v47 = vpop.f32.mrf.mxu0  ;;  %2491 = vmatmul.mubr.bf16.gmra.mxu1 %v2134_v42 }
 0x2b9   :  { %v1760_v48 = vadd.f32 %v1759_v47, %v4586_v43  ;;  %v2026_v52 = vmax.f32 %v1758_v46, 0.0 }
 0x2ba   :  { %v1763_v50 = vpop.f32.mrf.mxu0 }
 0x2bb   :  { %v2027_v53 = vmax.f32 %v1760_v48, 0.0  ;;  %v2136_v61 = vpack.c.bf16 %v2026_v52, %v2024_v49  ;;  %v1764_v1 = vadd.f32 %v1763_v50, %v4589_v10 }
 0x2bc   :  { %v1765_v56 = vpop.f32.mrf.mxu0 }
 0x2bd   :  { %v2137_v57 = vpack.c.bf16 %v2027_v53, %v2025_v39  ;;  %v1766_v62 = vadd.f32 %v1765_v56, %v4586_v43  ;;  %v2028_v31 = vmax.f32 %v1764_v1, 0.0 }
 0x2be   :  { %v1767_v51 = vpop.f32.mrf.mxu0 }
 0x2bf   :  { %v1768_v63 = vadd.f32 %v1767_v51, %v4589_v10  ;;  %2500 = vmatprep.mubr.bf16.mxu1 %v2137_v57  ;;  %v2029_v22 = vmax.f32 %v1766_v62, 0.0 }
 0x2c0   :  { %v1769_v0 = vpop.f32.mrf.mxu0  ;;  %2501 = vmatmul.mubr.bf16.gmra.mxu1 %v2136_v61 }
 0x2c1   :  { %v1770_v2 = vadd.f32 %v1769_v0, %v4586_v43  ;;  %v2030_v6 = vmax.f32 %v1768_v63, 0.0 }
 0x2c2   :  { %v1773_v4 = vpop.f32.mrf.mxu0 }
 0x2c3   :  { %v2031_v60 = vmax.f32 %v1770_v2, 0.0  ;;  %v2138_v8 = vpack.c.bf16 %v2030_v6, %v2028_v31  ;;  %v1774_v13 = vadd.f32 %v1773_v4, %v4589_v10 }
 0x2c4   :  { %v1775_v35 = vpop.f32.mrf.mxu0 }
 0x2c5   :  { %v2139_v59 = vpack.c.bf16 %v2031_v60, %v2029_v22  ;;  %v1776_v11 = vadd.f32 %v1775_v35, %v4586_v43  ;;  %v2032_v16 = vmax.f32 %v1774_v13, 0.0 }
 0x2c6   :  { %v1777_v5 = vpop.f32.mrf.mxu0 }
 0x2c7   :  { %v1778_v58 = vadd.f32 %v1777_v5, %v4589_v10  ;;  %2510 = vmatprep.mubr.bf16.mxu1 %v2139_v59  ;;  %v2033_v18 = vmax.f32 %v1776_v11, 0.0 }
 0x2c8   :  { %v1779_v12 = vpop.f32.mrf.mxu0  ;;  %2511 = vmatmul.mubr.bf16.gmra.mxu1 %v2138_v8 }
 0x2c9   :  { %v1780_v14 = vadd.f32 %v1779_v12, %v4586_v43  ;;  %v2034_v7 = vmax.f32 %v1778_v58, 0.0 }
 0x2ca   :  { %v1783_v17 = vpop.f32.mrf.mxu0 }
 0x2cb   :  { %v2035_v20 = vmax.f32 %v1780_v14, 0.0  ;;  %v2140_v23 = vpack.c.bf16 %v2034_v7, %v2032_v16  ;;  %v1784_v27 = vadd.f32 %v1783_v17, %v4589_v10 }
 0x2cc   :  { %v1785_v21 = vpop.f32.mrf.mxu0 }
 0x2cd   :  { %v2141_v15 = vpack.c.bf16 %v2035_v20, %v2033_v18  ;;  %v1786_v24 = vadd.f32 %v1785_v21, %v4586_v43  ;;  %v2036_v37 = vmax.f32 %v1784_v27, 0.0 }
 0x2ce   :  { %v1787_v19 = vpop.f32.mrf.mxu0 }
 0x2cf   :  { %v1788_v25 = vadd.f32 %v1787_v19, %v4589_v10  ;;  %2520 = vmatprep.mubr.bf16.mxu1 %v2141_v15  ;;  %v2037_v30 = vmax.f32 %v1786_v24, 0.0 }
 0x2d0   :  { %v1789_v26 = vpop.f32.mrf.mxu0  ;;  %2521 = vmatmul.mubr.bf16.gmra.mxu1 %v2140_v23 }
 0x2d1   :  { %v1790_v28 = vadd.f32 %v1789_v26, %v4586_v43  ;;  %v2038_v33 = vmax.f32 %v1788_v25, 0.0 }
 0x2d2   :  { %v1793_v29 = vpop.f32.mrf.mxu0 }
 0x2d3   :  { %v2039_v34 = vmax.f32 %v1790_v28, 0.0  ;;  %v2142_v40 = vpack.c.bf16 %v2038_v33, %v2036_v37  ;;  %v1794_v44 = vadd.f32 %v1793_v29, %v4589_v10 }
 0x2d4   :  { %v1795_v36 = vpop.f32.mrf.mxu0 }
 0x2d5   :  { %v2143_v32 = vpack.c.bf16 %v2039_v34, %v2037_v30  ;;  %v1796_v41 = vadd.f32 %v1795_v36, %v4586_v43  ;;  %v2040_v52 = vmax.f32 %v1794_v44, 0.0 }
 0x2d6   :  { %v1797_v3 = vpop.f32.mrf.mxu0 }
 0x2d7   :  { %v1798_v9 = vadd.f32 %v1797_v3, %v4589_v10  ;;  %2530 = vmatprep.mubr.bf16.mxu1 %v2143_v32  ;;  %v2041_v38 = vmax.f32 %v1796_v41, 0.0 }
 0x2d8   :  { %v1799_v42 = vpop.f32.mrf.mxu0  ;;  %2531 = vmatmul.mubr.bf16.gmra.mxu1 %v2142_v40 }
 0x2d9   :  { %v1800_v46 = vadd.f32 %v1799_v42, %v4586_v43  ;;  %v2042_v48 = vmax.f32 %v1798_v9, 0.0 }
 0x2da   :  { %v1803_v47 = vpop.f32.mrf.mxu0 }
 0x2db   :  { %v2043_v50 = vmax.f32 %v1800_v46, 0.0  ;;  %v2144_v49 = vpack.c.bf16 %v2042_v48, %v2040_v52  ;;  %v1804_v62 = vadd.f32 %v1803_v47, %v4589_v10 }
 0x2dc   :  { %v1805_v39 = vpop.f32.mrf.mxu0 }
 0x2dd   :  { %v2145_v53 = vpack.c.bf16 %v2043_v50, %v2041_v38  ;;  %v1806_v57 = vadd.f32 %v1805_v39, %v4586_v43  ;;  %v2044_v6 = vmax.f32 %v1804_v62, 0.0 }
 0x2de   :  { %v1807_v56 = vpop.f32.mrf.mxu0 }
 0x2df   :  { %v1808_v51 = vadd.f32 %v1807_v56, %v4589_v10  ;;  %2540 = vmatprep.mubr.bf16.mxu1 %v2145_v53  ;;  %v2045_v1 = vmax.f32 %v1806_v57, 0.0 }
 0x2e0   :  { %v1809_v61 = vpop.f32.mrf.mxu0  ;;  %2541 = vmatmul.mubr.bf16.gmra.mxu1 %v2144_v49 }
 0x2e1   :  { %v1810_v63 = vadd.f32 %v1809_v61, %v4586_v43  ;;  %v2046_v2 = vmax.f32 %v1808_v51, 0.0 }
 0x2e2   :  { %v1813_v0 = vpop.f32.mrf.mxu0 }
 0x2e3   :  { %v2047_v4 = vmax.f32 %v1810_v63, 0.0  ;;  %v2146_v35 = vpack.c.bf16 %v2046_v2, %v2044_v6  ;;  %v1814_v8 = vadd.f32 %v1813_v0, %v4589_v10 }
 0x2e4   :  { %v1815_v22 = vpop.f32.mrf.mxu0 }
 0x2e5   :  { %v2147_v60 = vpack.c.bf16 %v2047_v4, %v2045_v1  ;;  %v1816_v31 = vadd.f32 %v1815_v22, %v4586_v43  ;;  %v2048_v18 = vmax.f32 %v1814_v8, 0.0 }
 0x2e6   :  { %v1817_v54 = vpop.f32.mrf.mxu0 }
 0x2e7   :  { %v1818_v59 = vadd.f32 %v1817_v54, %v4589_v10  ;;  %2550 = vmatprep.mubr.bf16.mxu1 %v2147_v60  ;;  %v2049_v12 = vmax.f32 %v1816_v31, 0.0 }
 0x2e8   :  { %v1819_v5 = vpop.f32.mrf.mxu0  ;;  %2551 = vmatmul.mubr.bf16.gmra.mxu1 %v2146_v35 }
 0x2e9   :  { %v1820_v11 = vadd.f32 %v1819_v5, %v4586_v43  ;;  %v2050_v13 = vmax.f32 %v1818_v59, 0.0 }
 0x2ea   :  { %v1823_v58 = vpop.f32.mrf.mxu0 }
 0x2eb   :  { %v2051_v14 = vmax.f32 %v1820_v11, 0.0  ;;  %v2148_v21 = vpack.c.bf16 %v2050_v13, %v2048_v18  ;;  %v1824_v23 = vadd.f32 %v1823_v58, %v4589_v10 }
 0x2ec   :  { %v1825_v17 = vpop.f32.mrf.mxu0 }
 0x2ed   :  { %v2149_v7 = vpack.c.bf16 %v2051_v14, %v2049_v12  ;;  %v1826_v16 = vadd.f32 %v1825_v17, %v4586_v43  ;;  %v2052_v30 = vmax.f32 %v1824_v23, 0.0 }
 0x2ee   :  { %v1827_v20 = vpop.f32.mrf.mxu0 }
 0x2ef   :  { %v1828_v15 = vadd.f32 %v1827_v20, %v4589_v10  ;;  %2560 = vmatprep.mubr.bf16.mxu1 %v2149_v7  ;;  %v2053_v26 = vmax.f32 %v1826_v16, 0.0 }
 0x2f0   :  { %v1829_v19 = vpop.f32.mrf.mxu0  ;;  %2561 = vmatmul.mubr.bf16.gmra.mxu1 %v2148_v21 }
 0x2f1   :  { %v1830_v24 = vadd.f32 %v1829_v19, %v4586_v43  ;;  %v2054_v27 = vmax.f32 %v1828_v15, 0.0 }
 0x2f2   :  { %v1833_v25 = vpop.f32.mrf.mxu0 }
 0x2f3   :  { %v2055_v28 = vmax.f32 %v1830_v24, 0.0  ;;  %v2150_v36 = vpack.c.bf16 %v2054_v27, %v2052_v30  ;;  %v1834_v40 = vadd.f32 %v1833_v25, %v4589_v10 }
 0x2f4   :  { %v1835_v29 = vpop.f32.mrf.mxu0 }
 0x2f5   :  { %v2151_v33 = vpack.c.bf16 %v2055_v28, %v2053_v26  ;;  %v1836_v37 = vadd.f32 %v1835_v29, %v4586_v43  ;;  %v2056_v38 = vmax.f32 %v1834_v40, 0.0 }
 0x2f6   :  { %v1837_v34 = vpop.f32.mrf.mxu0 }
 0x2f7   :  { %v1838_v32 = vadd.f32 %v1837_v34, %v4589_v10  ;;  %2570 = vmatprep.mubr.bf16.mxu1 %v2151_v33  ;;  %v2057_v42 = vmax.f32 %v1836_v37, 0.0 }
 0x2f8   :  { %v1839_v3 = vpop.f32.mrf.mxu0  ;;  %2571 = vmatmul.mubr.bf16.gmra.mxu1 %v2150_v36 }
 0x2f9   :  { %v1840_v41 = vadd.f32 %v1839_v3, %v4586_v43  ;;  %v2058_v44 = vmax.f32 %v1838_v32, 0.0 }
 0x2fa   :  { %v1843_v9 = vpop.f32.mrf.mxu0 }
 0x2fb   :  { %v2059_v46 = vmax.f32 %v1840_v41, 0.0  ;;  %v2152_v39 = vpack.c.bf16 %v2058_v44, %v2056_v38  ;;  %v1844_v49 = vadd.f32 %v1843_v9, %v4589_v10 }
 0x2fc   :  { %v1845_v47 = vpop.f32.mrf.mxu0 }
 0x2fd   :  { %v2153_v48 = vpack.c.bf16 %v2059_v46, %v2057_v42  ;;  %v1846_v52 = vadd.f32 %v1845_v47, %v4586_v43  ;;  %v2060_v1 = vmax.f32 %v1844_v49, 0.0 }
 0x2fe   :  { %v1847_v50 = vpop.f32.mrf.mxu0 }
 0x2ff   :  { %v1848_v53 = vadd.f32 %v1847_v50, %v4589_v10  ;;  %2580 = vmatprep.mubr.bf16.mxu1 %v2153_v48  ;;  %v2061_v61 = vmax.f32 %v1846_v52, 0.0 }
 0x300   :  { %v1849_v56 = vpop.f32.mrf.mxu0  ;;  %2581 = vmatmul.mubr.bf16.gmra.mxu1 %v2152_v39 }
 0x301   :  { %v1850_v57 = vadd.f32 %v1849_v56, %v4586_v43  ;;  %v2062_v62 = vmax.f32 %v1848_v53, 0.0 }
 0x302   :  { %v1853_v51 = vpop.f32.mrf.mxu0 }
 0x303   :  { %v2063_v63 = vmax.f32 %v1850_v57, 0.0  ;;  %v2154_v22 = vpack.c.bf16 %v2062_v62, %v2060_v1  ;;  %v1854_v35 = vadd.f32 %v1853_v51, %v4589_v10 }
 0x304   :  { %v1855_v0 = vpop.f32.mrf.mxu0 }
 0x305   :  { %v2155_v2 = vpack.c.bf16 %v2063_v63, %v2061_v61  ;;  %v1856_v6 = vadd.f32 %v1855_v0, %v4586_v43  ;;  %v2064_v12 = vmax.f32 %v1854_v35, 0.0 }
 0x306   :  { %v1857_v4 = vpop.f32.mrf.mxu0 }
 0x307   :  { %v1858_v60 = vadd.f32 %v1857_v4, %v4589_v10  ;;  %2590 = vmatprep.mubr.bf16.mxu1 %v2155_v2  ;;  %v2065_v5 = vmax.f32 %v1856_v6, 0.0 }
 0x308   :  { %v1859_v54 = vpop.f32.mrf.mxu0  ;;  %2591 = vmatmul.mubr.bf16.gmra.mxu1 %v2154_v22 }
 0x309   :  { %v1860_v31 = vadd.f32 %v1859_v54, %v4586_v43  ;;  %v2066_v8 = vmax.f32 %v1858_v60, 0.0 }
 0x30a   :  { %v1863_v59 = vpop.f32.mrf.mxu0 }
 0x30b   :  { %v2067_v11 = vmax.f32 %v1860_v31, 0.0  ;;  %v2156_v17 = vpack.c.bf16 %v2066_v8, %v2064_v12  ;;  %v1864_v21 = vadd.f32 %v1863_v59, %v4589_v10 }
 0x30c   :  { %v1865_v58 = vpop.f32.mrf.mxu0 }
 0x30d   :  { %v2157_v13 = vpack.c.bf16 %v2067_v11, %v2065_v5  ;;  %v1866_v18 = vadd.f32 %v1865_v58, %v4586_v43  ;;  %v2068_v26 = vmax.f32 %v1864_v21, 0.0 }
 0x30e   :  { %v1867_v14 = vpop.f32.mrf.mxu0 }
 0x30f   :  { %v1868_v7 = vadd.f32 %v1867_v14, %v4589_v10  ;;  %2600 = vmatprep.mubr.bf16.mxu1 %v2157_v13  ;;  %v2069_v19 = vmax.f32 %v1866_v18, 0.0 }
 0x310   :  { %v1869_v20 = vpop.f32.mrf.mxu0  ;;  %2601 = vmatmul.mubr.bf16.gmra.mxu1 %v2156_v17 }
 0x311   :  { %v1870_v16 = vadd.f32 %v1869_v20, %v4586_v43  ;;  %v2070_v23 = vmax.f32 %v1868_v7, 0.0 }
 0x312   :  { %v1873_v15 = vpop.f32.mrf.mxu0 }
 0x313   :  { %v2071_v24 = vmax.f32 %v1870_v16, 0.0  ;;  %v2158_v29 = vpack.c.bf16 %v2070_v23, %v2068_v26  ;;  %v1874_v36 = vadd.f32 %v1873_v15, %v4589_v10 }
 0x314   :  { %v1875_v25 = vpop.f32.mrf.mxu0 }
 0x315   :  { %v2159_v27 = vpack.c.bf16 %v2071_v24, %v2069_v19  ;;  %v1876_v30 = vadd.f32 %v1875_v25, %v4586_v43  ;;  %v2072_v42 = vmax.f32 %v1874_v36, 0.0 }
 0x316   :  { %v1877_v28 = vpop.f32.mrf.mxu0 }
 0x317   :  { %v1878_v33 = vadd.f32 %v1877_v28, %v4589_v10  ;;  %2610 = vmatprep.mubr.bf16.mxu1 %v2159_v27  ;;  %v2073_v3 = vmax.f32 %v1876_v30, 0.0 }
 0x318   :  { %v1879_v34 = vpop.f32.mrf.mxu0  ;;  %2611 = vmatmul.mubr.bf16.gmra.mxu1 %v2158_v29 }
 0x319   :  { %v1880_v37 = vadd.f32 %v1879_v34, %v4586_v43  ;;  %v2074_v40 = vmax.f32 %v1878_v33, 0.0 }
 0x31a   :  { %v1883_v32 = vpop.f32.mrf.mxu0 }
 0x31b   :  { %v2075_v41 = vmax.f32 %v1880_v37, 0.0  ;;  %v2160_v47 = vpack.c.bf16 %v2074_v40, %v2072_v42  ;;  %v1884_v39 = vadd.f32 %v1883_v32, %v4589_v10 }
 0x31c   :  { %v1885_v9 = vpop.f32.mrf.mxu0 }
 0x31d   :  { %v2161_v44 = vpack.c.bf16 %v2075_v41, %v2073_v3  ;;  %v1886_v38 = vadd.f32 %v1885_v9, %v4586_v43  ;;  %v2076_v61 = vmax.f32 %v1884_v39, 0.0 }
 0x31e   :  { %v1887_v46 = vpop.f32.mrf.mxu0 }
 0x31f   :  { %v1888_v48 = vadd.f32 %v1887_v46, %v4589_v10  ;;  %2620 = vmatprep.mubr.bf16.mxu1 %v2161_v44  ;;  %v2077_v56 = vmax.f32 %v1886_v38, 0.0 }
 0x320   :  { %v1889_v50 = vpop.f32.mrf.mxu0  ;;  %2621 = vmatmul.mubr.bf16.gmra.mxu1 %v2160_v47 }
 0x321   :  { %v1890_v52 = vadd.f32 %v1889_v50, %v4586_v43  ;;  %v2078_v49 = vmax.f32 %v1888_v48, 0.0  ;;  %v2216_v48 = vld [vmem:[%s5233_s8] sm:$0x3] }
 0x322   :  { %v1893_v53 = vpop.f32.mrf.mxu0 }
 0x323   :  { %v2079_v57 = vmax.f32 %v1890_v52, 0.0  ;;  %v2162_v0 = vpack.c.bf16 %v2078_v49, %v2076_v61  ;;  %v1894_v22 = vadd.f32 %v1893_v53, %v4589_v10  ;;  %v4743_v49 = vrot.slane %v2216_v48, %v4385_v45 }
 0x324   :  { %v1895_v51 = vpop.f32.mrf.mxu0 }
 0x325   :  { %v2163_v62 = vpack.c.bf16 %v2079_v57, %v2077_v56  ;;  %v1896_v1 = vadd.f32 %v1895_v51, %v4586_v43  ;;  %v2080_v5 = vmax.f32 %v1894_v22, 0.0  ;;  %v4746_v51 = vrot.slane %v2216_v48, %v4393_v55 }
 0x326   :  { %v1897_v63 = vpop.f32.mrf.mxu0 }
 0x327   :  { %v1898_v2 = vadd.f32 %v1897_v63, %v4589_v10  ;;  %2630 = vmatprep.mubr.bf16.mxu1 %v2163_v62  ;;  %v2081_v54 = vmax.f32 %v1896_v1, 0.0 }
 0x328   :  { %v1899_v4 = vpop.f32.mrf.mxu0  ;;  %2631 = vmatmul.mubr.bf16.gmra.mxu1 %v2162_v0 }
 0x329   :  { %v1900_v6 = vadd.f32 %v1899_v4, %v4586_v43  ;;  %v2082_v35 = vmax.f32 %v1898_v2, 0.0 }
 0x32a   :  { %v1903_v60 = vpop.f32.mrf.mxu0 }
 0x32b   :  { %v2083_v31 = vmax.f32 %v1900_v6, 0.0  ;;  %v2164_v58 = vpack.c.bf16 %v2082_v35, %v2080_v5  ;;  %v1904_v17 = vadd.f32 %v1903_v60, %v4589_v10 }
 0x32c   :  { %v1905_v59 = vpop.f32.mrf.mxu0 }
 0x32d   :  { %v2165_v8 = vpack.c.bf16 %v2083_v31, %v2081_v54  ;;  %v1906_v12 = vadd.f32 %v1905_v59, %v4586_v43  ;;  %v2084_v19 = vmax.f32 %v1904_v17, 0.0 }
 0x32e   :  { %v1907_v11 = vpop.f32.mrf.mxu0 }
 0x32f   :  { %v1908_v13 = vadd.f32 %v1907_v11, %v4589_v10  ;;  %2640 = vmatprep.mubr.bf16.mxu1 %v2165_v8  ;;  %v2085_v20 = vmax.f32 %v1906_v12, 0.0 }
 0x330   :  { %v1909_v14 = vpop.f32.mrf.mxu0  ;;  %2641 = vmatmul.mubr.bf16.gmra.mxu1 %v2164_v58 }
 0x331   :  { %v1910_v18 = vadd.f32 %v1909_v14, %v4586_v43  ;;  %v2086_v21 = vmax.f32 %v1908_v13, 0.0 }
 0x332   :  { %v1913_v7 = vpop.f32.mrf.mxu0 }
 0x333   :  { %v2087_v16 = vmax.f32 %v1910_v18, 0.0  ;;  %v2166_v25 = vpack.c.bf16 %v2086_v21, %v2084_v19  ;;  %v1914_v29 = vadd.f32 %v1913_v7, %v4589_v10 }
 0x334   :  { %v1915_v15 = vpop.f32.mrf.mxu0 }
 0x335   :  { %v2167_v23 = vpack.c.bf16 %v2087_v16, %v2085_v20  ;;  %v1916_v26 = vadd.f32 %v1915_v15, %v4586_v43  ;;  %v2088_v3 = vmax.f32 %v1914_v29, 0.0 }
 0x336   :  { %v1917_v24 = vpop.f32.mrf.mxu0 }
 0x337   :  { %v1918_v27 = vadd.f32 %v1917_v24, %v4589_v10  ;;  %2650 = vmatprep.mubr.bf16.mxu1 %v2167_v23  ;;  %v2089_v34 = vmax.f32 %v1916_v26, 0.0 }
 0x338   :  { %v1919_v28 = vpop.f32.mrf.mxu0  ;;  %2651 = vmatmul.mubr.bf16.gmra.mxu1 %v2166_v25 }
 0x339   :  { %v1920_v30 = vadd.f32 %v1919_v28, %v4586_v43  ;;  %v2090_v36 = vmax.f32 %v1918_v27, 0.0 }
 0x33a   :  { %v1923_v33 = vpop.f32.mrf.mxu0 }
 0x33b   :  { %v2091_v37 = vmax.f32 %v1920_v30, 0.0  ;;  %v2168_v9 = vpack.c.bf16 %v2090_v36, %v2088_v3  ;;  %v1924_v47 = vadd.f32 %v1923_v33, %v4589_v10 }
 0x33c   :  { %v1925_v32 = vpop.f32.mrf.mxu0 }
 0x33d   :  { %v2169_v40 = vpack.c.bf16 %v2091_v37, %v2089_v34  ;;  %v1926_v42 = vadd.f32 %v1925_v32, %v4586_v43  ;;  %v2092_v61 = vmax.f32 %v1924_v47, 0.0 }
 0x33e   :  { %v1927_v41 = vpop.f32.mrf.mxu0 }
 0x33f   :  { %v1928_v44 = vadd.f32 %v1927_v41, %v4589_v10  ;;  %2660 = vmatprep.mubr.bf16.mxu1 %v2169_v40  ;;  %v2093_v39 = vmax.f32 %v1926_v42, 0.0 }
 0x340   :  { %v1929_v46 = vpop.f32.mrf.mxu0  ;;  %v2422_v50 = vpop.f32.mrf.mxu1  ;;  %2661 = vmatmul.mubr.bf16.gmra.mxu1 %v2168_v9 }
 0x341   :  { %v1930_v38 = vadd.f32 %v1929_v46, %v4586_v43  ;;  %v2094_v52 = vmax.f32 %v1928_v44, 0.0  ;;  %v2423_v60 = vadd.f32 %v2422_v50, %v4746_v51 }
 0x342   :  { %v1933_v56 = vpop.f32.mrf.mxu0  ;;  %v2424_v57 = vpop.f32.mrf.mxu1 }
 0x343   :  { %v2095_v53 = vmax.f32 %v1930_v38, 0.0  ;;  %v2170_v2 = vpack.c.bf16 %v2094_v52, %v2092_v61  ;;  %v2425_v4 = vadd.f32 %v2424_v57, %v4743_v49  ;;  %v1934_v59 = vadd.f32 %v1933_v56, %v4589_v10 }
 0x344   :  { %v1935_v62 = vpop.f32.mrf.mxu0  ;;  %v2426_v63 = vpop.f32.mrf.mxu1  ;;  %v2741_v14 = vmax.f32 %v2423_v60, 0.0 }
 0x345   :  { %v2171_v0 = vpack.c.bf16 %v2095_v53, %v2093_v39  ;;  %v2427_v1 = vadd.f32 %v2426_v63, %v4746_v51  ;;  %v1936_v55 = vadd.f32 %v1935_v62, %v4586_v43  ;;  %v2742_v58 = vmax.f32 %v2425_v4, 0.0 }
 0x346   :  { %v1937_v22 = vpop.f32.mrf.mxu0  ;;  %v2428_v6 = vpop.f32.mrf.mxu1  ;;  %v2096_v15 = vmax.f32 %v1934_v59, 0.0 }
 0x347   :  { %2670 = vmatprep.mubr.bf16.mxu1 %v2171_v0  ;;  %v1938_v45 = vadd.f32 %v1937_v22, %v4589_v10  ;;  %v2429_v54 = vadd.f32 %v2428_v6, %v4743_v49  ;;  %v2743_v5 = vmax.f32 %v2427_v1, 0.0  ;;  %v2097_v7 = vmax.f32 %v1936_v55, 0.0 }
 0x348   :  { %v1939_v35 = vpop.f32.mrf.mxu0  ;;  %v2432_v31 = vpop.f32.mrf.mxu1  ;;  %2671 = vmatmul.mubr.bf16.gmra.mxu1 %v2170_v2 }
 0x349   :  { %v2744_v8 = vmax.f32 %v2429_v54, 0.0  ;;  %v1940_v11 = vadd.f32 %v1939_v35, %v4586_v43  ;;  %v2098_v17 = vmax.f32 %v1938_v45, 0.0  ;;  %v2869_v19 = vpack.c.bf16 %v2743_v5, %v2741_v14 }
 0x34a   :  { %v1943_v12 = vpop.f32.mrf.mxu0  ;;  %v2434_v13 = vpop.f32.mrf.mxu1  ;;  %v2433_v29 = vadd.f32 %v2432_v31, %v4746_v51 }
 0x34b   :  { %v2099_v18 = vmax.f32 %v1940_v11, 0.0  ;;  %v2870_v16 = vpack.c.bf16 %v2744_v8, %v2742_v58  ;;  %v2435_v24 = vadd.f32 %v2434_v13, %v4743_v49  ;;  %v2172_v28 = vpack.c.bf16 %v2098_v17, %v2096_v15 }
 0x34c   :  { %v1945_v20 = vpop.f32.mrf.mxu0  ;;  %v2436_v21 = vpop.f32.mrf.mxu1  ;;  %v1944_v32 = vadd.f32 %v1943_v12, %v4589_v10  ;;  %v2745_v46 = vmax.f32 %v2433_v29, 0.0 }
 0x34d   :  { %v2437_v23 = vadd.f32 %v2436_v21, %v4746_v51  ;;  %3100 = vmatprep.mubr.bf16.mxu0 %v2870_v16  ;;  %v2173_v27 = vpack.c.bf16 %v2099_v18, %v2097_v7  ;;  %v1946_v34 = vadd.f32 %v1945_v20, %v4586_v43  ;;  %v2746_v9 = vmax.f32 %v2435_v24, 0.0 }
 0x34e   :  { %v1947_v25 = vpop.f32.mrf.mxu0  ;;  %v2438_v26 = vpop.f32.mrf.mxu1  ;;  %3101 = vmatmul.mubr.bf16.vlgmr.msra.gmra.mxu0 %v2869_v19  ;;  %v2100_v53 = vmax.f32 %v1944_v32, 0.0 }
 0x34f   :  { %v1948_v30 = vadd.f32 %v1947_v25, %v4589_v10  ;;  %v2439_v33 = vadd.f32 %v2438_v26, %v4743_v49  ;;  %2680 = vmatprep.mubr.bf16.mxu1 %v2173_v27  ;;  %v2747_v3 = vmax.f32 %v2437_v23, 0.0  ;;  %v2101_v48 = vmax.f32 %v1946_v34, 0.0 }
 0x350   :  { %v1949_v36 = vpop.f32.mrf.mxu0  ;;  %v2442_v37 = vpop.f32.mrf.mxu1  ;;  %2681 = vmatmul.mubr.bf16.gmra.mxu1 %v2172_v28 }
 0x351   :  { %v2748_v40 = vmax.f32 %v2439_v33, 0.0  ;;  %v1950_v41 = vadd.f32 %v1949_v36, %v4586_v43  ;;  %v2102_v47 = vmax.f32 %v1948_v30, 0.0  ;;  %v2871_v56 = vpack.c.bf16 %v2747_v3, %v2745_v46 }
 0x352   :  { %v1953_v42 = vpop.f32.mrf.mxu0  ;;  %v2444_v44 = vpop.f32.mrf.mxu1  ;;  %v2443_v2 = vadd.f32 %v2442_v37, %v4746_v51 }
 0x353   :  { %v2103_v38 = vmax.f32 %v1950_v41, 0.0  ;;  %v2872_v52 = vpack.c.bf16 %v2748_v40, %v2746_v9  ;;  %v2445_v61 = vadd.f32 %v2444_v44, %v4743_v49  ;;  %v2174_v1 = vpack.c.bf16 %v2102_v47, %v2100_v53 }
 0x354   :  { %v1955_v50 = vpop.f32.mrf.mxu0  ;;  %v2446_v39 = vpop.f32.mrf.mxu1  ;;  %v1954_v54 = vadd.f32 %v1953_v42, %v4589_v10  ;;  %v2749_v11 = vmax.f32 %v2443_v2, 0.0 }
 0x355   :  { %v2447_v57 = vadd.f32 %v2446_v39, %v4746_v51  ;;  %3108 = vmatprep.mubr.bf16.mxu0 %v2872_v52  ;;  %v2175_v0 = vpack.c.bf16 %v2103_v38, %v2101_v48  ;;  %v1956_v6 = vadd.f32 %v1955_v50, %v4586_v43  ;;  %v2750_v59 = vmax.f32 %v2445_v61, 0.0 }
 0x356   :  { %v1957_v62 = vpop.f32.mrf.mxu0  ;;  %v2448_v63 = vpop.f32.mrf.mxu1  ;;  %3109 = vmatmul.mubr.bf16.gmra.mxu0 %v2871_v56  ;;  %v2104_v7 = vmax.f32 %v1954_v54, 0.0 }
 0x357   :  { %v1958_v4 = vadd.f32 %v1957_v62, %v4589_v10  ;;  %v2449_v22 = vadd.f32 %v2448_v63, %v4743_v49  ;;  %2690 = vmatprep.mubr.bf16.mxu1 %v2175_v0  ;;  %v2751_v55 = vmax.f32 %v2447_v57, 0.0  ;;  %v2105_v13 = vmax.f32 %v1956_v6, 0.0 }
 0x358   :  { %v1959_v60 = vpop.f32.mrf.mxu0  ;;  %v2452_v45 = vpop.f32.mrf.mxu1  ;;  %2691 = vmatmul.mubr.bf16.gmra.mxu1 %v2174_v1 }
 0x359   :  { %v2752_v35 = vmax.f32 %v2449_v22, 0.0  ;;  %v1960_v31 = vadd.f32 %v1959_v60, %v4586_v43  ;;  %v2106_v58 = vmax.f32 %v1958_v4, 0.0  ;;  %v2873_v20 = vpack.c.bf16 %v2751_v55, %v2749_v11 }
 0x35a   :  { %v1963_v5 = vpop.f32.mrf.mxu0  ;;  %v2454_v8 = vpop.f32.mrf.mxu1  ;;  %v2453_v25 = vadd.f32 %v2452_v45, %v4746_v51 }
 0x35b   :  { %v2107_v12 = vmax.f32 %v1960_v31, 0.0  ;;  %v2874_v18 = vpack.c.bf16 %v2752_v35, %v2750_v59  ;;  %v2455_v16 = vadd.f32 %v2454_v8, %v4743_v49  ;;  %v2176_v24 = vpack.c.bf16 %v2106_v58, %v2104_v7 }
 0x35c   :  { %v1965_v14 = vpop.f32.mrf.mxu0  ;;  %v2456_v17 = vpop.f32.mrf.mxu1  ;;  %v1964_v33 = vadd.f32 %v1963_v5, %v4589_v10  ;;  %v2753_v41 = vmax.f32 %v2453_v25, 0.0 }
 0x35d   :  { %v2457_v21 = vadd.f32 %v2456_v17, %v4746_v51  ;;  %3116 = vmatprep.mubr.bf16.mxu0 %v2874_v18  ;;  %v2177_v23 = vpack.c.bf16 %v2107_v12, %v2105_v13  ;;  %v1966_v28 = vadd.f32 %v1965_v14, %v4586_v43  ;;  %v2754_v32 = vmax.f32 %v2455_v16, 0.0 }
 0x35e   :  { %v1967_v15 = vpop.f32.mrf.mxu0  ;;  %v2458_v19 = vpop.f32.mrf.mxu1  ;;  %3117 = vmatmul.mubr.bf16.gmra.mxu0 %v2873_v20  ;;  %v2108_v48 = vmax.f32 %v1964_v33, 0.0 }
 0x35f   :  { %v1968_v26 = vadd.f32 %v1967_v15, %v4589_v10  ;;  %v2459_v27 = vadd.f32 %v2458_v19, %v4743_v49  ;;  %2700 = vmatprep.mubr.bf16.mxu1 %v2177_v23  ;;  %v2755_v34 = vmax.f32 %v2457_v21, 0.0  ;;  %v2109_v44 = vmax.f32 %v1966_v28, 0.0 }
 0x360   :  { %v1969_v29 = vpop.f32.mrf.mxu0  ;;  %v2462_v30 = vpop.f32.mrf.mxu1  ;;  %2701 = vmatmul.mubr.bf16.gmra.mxu1 %v2176_v24 }
 0x361   :  { %v2756_v36 = vmax.f32 %v2459_v27, 0.0  ;;  %v1970_v37 = vadd.f32 %v1969_v29, %v4586_v43  ;;  %v2110_v9 = vmax.f32 %v1968_v26, 0.0  ;;  %v2875_v50 = vpack.c.bf16 %v2755_v34, %v2753_v41 }
 0x362   :  { %v1973_v3 = vpop.f32.mrf.mxu0  ;;  %v2464_v40 = vpop.f32.mrf.mxu1  ;;  %v2463_v53 = vadd.f32 %v2462_v30, %v4746_v51 }
 0x363   :  { %v2111_v42 = vmax.f32 %v1970_v37, 0.0  ;;  %v2876_v38 = vpack.c.bf16 %v2756_v36, %v2754_v32  ;;  %v2465_v39 = vadd.f32 %v2464_v40, %v4743_v49  ;;  %v2178_v62 = vpack.c.bf16 %v2110_v9, %v2108_v48 }
 0x364   :  { %v1975_v46 = vpop.f32.mrf.mxu0  ;;  %v2466_v47 = vpop.f32.mrf.mxu1  ;;  %v1974_v2 = vadd.f32 %v1973_v3, %v4589_v10  ;;  %v2757_v59 = vmax.f32 %v2463_v53, 0.0 }
 0x365   :  { %v2467_v52 = vadd.f32 %v2466_v47, %v4746_v51  ;;  %3124 = vmatprep.mubr.bf16.mxu0 %v2876_v38  ;;  %v2179_v61 = vpack.c.bf16 %v2111_v42, %v2109_v44  ;;  %v1976_v63 = vadd.f32 %v1975_v46, %v4586_v43  ;;  %v2758_v6 = vmax.f32 %v2465_v39, 0.0 }
 0x366   :  { %v1977_v56 = vpop.f32.mrf.mxu0  ;;  %v2468_v57 = vpop.f32.mrf.mxu1  ;;  %3125 = vmatmul.mubr.bf16.gmra.mxu0 %v2875_v50  ;;  %v2112_v58 = vmax.f32 %v1974_v2, 0.0 }
 0x367   :  { %v1978_v0 = vadd.f32 %v1977_v56, %v4589_v10  ;;  %v2469_v1 = vadd.f32 %v2468_v57, %v4743_v49  ;;  %2710 = vmatprep.mubr.bf16.mxu1 %v2179_v61  ;;  %v2759_v60 = vmax.f32 %v2467_v52, 0.0  ;;  %v2113_v5 = vmax.f32 %v1976_v63, 0.0 }
 0x368   :  { %v1979_v4 = vpop.f32.mrf.mxu0  ;;  %v2472_v22 = vpop.f32.mrf.mxu1  ;;  %2711 = vmatmul.mubr.bf16.gmra.mxu1 %v2178_v62 }
 0x369   :  { %v2760_v45 = vmax.f32 %v2469_v1, 0.0  ;;  %v1980_v54 = vadd.f32 %v1979_v4, %v4586_v43  ;;  %v2114_v55 = vmax.f32 %v1978_v0, 0.0  ;;  %v2877_v14 = vpack.c.bf16 %v2759_v60, %v2757_v59 }
 0x36a   :  { %v1983_v35 = vpop.f32.mrf.mxu0  ;;  %v2474_v31 = vpop.f32.mrf.mxu1  ;;  %v2473_v21 = vadd.f32 %v2472_v22, %v4746_v51 }
 0x36b   :  { %v2878_v8 = vpack.c.bf16 %v2760_v45, %v2758_v6  ;;  %v2115_v11 = vmax.f32 %v1980_v54, 0.0  ;;  %v2475_v17 = vadd.f32 %v2474_v31, %v4743_v49  ;;  %v2180_v20 = vpack.c.bf16 %v2114_v55, %v2112_v58 }
 0x36c   :  { %v1985_v12 = vpop.f32.mrf.mxu0  ;;  %v2476_v13 = vpop.f32.mrf.mxu1  ;;  %v1984_v25 = vadd.f32 %v1983_v35, %v4589_v10  ;;  %v2761_v34 = vmax.f32 %v2473_v21, 0.0 }
 0x36d   :  { %v2477_v18 = vadd.f32 %v2476_v13, %v4746_v51  ;;  %3132 = vmatprep.mubr.bf16.mxu0 %v2878_v8  ;;  %v2181_v7 = vpack.c.bf16 %v2115_v11, %v2113_v5  ;;  %v1986_v19 = vadd.f32 %v1985_v12, %v4586_v43  ;;  %v2762_v28 = vmax.f32 %v2475_v17, 0.0 }
 0x36e   :  { %v1987_v16 = vpop.f32.mrf.mxu0  ;;  %v2478_v15 = vpop.f32.mrf.mxu1  ;;  %3133 = vmatmul.mubr.bf16.gmra.mxu0 %v2877_v14  ;;  %v2116_v41 = vmax.f32 %v1984_v25, 0.0 }
 0x36f   :  { %v1988_v23 = vadd.f32 %v1987_v16, %v4589_v10  ;;  %v2479_v24 = vadd.f32 %v2478_v15, %v4743_v49  ;;  %2720 = vmatprep.mubr.bf16.mxu1 %v2181_v7  ;;  %v2763_v29 = vmax.f32 %v2477_v18, 0.0  ;;  %v2117_v37 = vmax.f32 %v1986_v19, 0.0 }
 0x370   :  { %v1989_v26 = vpop.f32.mrf.mxu0  ;;  %v2482_v27 = vpop.f32.mrf.mxu1  ;;  %2721 = vmatmul.mubr.bf16.gmra.mxu1 %v2180_v20 }
 0x371   :  { %v2764_v30 = vmax.f32 %v2479_v24, 0.0  ;;  %v1990_v33 = vadd.f32 %v1989_v26, %v4586_v43  ;;  %v2118_v32 = vmax.f32 %v1988_v23, 0.0  ;;  %v2879_v42 = vpack.c.bf16 %v2763_v29, %v2761_v34 }
 0x372   :  { %v2484_v36 = vpop.f32.mrf.mxu1  ;;  %v2483_v43 = vadd.f32 %v2482_v27, %v4746_v51 }
 0x373   :  { %v2880_v3 = vpack.c.bf16 %v2764_v30, %v2762_v28  ;;  %v2119_v40 = vmax.f32 %v1990_v33, 0.0  ;;  %v2485_v44 = vadd.f32 %v2484_v36, %v4743_v49  ;;  %v2182_v38 = vpack.c.bf16 %v2118_v32, %v2116_v41 }
 0x374   :  { %v2486_v9 = vpop.f32.mrf.mxu1  ;;  %v2765_v57 = vmax.f32 %v2483_v43, 0.0 }
 0x375   :  { %v2487_v10 = vadd.f32 %v2486_v9, %v4746_v51  ;;  %3140 = vmatprep.mubr.bf16.mxu0 %v2880_v3  ;;  %v2183_v46 = vpack.c.bf16 %v2119_v40, %v2117_v37  ;;  %v2766_v39 = vmax.f32 %v2485_v44, 0.0 }
 0x376   :  { %v2488_v47 = vpop.f32.mrf.mxu1  ;;  %3141 = vmatmul.mubr.bf16.gmra.mxu0 %v2879_v42 }
 0x377   :  { %v2489_v48 = vadd.f32 %v2488_v47, %v4743_v49  ;;  %2730 = vmatprep.mubr.bf16.mxu1 %v2183_v46  ;;  %v2767_v52 = vmax.f32 %v2487_v10, 0.0 }
 0x378   :  { %v2492_v50 = vpop.f32.mrf.mxu1  ;;  %2731 = vmatmul.mubr.bf16.gmra.mxu1 %v2182_v38 }
 0x379   :  { %v2768_v53 = vmax.f32 %v2489_v48, 0.0  ;;  %v2881_v63 = vpack.c.bf16 %v2767_v52, %v2765_v57  ;;  %v2493_v4 = vadd.f32 %v2492_v50, %v4746_v51 }
 0x37a   :  { %v2494_v56 = vpop.f32.mrf.mxu1 }
 0x37b   :  { %v2882_v61 = vpack.c.bf16 %v2768_v53, %v2766_v39  ;;  %v2495_v0 = vadd.f32 %v2494_v56, %v4743_v49  ;;  %v2769_v35 = vmax.f32 %v2493_v4, 0.0 }
 0x37c   :  { %v2496_v62 = vpop.f32.mrf.mxu1 }
 0x37d   :  { %v2497_v1 = vadd.f32 %v2496_v62, %v4746_v51  ;;  %3148 = vmatprep.mubr.bf16.mxu0 %v2882_v61  ;;  %v2770_v60 = vmax.f32 %v2495_v0, 0.0 }
 0x37e   :  { %v2498_v2 = vpop.f32.mrf.mxu1  ;;  %3149 = vmatmul.mubr.bf16.gmra.mxu0 %v2881_v63 }
 0x37f   :  { %v2499_v22 = vadd.f32 %v2498_v2, %v4743_v49  ;;  %v2771_v45 = vmax.f32 %v2497_v1, 0.0 }
 0x380   :  { %v2502_v6 = vpop.f32.mrf.mxu1 }
 0x381   :  { %v2772_v54 = vmax.f32 %v2499_v22, 0.0  ;;  %v2883_v5 = vpack.c.bf16 %v2771_v45, %v2769_v35  ;;  %v2503_v12 = vadd.f32 %v2502_v6, %v4746_v51 }
 0x382   :  { %v2504_v55 = vpop.f32.mrf.mxu1 }
 0x383   :  { %v2884_v31 = vpack.c.bf16 %v2772_v54, %v2770_v60  ;;  %v2505_v8 = vadd.f32 %v2504_v55, %v4743_v49  ;;  %v2773_v21 = vmax.f32 %v2503_v12, 0.0 }
 0x384   :  { %v2506_v59 = vpop.f32.mrf.mxu1 }
 0x385   :  { %v2507_v11 = vadd.f32 %v2506_v59, %v4746_v51  ;;  %3156 = vmatprep.mubr.bf16.mxu0 %v2884_v31  ;;  %v2774_v17 = vmax.f32 %v2505_v8, 0.0 }
 0x386   :  { %v2508_v58 = vpop.f32.mrf.mxu1  ;;  %3157 = vmatmul.mubr.bf16.gmra.mxu0 %v2883_v5 }
 0x387   :  { %v2509_v13 = vadd.f32 %v2508_v58, %v4743_v49  ;;  %v2775_v18 = vmax.f32 %v2507_v11, 0.0 }
 0x388   :  { %v2512_v14 = vpop.f32.mrf.mxu1 }
 0x389   :  { %v2776_v7 = vmax.f32 %v2509_v13, 0.0  ;;  %v2885_v19 = vpack.c.bf16 %v2775_v18, %v2773_v21  ;;  %v2513_v26 = vadd.f32 %v2512_v14, %v4746_v51 }
 0x38a   :  { %v2514_v20 = vpop.f32.mrf.mxu1 }
 0x38b   :  { %v2886_v16 = vpack.c.bf16 %v2776_v7, %v2774_v17  ;;  %v2515_v23 = vadd.f32 %v2514_v20, %v4743_v49  ;;  %v2777_v36 = vmax.f32 %v2513_v26, 0.0 }
 0x38c   :  { %v2516_v15 = vpop.f32.mrf.mxu1 }
 0x38d   :  { %v2517_v24 = vadd.f32 %v2516_v15, %v4746_v51  ;;  %3164 = vmatprep.mubr.bf16.mxu0 %v2886_v16  ;;  %v2778_v29 = vmax.f32 %v2515_v23, 0.0 }
 0x38e   :  { %v2518_v25 = vpop.f32.mrf.mxu1  ;;  %3165 = vmatmul.mubr.bf16.gmra.mxu0 %v2885_v19 }
 0x38f   :  { %v2519_v27 = vadd.f32 %v2518_v25, %v4743_v49  ;;  %v2779_v30 = vmax.f32 %v2517_v24, 0.0 }
 0x390   :  { %v2522_v28 = vpop.f32.mrf.mxu1 }
 0x391   :  { %v2780_v33 = vmax.f32 %v2519_v27, 0.0  ;;  %v2887_v3 = vpack.c.bf16 %v2779_v30, %v2777_v36  ;;  %v2523_v42 = vadd.f32 %v2522_v28, %v4746_v51 }
 0x392   :  { %v2524_v34 = vpop.f32.mrf.mxu1 }
 0x393   :  { %v2888_v37 = vpack.c.bf16 %v2780_v33, %v2778_v29  ;;  %v2525_v40 = vadd.f32 %v2524_v34, %v4743_v49  ;;  %v2781_v48 = vmax.f32 %v2523_v42, 0.0 }
 0x394   :  { %v2526_v32 = vpop.f32.mrf.mxu1 }
 0x395   :  { %v2527_v41 = vadd.f32 %v2526_v32, %v4746_v51  ;;  %3172 = vmatprep.mubr.bf16.mxu0 %v2888_v37  ;;  %v2782_v46 = vmax.f32 %v2525_v40, 0.0 }
 0x396   :  { %v2528_v9 = vpop.f32.mrf.mxu1  ;;  %3173 = vmatmul.mubr.bf16.gmra.mxu0 %v2887_v3 }
 0x397   :  { %v2529_v44 = vadd.f32 %v2528_v9, %v4743_v49  ;;  %v2783_v47 = vmax.f32 %v2527_v41, 0.0 }
 0x398   :  { %v2532_v10 = vpop.f32.mrf.mxu1 }
 0x399   :  { %v2784_v38 = vmax.f32 %v2529_v44, 0.0  ;;  %v2889_v52 = vpack.c.bf16 %v2783_v47, %v2781_v48  ;;  %v2533_v61 = vadd.f32 %v2532_v10, %v4746_v51 }
 0x39a   :  { %v2534_v43 = vpop.f32.mrf.mxu1 }
 0x39b   :  { %v2890_v50 = vpack.c.bf16 %v2784_v38, %v2782_v46  ;;  %v2535_v53 = vadd.f32 %v2534_v43, %v4743_v49  ;;  %v2785_v22 = vmax.f32 %v2533_v61, 0.0 }
 0x39c   :  { %v2536_v39 = vpop.f32.mrf.mxu1 }
 0x39d   :  { %v2537_v56 = vadd.f32 %v2536_v39, %v4746_v51  ;;  %3180 = vmatprep.mubr.bf16.mxu0 %v2890_v50  ;;  %v2786_v0 = vmax.f32 %v2535_v53, 0.0 }
 0x39e   :  { %v2538_v57 = vpop.f32.mrf.mxu1  ;;  %3181 = vmatmul.mubr.bf16.gmra.mxu0 %v2889_v52 }
 0x39f   :  { %v2539_v62 = vadd.f32 %v2538_v57, %v4743_v49  ;;  %v2787_v1 = vmax.f32 %v2537_v56, 0.0 }
 0x3a0   :  { %v2542_v63 = vpop.f32.mrf.mxu1 }
 0x3a1   :  { %v2788_v2 = vmax.f32 %v2539_v62, 0.0  ;;  %v2891_v45 = vpack.c.bf16 %v2787_v1, %v2785_v22  ;;  %v2543_v31 = vadd.f32 %v2542_v63, %v4746_v51 }
 0x3a2   :  { %v2544_v4 = vpop.f32.mrf.mxu1 }
 0x3a3   :  { %v2892_v6 = vpack.c.bf16 %v2788_v2, %v2786_v0  ;;  %v2545_v54 = vadd.f32 %v2544_v4, %v4743_v49  ;;  %v2789_v13 = vmax.f32 %v2543_v31, 0.0 }
 0x3a4   :  { %v2546_v60 = vpop.f32.mrf.mxu1 }
 0x3a5   :  { %v2547_v55 = vadd.f32 %v2546_v60, %v4746_v51  ;;  %3188 = vmatprep.mubr.bf16.mxu0 %v2892_v6  ;;  %v2790_v8 = vmax.f32 %v2545_v54, 0.0 }
 0x3a6   :  { %v2548_v35 = vpop.f32.mrf.mxu1  ;;  %3189 = vmatmul.mubr.bf16.gmra.mxu0 %v2891_v45 }
 0x3a7   :  { %v2549_v59 = vadd.f32 %v2548_v35, %v4743_v49  ;;  %v2791_v11 = vmax.f32 %v2547_v55, 0.0 }
 0x3a8   :  { %v2552_v5 = vpop.f32.mrf.mxu1 }
 0x3a9   :  { %v2792_v58 = vmax.f32 %v2549_v59, 0.0  ;;  %v2893_v18 = vpack.c.bf16 %v2791_v11, %v2789_v13  ;;  %v2553_v16 = vadd.f32 %v2552_v5, %v4746_v51 }
 0x3aa   :  { %v2554_v12 = vpop.f32.mrf.mxu1 }
 0x3ab   :  { %v2894_v14 = vpack.c.bf16 %v2792_v58, %v2790_v8  ;;  %v2555_v7 = vadd.f32 %v2554_v12, %v4743_v49  ;;  %v2793_v27 = vmax.f32 %v2553_v16, 0.0 }
 0x3ac   :  { %v2556_v17 = vpop.f32.mrf.mxu1 }
 0x3ad   :  { %v2557_v20 = vadd.f32 %v2556_v17, %v4746_v51  ;;  %3196 = vmatprep.mubr.bf16.mxu0 %v2894_v14  ;;  %v2794_v23 = vmax.f32 %v2555_v7, 0.0 }
 0x3ae   :  { %v2558_v21 = vpop.f32.mrf.mxu1  ;;  %3197 = vmatmul.mubr.bf16.gmra.mxu0 %v2893_v18 }
 0x3af   :  { %v2559_v15 = vadd.f32 %v2558_v21, %v4743_v49  ;;  %v2795_v24 = vmax.f32 %v2557_v20, 0.0 }
 0x3b0   :  { %v2562_v19 = vpop.f32.mrf.mxu1 }
 0x3b1   :  { %v2796_v25 = vmax.f32 %v2559_v15, 0.0  ;;  %v2895_v30 = vpack.c.bf16 %v2795_v24, %v2793_v27  ;;  %v2563_v37 = vadd.f32 %v2562_v19, %v4746_v51 }
 0x3b2   :  { %v2564_v26 = vpop.f32.mrf.mxu1 }
 0x3b3   :  { %v2896_v28 = vpack.c.bf16 %v2796_v25, %v2794_v23  ;;  %v2565_v33 = vadd.f32 %v2564_v26, %v4743_v49  ;;  %v2797_v44 = vmax.f32 %v2563_v37, 0.0 }
 0x3b4   :  { %v2566_v29 = vpop.f32.mrf.mxu1 }
 0x3b5   :  { %v2567_v34 = vadd.f32 %v2566_v29, %v4746_v51  ;;  %3204 = vmatprep.mubr.bf16.mxu0 %v2896_v28  ;;  %v2798_v40 = vmax.f32 %v2565_v33, 0.0 }
 0x3b6   :  { %v2568_v36 = vpop.f32.mrf.mxu1  ;;  %3205 = vmatmul.mubr.bf16.gmra.mxu0 %v2895_v30 }
 0x3b7   :  { %v2569_v32 = vadd.f32 %v2568_v36, %v4743_v49  ;;  %v2799_v41 = vmax.f32 %v2567_v34, 0.0 }
 0x3b8   :  { %v2572_v3 = vpop.f32.mrf.mxu1 }
 0x3b9   :  { %v2800_v9 = vmax.f32 %v2569_v32, 0.0  ;;  %v2897_v47 = vpack.c.bf16 %v2799_v41, %v2797_v44  ;;  %v2573_v50 = vadd.f32 %v2572_v3, %v4746_v51 }
 0x3ba   :  { %v2574_v42 = vpop.f32.mrf.mxu1 }
 0x3bb   :  { %v2898_v10 = vpack.c.bf16 %v2800_v9, %v2798_v40  ;;  %v2575_v38 = vadd.f32 %v2574_v42, %v4743_v49  ;;  %v2801_v62 = vmax.f32 %v2573_v50, 0.0 }
 0x3bc   :  { %v2576_v46 = vpop.f32.mrf.mxu1 }
 0x3bd   :  { %v2577_v43 = vadd.f32 %v2576_v46, %v4746_v51  ;;  %3212 = vmatprep.mubr.bf16.mxu0 %v2898_v10  ;;  %v2802_v53 = vmax.f32 %v2575_v38, 0.0 }
 0x3be   :  { %v2578_v48 = vpop.f32.mrf.mxu1  ;;  %3213 = vmatmul.mubr.bf16.gmra.mxu0 %v2897_v47 }
 0x3bf   :  { %v2579_v39 = vadd.f32 %v2578_v48, %v4743_v49  ;;  %v2803_v56 = vmax.f32 %v2577_v43, 0.0 }
 0x3c0   :  { %v2582_v52 = vpop.f32.mrf.mxu1 }
 0x3c1   :  { %v2804_v57 = vmax.f32 %v2579_v39, 0.0  ;;  %v2899_v1 = vpack.c.bf16 %v2803_v56, %v2801_v62  ;;  %v2583_v6 = vadd.f32 %v2582_v52, %v4746_v51 }
 0x3c2   :  { %v2584_v61 = vpop.f32.mrf.mxu1 }
 0x3c3   :  { %v2900_v63 = vpack.c.bf16 %v2804_v57, %v2802_v53  ;;  %v2585_v2 = vadd.f32 %v2584_v61, %v4743_v49  ;;  %v2805_v59 = vmax.f32 %v2583_v6, 0.0 }
 0x3c4   :  { %v2586_v0 = vpop.f32.mrf.mxu1 }
 0x3c5   :  { %v2587_v4 = vadd.f32 %v2586_v0, %v4746_v51  ;;  %3220 = vmatprep.mubr.bf16.mxu0 %v2900_v63  ;;  %v2806_v54 = vmax.f32 %v2585_v2, 0.0 }
 0x3c6   :  { %v2588_v22 = vpop.f32.mrf.mxu1  ;;  %3221 = vmatmul.mubr.bf16.gmra.mxu0 %v2899_v1 }
 0x3c7   :  { %v2589_v60 = vadd.f32 %v2588_v22, %v4743_v49  ;;  %v2807_v55 = vmax.f32 %v2587_v4, 0.0 }
 0x3c8   :  { %v2592_v45 = vpop.f32.mrf.mxu1 }
 0x3c9   :  { %v2808_v35 = vmax.f32 %v2589_v60, 0.0  ;;  %v2901_v11 = vpack.c.bf16 %v2807_v55, %v2805_v59  ;;  %v2593_v14 = vadd.f32 %v2592_v45, %v4746_v51 }
 0x3ca   :  { %v2594_v31 = vpop.f32.mrf.mxu1 }
 0x3cb   :  { %v2902_v5 = vpack.c.bf16 %v2808_v35, %v2806_v54  ;;  %v2595_v58 = vadd.f32 %v2594_v31, %v4743_v49  ;;  %v2809_v15 = vmax.f32 %v2593_v14, 0.0 }
 0x3cc   :  { %v2596_v8 = vpop.f32.mrf.mxu1 }
 0x3cd   :  { %v2597_v12 = vadd.f32 %v2596_v8, %v4746_v51  ;;  %3228 = vmatprep.mubr.bf16.mxu0 %v2902_v5  ;;  %v2810_v7 = vmax.f32 %v2595_v58, 0.0 }
 0x3ce   :  { %v2598_v13 = vpop.f32.mrf.mxu1  ;;  %3229 = vmatmul.mubr.bf16.gmra.mxu0 %v2901_v11 }
 0x3cf   :  { %v2599_v17 = vadd.f32 %v2598_v13, %v4743_v49  ;;  %v2811_v20 = vmax.f32 %v2597_v12, 0.0 }
 0x3d0   :  { %v2602_v18 = vpop.f32.mrf.mxu1 }
 0x3d1   :  { %v2812_v21 = vmax.f32 %v2599_v17, 0.0  ;;  %v2903_v24 = vpack.c.bf16 %v2811_v20, %v2809_v15  ;;  %v2603_v28 = vadd.f32 %v2602_v18, %v4746_v51 }
 0x3d2   :  { %v2604_v16 = vpop.f32.mrf.mxu1 }
 0x3d3   :  { %v2904_v19 = vpack.c.bf16 %v2812_v21, %v2810_v7  ;;  %v2605_v25 = vadd.f32 %v2604_v16, %v4743_v49  ;;  %v2813_v32 = vmax.f32 %v2603_v28, 0.0 }
 0x3d4   :  { %v2606_v23 = vpop.f32.mrf.mxu1 }
 0x3d5   :  { %v2607_v26 = vadd.f32 %v2606_v23, %v4746_v51  ;;  %3236 = vmatprep.mubr.bf16.mxu0 %v2904_v19  ;;  %v2814_v33 = vmax.f32 %v2605_v25, 0.0 }
 0x3d6   :  { %v2608_v27 = vpop.f32.mrf.mxu1  ;;  %3237 = vmatmul.mubr.bf16.gmra.mxu0 %v2903_v24 }
 0x3d7   :  { %v2609_v29 = vadd.f32 %v2608_v27, %v4743_v49  ;;  %v2815_v34 = vmax.f32 %v2607_v26, 0.0 }
 0x3d8   :  { %v2612_v30 = vpop.f32.mrf.mxu1 }
 0x3d9   :  { %v2816_v36 = vmax.f32 %v2609_v29, 0.0  ;;  %v2905_v41 = vpack.c.bf16 %v2815_v34, %v2813_v32  ;;  %v2613_v10 = vadd.f32 %v2612_v30, %v4746_v51 }
 0x3da   :  { %v2614_v37 = vpop.f32.mrf.mxu1 }
 0x3db   :  { %v2906_v3 = vpack.c.bf16 %v2816_v36, %v2814_v33  ;;  %v2615_v9 = vadd.f32 %v2614_v37, %v4743_v49  ;;  %v2817_v39 = vmax.f32 %v2613_v10, 0.0 }
 0x3dc   :  { %v2616_v40 = vpop.f32.mrf.mxu1 }
 0x3dd   :  { %v2617_v42 = vadd.f32 %v2616_v40, %v4746_v51  ;;  %3244 = vmatprep.mubr.bf16.mxu0 %v2906_v3  ;;  %v2818_v38 = vmax.f32 %v2615_v9, 0.0 }
 0x3de   :  { %v2618_v44 = vpop.f32.mrf.mxu1  ;;  %3245 = vmatmul.mubr.bf16.gmra.mxu0 %v2905_v41 }
 0x3df   :  { %v2619_v46 = vadd.f32 %v2618_v44, %v4743_v49  ;;  %v2819_v43 = vmax.f32 %v2617_v42, 0.0 }
 0x3e0   :  { %v2622_v47 = vpop.f32.mrf.mxu1 }
 0x3e1   :  { %v2820_v48 = vmax.f32 %v2619_v46, 0.0  ;;  %v2907_v56 = vpack.c.bf16 %v2819_v43, %v2817_v39  ;;  %v2623_v63 = vadd.f32 %v2622_v47, %v4746_v51 }
 0x3e2   :  { %v2624_v50 = vpop.f32.mrf.mxu1 }
 0x3e3   :  { %v2908_v52 = vpack.c.bf16 %v2820_v48, %v2818_v38  ;;  %v2625_v57 = vadd.f32 %v2624_v50, %v4743_v49  ;;  %v2821_v60 = vmax.f32 %v2623_v63, 0.0 }
 0x3e4   :  { %v2626_v53 = vpop.f32.mrf.mxu1 }
 0x3e5   :  { %v2627_v61 = vadd.f32 %v2626_v53, %v4746_v51  ;;  %3252 = vmatprep.mubr.bf16.mxu0 %v2908_v52  ;;  %v2822_v2 = vmax.f32 %v2625_v57, 0.0 }
 0x3e6   :  { %v2628_v62 = vpop.f32.mrf.mxu1  ;;  %3253 = vmatmul.mubr.bf16.gmra.mxu0 %v2907_v56 }
 0x3e7   :  { %v2629_v0 = vadd.f32 %v2628_v62, %v4743_v49  ;;  %v2823_v4 = vmax.f32 %v2627_v61, 0.0 }
 0x3e8   :  { %v2632_v1 = vpop.f32.mrf.mxu1 }
 0x3e9   :  { %v2824_v22 = vmax.f32 %v2629_v0, 0.0  ;;  %v2909_v55 = vpack.c.bf16 %v2823_v4, %v2821_v60  ;;  %v2633_v5 = vadd.f32 %v2632_v1, %v4746_v51  ;;  %v4877_v60 = vld [vmem:[%s5235_s10] ss:$0 sm:$0xff] }
 0x3ea   :  { %v2634_v6 = vpop.f32.mrf.mxu1 }
 0x3eb   :  { %v2910_v45 = vpack.c.bf16 %v2824_v22, %v2822_v2  ;;  %v2635_v35 = vadd.f32 %v2634_v6, %v4743_v49  ;;  %v2825_v17 = vmax.f32 %v2633_v5, 0.0 }
 0x3ec   :  { %v2636_v54 = vpop.f32.mrf.mxu1 }
 0x3ed   :  { %v2637_v31 = vadd.f32 %v2636_v54, %v4746_v51  ;;  %3260 = vmatprep.mubr.bf16.mxu0 %v2910_v45  ;;  %v2826_v58 = vmax.f32 %v2635_v35, 0.0 }
 0x3ee   :  { %v2638_v59 = vpop.f32.mrf.mxu1  ;;  %3261 = vmatmul.mubr.bf16.gmra.mxu0 %v2909_v55 }
 0x3ef   :  { %v2639_v8 = vadd.f32 %v2638_v59, %v4743_v49  ;;  %v2827_v12 = vmax.f32 %v2637_v31, 0.0 }
 0x3f0   :  { %v2642_v11 = vpop.f32.mrf.mxu1 }
 0x3f1   :  { %v2828_v13 = vmax.f32 %v2639_v8, 0.0  ;;  %v2911_v20 = vpack.c.bf16 %v2827_v12, %v2825_v17  ;;  %v2643_v19 = vadd.f32 %v2642_v11, %v4746_v51 }
 0x3f2   :  { %v2644_v14 = vpop.f32.mrf.mxu1 }
 0x3f3   :  { %v2912_v18 = vpack.c.bf16 %v2828_v13, %v2826_v58  ;;  %v2645_v21 = vadd.f32 %v2644_v14, %v4743_v49  ;;  %v2829_v29 = vmax.f32 %v2643_v19, 0.0 }
 0x3f4   :  { %v2646_v7 = vpop.f32.mrf.mxu1 }
 0x3f5   :  { %v2647_v16 = vadd.f32 %v2646_v7, %v4746_v51  ;;  %3268 = vmatprep.mubr.bf16.mxu0 %v2912_v18  ;;  %v2830_v25 = vmax.f32 %v2645_v21, 0.0 }
 0x3f6   :  { %v2648_v15 = vpop.f32.mrf.mxu1  ;;  %3269 = vmatmul.mubr.bf16.gmra.mxu0 %v2911_v20 }
 0x3f7   :  { %v2649_v23 = vadd.f32 %v2648_v15, %v4743_v49  ;;  %v2831_v26 = vmax.f32 %v2647_v16, 0.0 }
 0x3f8   :  { %v2652_v24 = vpop.f32.mrf.mxu1 }
 0x3f9   :  { %v2832_v27 = vmax.f32 %v2649_v23, 0.0  ;;  %v2913_v34 = vpack.c.bf16 %v2831_v26, %v2829_v29  ;;  %v2653_v3 = vadd.f32 %v2652_v24, %v4746_v51 }
 0x3fa   :  { %v2654_v28 = vpop.f32.mrf.mxu1 }
 0x3fb   :  { %v2914_v30 = vpack.c.bf16 %v2832_v27, %v2830_v25  ;;  %v2655_v36 = vadd.f32 %v2654_v28, %v4743_v49  ;;  %v2833_v46 = vmax.f32 %v2653_v3, 0.0 }
 0x3fc   :  { %v2656_v33 = vpop.f32.mrf.mxu1 }
 0x3fd   :  { %v2657_v37 = vadd.f32 %v2656_v33, %v4746_v51  ;;  %3276 = vmatprep.mubr.bf16.mxu0 %v2914_v30  ;;  %v2834_v9 = vmax.f32 %v2655_v36, 0.0 }
 0x3fe   :  { %v2658_v32 = vpop.f32.mrf.mxu1  ;;  %3277 = vmatmul.mubr.bf16.gmra.mxu0 %v2913_v34 }
 0x3ff   :  { %v2659_v40 = vadd.f32 %v2658_v32, %v4743_v49  ;;  %v2835_v42 = vmax.f32 %v2657_v37, 0.0 }
 0x400   :  { %v2662_v41 = vpop.f32.mrf.mxu1 }
 0x401   :  { %v2836_v44 = vmax.f32 %v2659_v40, 0.0  ;;  %v2915_v43 = vpack.c.bf16 %v2835_v42, %v2833_v46  ;;  %v2663_v52 = vadd.f32 %v2662_v41, %v4746_v51 }
 0x402   :  { %v2664_v10 = vpop.f32.mrf.mxu1 }
 0x403   :  { %v2916_v47 = vpack.c.bf16 %v2836_v44, %v2834_v9  ;;  %v2665_v48 = vadd.f32 %v2664_v10, %v4743_v49  ;;  %v2837_v0 = vmax.f32 %v2663_v52, 0.0 }
 0x404   :  { %v2666_v38 = vpop.f32.mrf.mxu1 }
 0x405   :  { %v2667_v50 = vadd.f32 %v2666_v38, %v4746_v51  ;;  %3284 = vmatprep.mubr.bf16.mxu0 %v2916_v47  ;;  %v2838_v57 = vmax.f32 %v2665_v48, 0.0 }
 0x406   :  { %v2668_v39 = vpop.f32.mrf.mxu1  ;;  %3285 = vmatmul.mubr.bf16.gmra.mxu0 %v2915_v43 }
 0x407   :  { %v2669_v53 = vadd.f32 %v2668_v39, %v4743_v49  ;;  %v2839_v61 = vmax.f32 %v2667_v50, 0.0 }
 0x408   :  { %v2672_v56 = vpop.f32.mrf.mxu1 }
 0x409   :  { %v2840_v62 = vmax.f32 %v2669_v53, 0.0  ;;  %v2917_v4 = vpack.c.bf16 %v2839_v61, %v2837_v0  ;;  %v2673_v54 = vadd.f32 %v2672_v56, %v4746_v51 }
 0x40a   :  { %v2674_v63 = vpop.f32.mrf.mxu1 }
 0x40b   :  { %v2918_v1 = vpack.c.bf16 %v2840_v62, %v2838_v57  ;;  %v2675_v22 = vadd.f32 %v2674_v63, %v4743_v49  ;;  %v2841_v12 = vmax.f32 %v2673_v54, 0.0 }
 0x40c   :  { %v2676_v2 = vpop.f32.mrf.mxu1 }
 0x40d   :  { %v2677_v6 = vadd.f32 %v2676_v2, %v4746_v51  ;;  %3292 = vmatprep.mubr.bf16.mxu0 %v2918_v1  ;;  %v2842_v59 = vmax.f32 %v2675_v22, 0.0 }
 0x40e   :  { %v2678_v45 = vpop.f32.mrf.mxu1  ;;  %v3102_v35 = vpop.f32.mrf.mxu0  ;;  %3293 = vmatmul.mubr.bf16.gmra.mxu0 %v2917_v4 }
 0x40f   :  { %v2679_v55 = vadd.f32 %v2678_v45, %v4743_v49  ;;  %v3103_v31 = vadd.f32 %v4877_v60, %v3102_v35  ;;  %v2843_v5 = vmax.f32 %v2677_v6, 0.0 }
 0x410   :  { %v2682_v11 = vpop.f32.mrf.mxu1  ;;  %v3104_v58 = vpop.f32.mrf.mxu0 }
 0x411   :  { %v2844_v8 = vmax.f32 %v2679_v55, 0.0  ;;  %3357 = vst.msk [vmem:[%s5236_s11] sm:$0xff] %vm296_vm1, %v3103_v31  ;;  %v2919_v7 = vpack.c.bf16 %v2843_v5, %v2841_v12  ;;  %v2683_v19 = vadd.f32 %v2682_v11, %v4746_v51 }
 0x412   :  { %v2684_v14 = vpop.f32.mrf.mxu1  ;;  %v3105_v17 = vpop.f32.mrf.mxu0 }
 0x413   :  { %v2920_v13 = vpack.c.bf16 %v2844_v8, %v2842_v59  ;;  %v3106_v18 = vadd.f32 %v4877_v60, %v3105_v17  ;;  %v2685_v16 = vadd.f32 %v2684_v14, %v4743_v49  ;;  %v2845_v34 = vmax.f32 %v2683_v19, 0.0 }
 0x414   :  { %v2686_v20 = vpop.f32.mrf.mxu1  ;;  %v3107_v21 = vpop.f32.mrf.mxu0 }
 0x415   :  { %3300 = vmatprep.mubr.bf16.mxu0 %v2920_v13  ;;  %3358 = vst.msk [vmem:[%s5236_s11 + $0x8] sm:$0xff] %vm296_vm1, %v3106_v18  ;;  %v2687_v15 = vadd.f32 %v2686_v20, %v4746_v51  ;;  %v2846_v30 = vmax.f32 %v2685_v16, 0.0 }
 0x416   :  { %v2688_v23 = vpop.f32.mrf.mxu1  ;;  %v3110_v24 = vpop.f32.mrf.mxu0  ;;  %3301 = vmatmul.mubr.bf16.gmra.mxu0 %v2919_v7 }
 0x417   :  { %v2689_v25 = vadd.f32 %v2688_v23, %v4743_v49  ;;  %v3111_v26 = vadd.f32 %v4877_v60, %v3110_v24  ;;  %v2847_v27 = vmax.f32 %v2687_v15, 0.0 }
 0x418   :  { %v2692_v28 = vpop.f32.mrf.mxu1  ;;  %v3112_v29 = vpop.f32.mrf.mxu0 }
 0x419   :  { %v2848_v33 = vmax.f32 %v2689_v25, 0.0  ;;  %3359 = vst.msk [vmem:[%s5236_s11 + $0x10] sm:$0xff] %vm296_vm1, %v3111_v26  ;;  %v2921_v40 = vpack.c.bf16 %v2847_v27, %v2845_v34  ;;  %v2693_v10 = vadd.f32 %v2692_v28, %v4746_v51 }
 0x41a   :  { %v2694_v36 = vpop.f32.mrf.mxu1  ;;  %v3113_v37 = vpop.f32.mrf.mxu0 }
 0x41b   :  { %v2922_v32 = vpack.c.bf16 %v2848_v33, %v2846_v30  ;;  %v3114_v3 = vadd.f32 %v4877_v60, %v3113_v37  ;;  %v2695_v42 = vadd.f32 %v2694_v36, %v4743_v49  ;;  %v2849_v56 = vmax.f32 %v2693_v10, 0.0 }
 0x41c   :  { %v2696_v41 = vpop.f32.mrf.mxu1  ;;  %v3115_v9 = vpop.f32.mrf.mxu0 }
 0x41d   :  { %3360 = vst.msk [vmem:[%s5236_s11 + $0x18] sm:$0xff] %vm296_vm1, %v3114_v3  ;;  %v2697_v44 = vadd.f32 %v2696_v41, %v4746_v51  ;;  %3308 = vmatprep.mubr.bf16.mxu0 %v2922_v32  ;;  %v2850_v52 = vmax.f32 %v2695_v42, 0.0 }
 0x41e   :  { %v2698_v46 = vpop.f32.mrf.mxu1  ;;  %v3118_v47 = vpop.f32.mrf.mxu0  ;;  %3309 = vmatmul.mubr.bf16.gmra.mxu0 %v2921_v40 }
 0x41f   :  { %v2699_v38 = vadd.f32 %v2698_v46, %v4743_v49  ;;  %v3119_v43 = vadd.f32 %v4877_v60, %v3118_v47  ;;  %v2851_v48 = vmax.f32 %v2697_v44, 0.0 }
 0x420   :  { %v2702_v50 = vpop.f32.mrf.mxu1  ;;  %v3120_v39 = vpop.f32.mrf.mxu0 }
 0x421   :  { %v2852_v53 = vmax.f32 %v2699_v38, 0.0  ;;  %3361 = vst.msk [vmem:[%s5236_s11 + $0x20] sm:$0xff] %vm296_vm1, %v3119_v43  ;;  %v2923_v0 = vpack.c.bf16 %v2851_v48, %v2849_v56  ;;  %v2703_v6 = vadd.f32 %v2702_v50, %v4746_v51 }
 0x422   :  { %v2704_v57 = vpop.f32.mrf.mxu1  ;;  %v3121_v61 = vpop.f32.mrf.mxu0 }
 0x423   :  { %v2924_v62 = vpack.c.bf16 %v2852_v53, %v2850_v52  ;;  %v3122_v63 = vadd.f32 %v4877_v60, %v3121_v61  ;;  %v2705_v4 = vadd.f32 %v2704_v57, %v4743_v49  ;;  %v2853_v58 = vmax.f32 %v2703_v6, 0.0 }
 0x424   :  { %v2706_v1 = vpop.f32.mrf.mxu1  ;;  %v3123_v2 = vpop.f32.mrf.mxu0 }
 0x425   :  { %3362 = vst.msk [vmem:[%s5236_s11 + $0x28] sm:$0xff] %vm296_vm1, %v3122_v63  ;;  %v2707_v22 = vadd.f32 %v2706_v1, %v4746_v51  ;;  %3316 = vmatprep.mubr.bf16.mxu0 %v2924_v62  ;;  %v2854_v8 = vmax.f32 %v2705_v4, 0.0 }
 0x426   :  { %v2708_v45 = vpop.f32.mrf.mxu1  ;;  %v3126_v54 = vpop.f32.mrf.mxu0  ;;  %3317 = vmatmul.mubr.bf16.gmra.mxu0 %v2923_v0 }
 0x427   :  { %v2709_v55 = vadd.f32 %v2708_v45, %v4743_v49  ;;  %v3127_v35 = vadd.f32 %v4877_v60, %v3126_v54  ;;  %v2855_v31 = vmax.f32 %v2707_v22, 0.0 }
 0x428   :  { %v2712_v59 = vpop.f32.mrf.mxu1  ;;  %v3128_v5 = vpop.f32.mrf.mxu0 }
 0x429   :  { %v2856_v11 = vmax.f32 %v2709_v55, 0.0  ;;  %3363 = vst.msk [vmem:[%s5236_s11 + $0x30] sm:$0xff] %vm296_vm1, %v3127_v35  ;;  %v2925_v18 = vpack.c.bf16 %v2855_v31, %v2853_v58  ;;  %v2713_v15 = vadd.f32 %v2712_v59, %v4746_v51 }
 0x42a   :  { %v2714_v12 = vpop.f32.mrf.mxu1  ;;  %v3129_v13 = vpop.f32.mrf.mxu0 }
 0x42b   :  { %v2926_v14 = vpack.c.bf16 %v2856_v11, %v2854_v8  ;;  %v3130_v17 = vadd.f32 %v4877_v60, %v3129_v13  ;;  %v2715_v21 = vadd.f32 %v2714_v12, %v4743_v49  ;;  %v2857_v33 = vmax.f32 %v2713_v15, 0.0 }
 0x42c   :  { %v2716_v7 = vpop.f32.mrf.mxu1  ;;  %v3131_v20 = vpop.f32.mrf.mxu0 }
 0x42d   :  { %3364 = vst.msk [vmem:[%s5236_s11 + $0x38] sm:$0xff] %vm296_vm1, %v3130_v17  ;;  %v2717_v16 = vadd.f32 %v2716_v7, %v4746_v51  ;;  %3324 = vmatprep.mubr.bf16.mxu0 %v2926_v14  ;;  %v2858_v29 = vmax.f32 %v2715_v21, 0.0 }
 0x42e   :  { %v2718_v19 = vpop.f32.mrf.mxu1  ;;  %v3134_v23 = vpop.f32.mrf.mxu0  ;;  %3325 = vmatmul.mubr.bf16.gmra.mxu0 %v2925_v18 }
 0x42f   :  { %v2719_v24 = vadd.f32 %v2718_v19, %v4743_v49  ;;  %v3135_v25 = vadd.f32 %v4877_v60, %v3134_v23  ;;  %v2859_v26 = vmax.f32 %v2717_v16, 0.0 }
 0x430   :  { %v2722_v27 = vpop.f32.mrf.mxu1  ;;  %v3136_v28 = vpop.f32.mrf.mxu0 }
 0x431   :  { %v2860_v30 = vmax.f32 %v2719_v24, 0.0  ;;  %3365 = vst.msk [vmem:[%s5236_s11 + $0x40] sm:$0xff] %vm296_vm1, %v3135_v25  ;;  %v2927_v3 = vpack.c.bf16 %v2859_v26, %v2857_v33  ;;  %v2723_v44 = vadd.f32 %v2722_v27, %v4746_v51 }
 0x432   :  { %v2724_v34 = vpop.f32.mrf.mxu1  ;;  %v3137_v36 = vpop.f32.mrf.mxu0 }
 0x433   :  { %v2928_v37 = vpack.c.bf16 %v2860_v30, %v2858_v29  ;;  %v3138_v32 = vadd.f32 %v4877_v60, %v3137_v36  ;;  %v2725_v9 = vadd.f32 %v2724_v34, %v4743_v49  ;;  %v2861_v53 = vmax.f32 %v2723_v44, 0.0 }
 0x434   :  { %v2726_v40 = vpop.f32.mrf.mxu1  ;;  %v3139_v41 = vpop.f32.mrf.mxu0 }
 0x435   :  { %3366 = vst.msk [vmem:[%s5236_s11 + $0x48] sm:$0xff] %vm296_vm1, %v3138_v32  ;;  %v2727_v42 = vadd.f32 %v2726_v40, %v4746_v51  ;;  %3332 = vmatprep.mubr.bf16.mxu0 %v2928_v37  ;;  %v2862_v39 = vmax.f32 %v2725_v9, 0.0 }
 0x436   :  { %v2728_v10 = vpop.f32.mrf.mxu1  ;;  %v3142_v46 = vpop.f32.mrf.mxu0  ;;  %3333 = vmatmul.mubr.bf16.gmra.mxu0 %v2927_v3 }
 0x437   :  { %v2729_v47 = vadd.f32 %v2728_v10, %v4743_v49  ;;  %v3143_v38 = vadd.f32 %v4877_v60, %v3142_v46  ;;  %v2863_v43 = vmax.f32 %v2727_v42, 0.0 }
 0x438   :  { %v2732_v48 = vpop.f32.mrf.mxu1  ;;  %v3144_v50 = vpop.f32.mrf.mxu0 }
 0x439   :  { %v2864_v52 = vmax.f32 %v2729_v47, 0.0  ;;  %3367 = vst.msk [vmem:[%s5236_s11 + $0x50] sm:$0xff] %vm296_vm1, %v3143_v38  ;;  %v2929_v63 = vpack.c.bf16 %v2863_v43, %v2861_v53  ;;  %v2733_v22 = vadd.f32 %v2732_v48, %v4746_v51 }
 0x43a   :  { %v2734_v56 = vpop.f32.mrf.mxu1  ;;  %v3145_v57 = vpop.f32.mrf.mxu0 }
 0x43b   :  { %v2930_v61 = vpack.c.bf16 %v2864_v52, %v2862_v39  ;;  %v3146_v62 = vadd.f32 %v4877_v60, %v3145_v57  ;;  %v2735_v2 = vadd.f32 %v2734_v56, %v4743_v49  ;;  %v2865_v8 = vmax.f32 %v2733_v22, 0.0 }
 0x43c   :  { %v2736_v0 = vpop.f32.mrf.mxu1  ;;  %v3147_v1 = vpop.f32.mrf.mxu0 }
 0x43d   :  { %3368 = vst.msk [vmem:[%s5236_s11 + $0x58] sm:$0xff] %vm296_vm1, %v3146_v62  ;;  %v2737_v4 = vadd.f32 %v2736_v0, %v4746_v51  ;;  %3340 = vmatprep.mubr.bf16.mxu0 %v2930_v61  ;;  %v2866_v59 = vmax.f32 %v2735_v2, 0.0 }
 0x43e   :  { %v2738_v6 = vpop.f32.mrf.mxu1  ;;  %v3150_v45 = vpop.f32.mrf.mxu0  ;;  %3341 = vmatmul.mubr.bf16.gmra.mxu0 %v2929_v63 }
 0x43f   :  { %v2739_v54 = vadd.f32 %v2738_v6, %v4743_v49  ;;  %v3151_v55 = vadd.f32 %v4877_v60, %v3150_v45  ;;  %v2867_v35 = vmax.f32 %v2737_v4, 0.0 }
 0x440   :  { %v3152_v31 = vpop.f32.mrf.mxu0 }
 0x441   :  { %v2868_v5 = vmax.f32 %v2739_v54, 0.0  ;;  %3369 = vst.msk [vmem:[%s5236_s11 + $0x60] sm:$0xff] %vm296_vm1, %v3151_v55  ;;  %v2931_v12 = vpack.c.bf16 %v2867_v35, %v2865_v8 }
 0x442   :  { %v3153_v11 = vpop.f32.mrf.mxu0 }
 0x443   :  { %v2932_v58 = vpack.c.bf16 %v2868_v5, %v2866_v59  ;;  %v3154_v51 = vadd.f32 %v4877_v60, %v3153_v11 }
 0x444   :  { %v3155_v13 = vpop.f32.mrf.mxu0 }
 0x445   :  { %3370 = vst.msk [vmem:[%s5236_s11 + $0x68] sm:$0xff] %vm296_vm1, %v3154_v51  ;;  %3348 = vmatprep.mubr.bf16.mxu0 %v2932_v58 }
 0x446   :  { %v3158_v49 = vpop.f32.mrf.mxu0  ;;  %3349 = vmatmul.mubr.bf16.gmra.mxu0 %v2931_v12 }
 0x447   :  { %v3159_v14 = vadd.f32 %v4877_v60, %v3158_v49 }
 0x448   :  { %v3160_v17 = vpop.f32.mrf.mxu0 }
 0x449   :  { %3371 = vst.msk [vmem:[%s5236_s11 + $0x70] sm:$0xff] %vm296_vm1, %v3159_v14 }
 0x44a   :  { %v3161_v18 = vpop.f32.mrf.mxu0 }
 0x44b   :  { %v3162_v7 = vadd.f32 %v4877_v60, %v3161_v18 }
 0x44c   :  { %v3163_v20 = vpop.f32.mrf.mxu0 }
 0x44d   :  { %3372 = vst.msk [vmem:[%s5236_s11 + $0x78] sm:$0xff] %vm296_vm1, %v3162_v7 }
 0x44e   :  { %v3166_v21 = vpop.f32.mrf.mxu0 }
 0x44f   :  { %v3167_v16 = vadd.f32 %v4877_v60, %v3166_v21 }
 0x450   :  { %v3168_v15 = vpop.f32.mrf.mxu0 }
 0x451   :  { %3373 = vst.msk [vmem:[%s5236_s11 + $0x80] sm:$0xff] %vm296_vm1, %v3167_v16 }
 0x452   :  { %v3169_v19 = vpop.f32.mrf.mxu0 }
 0x453   :  { %v3170_v23 = vadd.f32 %v4877_v60, %v3169_v19 }
 0x454   :  { %v3171_v24 = vpop.f32.mrf.mxu0 }
 0x455   :  { %3374 = vst.msk [vmem:[%s5236_s11 + $0x88] sm:$0xff] %vm296_vm1, %v3170_v23 }
 0x456   :  { %v3174_v25 = vpop.f32.mrf.mxu0 }
 0x457   :  { %v3175_v26 = vadd.f32 %v4877_v60, %v3174_v25 }
 0x458   :  { %v3176_v27 = vpop.f32.mrf.mxu0 }
 0x459   :  { %3375 = vst.msk [vmem:[%s5236_s11 + $0x90] sm:$0xff] %vm296_vm1, %v3175_v26 }
 0x45a   :  { %v3177_v28 = vpop.f32.mrf.mxu0 }
 0x45b   :  { %v3178_v29 = vadd.f32 %v4877_v60, %v3177_v28 }
 0x45c   :  { %v3179_v30 = vpop.f32.mrf.mxu0 }
 0x45d   :  { %3376 = vst.msk [vmem:[%s5236_s11 + $0x98] sm:$0xff] %vm296_vm1, %v3178_v29 }
 0x45e   :  { %v3182_v33 = vpop.f32.mrf.mxu0 }
 0x45f   :  { %v3183_v34 = vadd.f32 %v4877_v60, %v3182_v33 }
 0x460   :  { %v3184_v36 = vpop.f32.mrf.mxu0 }
 0x461   :  { %3377 = vst.msk [vmem:[%s5236_s11 + $0xa0] sm:$0xff] %vm296_vm1, %v3183_v34 }
 0x462   :  { %v3185_v37 = vpop.f32.mrf.mxu0 }
 0x463   :  { %v3186_v32 = vadd.f32 %v4877_v60, %v3185_v37 }
 0x464   :  { %v3187_v3 = vpop.f32.mrf.mxu0 }
 0x465   :  { %3378 = vst.msk [vmem:[%s5236_s11 + $0xa8] sm:$0xff] %vm296_vm1, %v3186_v32 }
 0x466   :  { %v3190_v40 = vpop.f32.mrf.mxu0 }
 0x467   :  { %v3191_v41 = vadd.f32 %v4877_v60, %v3190_v40 }
 0x468   :  { %v3192_v9 = vpop.f32.mrf.mxu0 }
 0x469   :  { %3379 = vst.msk [vmem:[%s5236_s11 + $0xb0] sm:$0xff] %vm296_vm1, %v3191_v41 }
 0x46a   :  { %v3193_v42 = vpop.f32.mrf.mxu0 }
 0x46b   :  { %v3194_v44 = vadd.f32 %v4877_v60, %v3193_v42 }
 0x46c   :  { %v3195_v10 = vpop.f32.mrf.mxu0 }
 0x46d   :  { %3380 = vst.msk [vmem:[%s5236_s11 + $0xb8] sm:$0xff] %vm296_vm1, %v3194_v44 }
 0x46e   :  { %v3198_v46 = vpop.f32.mrf.mxu0 }
 0x46f   :  { %v3199_v47 = vadd.f32 %v4877_v60, %v3198_v46 }
 0x470   :  { %v3200_v38 = vpop.f32.mrf.mxu0 }
 0x471   :  { %3381 = vst.msk [vmem:[%s5236_s11 + $0xc0] sm:$0xff] %vm296_vm1, %v3199_v47 }
 0x472   :  { %v3201_v43 = vpop.f32.mrf.mxu0 }
 0x473   :  { %v3202_v48 = vadd.f32 %v4877_v60, %v3201_v43 }
 0x474   :  { %v3203_v50 = vpop.f32.mrf.mxu0 }
 0x475   :  { %3382 = vst.msk [vmem:[%s5236_s11 + $0xc8] sm:$0xff] %vm296_vm1, %v3202_v48 }
 0x476   :  { %v3206_v39 = vpop.f32.mrf.mxu0 }
 0x477   :  { %v3207_v52 = vadd.f32 %v4877_v60, %v3206_v39 }
 0x478   :  { %v3208_v53 = vpop.f32.mrf.mxu0 }
 0x479   :  { %3383 = vst.msk [vmem:[%s5236_s11 + $0xd0] sm:$0xff] %vm296_vm1, %v3207_v52 }
 0x47a   :  { %v3209_v56 = vpop.f32.mrf.mxu0 }
 0x47b   :  { %v3210_v57 = vadd.f32 %v4877_v60, %v3209_v56 }
 0x47c   :  { %v3211_v61 = vpop.f32.mrf.mxu0 }
 0x47d   :  { %3384 = vst.msk [vmem:[%s5236_s11 + $0xd8] sm:$0xff] %vm296_vm1, %v3210_v57 }
 0x47e   :  { %v3214_v62 = vpop.f32.mrf.mxu0 }
 0x47f   :  { %v3215_v63 = vadd.f32 %v4877_v60, %v3214_v62 }
 0x480   :  { %v3216_v0 = vpop.f32.mrf.mxu0 }
 0x481   :  { %3385 = vst.msk [vmem:[%s5236_s11 + $0xe0] sm:$0xff] %vm296_vm1, %v3215_v63 }
 0x482   :  { %v3217_v1 = vpop.f32.mrf.mxu0 }
 0x483   :  { %v3218_v2 = vadd.f32 %v4877_v60, %v3217_v1 }
 0x484   :  { %v3219_v4 = vpop.f32.mrf.mxu0 }
 0x485   :  { %3386 = vst.msk [vmem:[%s5236_s11 + $0xe8] sm:$0xff] %vm296_vm1, %v3218_v2 }
 0x486   :  { %v3222_v22 = vpop.f32.mrf.mxu0 }
 0x487   :  { %v3223_v6 = vadd.f32 %v4877_v60, %v3222_v22 }
 0x488   :  { %v3224_v45 = vpop.f32.mrf.mxu0 }
 0x489   :  { %3387 = vst.msk [vmem:[%s5236_s11 + $0xf0] sm:$0xff] %vm296_vm1, %v3223_v6 }
 0x48a   :  { %v3225_v54 = vpop.f32.mrf.mxu0 }
 0x48b   :  { %v3226_v55 = vadd.f32 %v4877_v60, %v3225_v54 }
 0x48c   :  { %v3227_v35 = vpop.f32.mrf.mxu0 }
 0x48d   :  { %3388 = vst.msk [vmem:[%s5236_s11 + $0xf8] sm:$0xff] %vm296_vm1, %v3226_v55 }
 0x48e   :  { %v3230_v31 = vpop.f32.mrf.mxu0 }
 0x48f   :  { %v3231_v59 = vadd.f32 %v4877_v60, %v3230_v31 }
 0x490   :  { %v3232_v5 = vpop.f32.mrf.mxu0 }
 0x491   :  { %3389 = vst.msk [vmem:[%s5236_s11 + $0x100] sm:$0xff] %vm296_vm1, %v3231_v59 }
 0x492   :  { %v3233_v8 = vpop.f32.mrf.mxu0 }
 0x493   :  { %v3234_v11 = vadd.f32 %v4877_v60, %v3233_v8 }
 0x494   :  { %v3235_v58 = vpop.f32.mrf.mxu0 }
 0x495   :  { %3390 = vst.msk [vmem:[%s5236_s11 + $0x108] sm:$0xff] %vm296_vm1, %v3234_v11 }
 0x496   :  { %v3238_v51 = vpop.f32.mrf.mxu0 }
 0x497   :  { %v3239_v12 = vadd.f32 %v4877_v60, %v3238_v51 }
 0x498   :  { %v3240_v13 = vpop.f32.mrf.mxu0 }
 0x499   :  { %3391 = vst.msk [vmem:[%s5236_s11 + $0x110] sm:$0xff] %vm296_vm1, %v3239_v12 }
 0x49a   :  { %v3241_v49 = vpop.f32.mrf.mxu0 }
 0x49b   :  { %v3242_v14 = vadd.f32 %v4877_v60, %v3241_v49 }
 0x49c   :  { %v3243_v17 = vpop.f32.mrf.mxu0 }
 0x49d   :  { %3392 = vst.msk [vmem:[%s5236_s11 + $0x118] sm:$0xff] %vm296_vm1, %v3242_v14 }
 0x49e   :  { %v3246_v18 = vpop.f32.mrf.mxu0 }
 0x49f   :  { %v3247_v7 = vadd.f32 %v4877_v60, %v3246_v18 }
 0x4a0   :  { %v3248_v20 = vpop.f32.mrf.mxu0 }
 0x4a1   :  { %3393 = vst.msk [vmem:[%s5236_s11 + $0x120] sm:$0xff] %vm296_vm1, %v3247_v7 }
 0x4a2   :  { %v3249_v21 = vpop.f32.mrf.mxu0 }
 0x4a3   :  { %v3250_v16 = vadd.f32 %v4877_v60, %v3249_v21 }
 0x4a4   :  { %v3251_v15 = vpop.f32.mrf.mxu0 }
 0x4a5   :  { %3394 = vst.msk [vmem:[%s5236_s11 + $0x128] sm:$0xff] %vm296_vm1, %v3250_v16 }
 0x4a6   :  { %v3254_v19 = vpop.f32.mrf.mxu0 }
 0x4a7   :  { %v3255_v23 = vadd.f32 %v4877_v60, %v3254_v19 }
 0x4a8   :  { %v3256_v24 = vpop.f32.mrf.mxu0 }
 0x4a9   :  { %3395 = vst.msk [vmem:[%s5236_s11 + $0x130] sm:$0xff] %vm296_vm1, %v3255_v23 }
 0x4aa   :  { %v3257_v25 = vpop.f32.mrf.mxu0 }
 0x4ab   :  { %v3258_v26 = vadd.f32 %v4877_v60, %v3257_v25 }
 0x4ac   :  { %v3259_v27 = vpop.f32.mrf.mxu0 }
 0x4ad   :  { %3396 = vst.msk [vmem:[%s5236_s11 + $0x138] sm:$0xff] %vm296_vm1, %v3258_v26 }
 0x4ae   :  { %v3262_v28 = vpop.f32.mrf.mxu0 }
 0x4af   :  { %v3263_v29 = vadd.f32 %v4877_v60, %v3262_v28 }
 0x4b0   :  { %v3264_v30 = vpop.f32.mrf.mxu0 }
 0x4b1   :  { %3397 = vst.msk [vmem:[%s5236_s11 + $0x140] sm:$0xff] %vm296_vm1, %v3263_v29 }
 0x4b2   :  { %v3265_v33 = vpop.f32.mrf.mxu0 }
 0x4b3   :  { %v3266_v34 = vadd.f32 %v4877_v60, %v3265_v33 }
 0x4b4   :  { %v3267_v36 = vpop.f32.mrf.mxu0 }
 0x4b5   :  { %3398 = vst.msk [vmem:[%s5236_s11 + $0x148] sm:$0xff] %vm296_vm1, %v3266_v34 }
 0x4b6   :  { %v3270_v37 = vpop.f32.mrf.mxu0 }
 0x4b7   :  { %v3271_v32 = vadd.f32 %v4877_v60, %v3270_v37 }
 0x4b8   :  { %v3272_v3 = vpop.f32.mrf.mxu0 }
 0x4b9   :  { %3399 = vst.msk [vmem:[%s5236_s11 + $0x150] sm:$0xff] %vm296_vm1, %v3271_v32 }
 0x4ba   :  { %v3273_v40 = vpop.f32.mrf.mxu0 }
 0x4bb   :  { %v3274_v41 = vadd.f32 %v4877_v60, %v3273_v40 }
 0x4bc   :  { %v3275_v9 = vpop.f32.mrf.mxu0 }
 0x4bd   :  { %3400 = vst.msk [vmem:[%s5236_s11 + $0x158] sm:$0xff] %vm296_vm1, %v3274_v41 }
 0x4be   :  { %v3278_v42 = vpop.f32.mrf.mxu0 }
 0x4bf   :  { %v3279_v44 = vadd.f32 %v4877_v60, %v3278_v42 }
 0x4c0   :  { %v3280_v10 = vpop.f32.mrf.mxu0 }
 0x4c1   :  { %3401 = vst.msk [vmem:[%s5236_s11 + $0x160] sm:$0xff] %vm296_vm1, %v3279_v44 }
 0x4c2   :  { %v3281_v46 = vpop.f32.mrf.mxu0 }
 0x4c3   :  { %v3282_v47 = vadd.f32 %v4877_v60, %v3281_v46 }
 0x4c4   :  { %v3283_v38 = vpop.f32.mrf.mxu0 }
 0x4c5   :  { %3402 = vst.msk [vmem:[%s5236_s11 + $0x168] sm:$0xff] %vm296_vm1, %v3282_v47 }
 0x4c6   :  { %v3286_v43 = vpop.f32.mrf.mxu0 }
 0x4c7   :  { %v3287_v48 = vadd.f32 %v4877_v60, %v3286_v43 }
 0x4c8   :  { %v3288_v50 = vpop.f32.mrf.mxu0 }
 0x4c9   :  { %3403 = vst.msk [vmem:[%s5236_s11 + $0x170] sm:$0xff] %vm296_vm1, %v3287_v48 }
 0x4ca   :  { %v3289_v39 = vpop.f32.mrf.mxu0 }
 0x4cb   :  { %v3290_v52 = vadd.f32 %v4877_v60, %v3289_v39 }
 0x4cc   :  { %v3291_v53 = vpop.f32.mrf.mxu0 }
 0x4cd   :  { %3404 = vst.msk [vmem:[%s5236_s11 + $0x178] sm:$0xff] %vm296_vm1, %v3290_v52 }
 0x4ce   :  { %v3294_v56 = vpop.f32.mrf.mxu0 }
 0x4cf   :  { %v3295_v57 = vadd.f32 %v4877_v60, %v3294_v56 }
 0x4d0   :  { %v3296_v61 = vpop.f32.mrf.mxu0 }
 0x4d1   :  { %3405 = vst.msk [vmem:[%s5236_s11 + $0x180] sm:$0xff] %vm296_vm1, %v3295_v57 }
 0x4d2   :  { %v3297_v62 = vpop.f32.mrf.mxu0 }
 0x4d3   :  { %v3298_v63 = vadd.f32 %v4877_v60, %v3297_v62 }
 0x4d4   :  { %v3299_v0 = vpop.f32.mrf.mxu0 }
 0x4d5   :  { %3406 = vst.msk [vmem:[%s5236_s11 + $0x188] sm:$0xff] %vm296_vm1, %v3298_v63 }
 0x4d6   :  { %v3302_v1 = vpop.f32.mrf.mxu0 }
 0x4d7   :  { %v3303_v2 = vadd.f32 %v4877_v60, %v3302_v1 }
 0x4d8   :  { %v3304_v4 = vpop.f32.mrf.mxu0 }
 0x4d9   :  { %3407 = vst.msk [vmem:[%s5236_s11 + $0x190] sm:$0xff] %vm296_vm1, %v3303_v2 }
 0x4da   :  { %v3305_v22 = vpop.f32.mrf.mxu0 }
 0x4db   :  { %v3306_v6 = vadd.f32 %v4877_v60, %v3305_v22 }
 0x4dc   :  { %v3307_v45 = vpop.f32.mrf.mxu0 }
 0x4dd   :  { %3408 = vst.msk [vmem:[%s5236_s11 + $0x198] sm:$0xff] %vm296_vm1, %v3306_v6 }
 0x4de   :  { %v3310_v54 = vpop.f32.mrf.mxu0 }
 0x4df   :  { %v3311_v55 = vadd.f32 %v4877_v60, %v3310_v54 }
 0x4e0   :  { %v3312_v35 = vpop.f32.mrf.mxu0 }
 0x4e1   :  { %3409 = vst.msk [vmem:[%s5236_s11 + $0x1a0] sm:$0xff] %vm296_vm1, %v3311_v55 }
 0x4e2   :  { %v3313_v31 = vpop.f32.mrf.mxu0 }
 0x4e3   :  { %v3314_v59 = vadd.f32 %v4877_v60, %v3313_v31 }
 0x4e4   :  { %v3315_v5 = vpop.f32.mrf.mxu0 }
 0x4e5   :  { %3410 = vst.msk [vmem:[%s5236_s11 + $0x1a8] sm:$0xff] %vm296_vm1, %v3314_v59 }
 0x4e6   :  { %v3318_v8 = vpop.f32.mrf.mxu0 }
 0x4e7   :  { %v3319_v11 = vadd.f32 %v4877_v60, %v3318_v8 }
 0x4e8   :  { %v3320_v58 = vpop.f32.mrf.mxu0 }
 0x4e9   :  { %3411 = vst.msk [vmem:[%s5236_s11 + $0x1b0] sm:$0xff] %vm296_vm1, %v3319_v11 }
 0x4ea   :  { %v3321_v51 = vpop.f32.mrf.mxu0 }
 0x4eb   :  { %v3322_v12 = vadd.f32 %v4877_v60, %v3321_v51 }
 0x4ec   :  { %v3323_v13 = vpop.f32.mrf.mxu0 }
 0x4ed   :  { %3412 = vst.msk [vmem:[%s5236_s11 + $0x1b8] sm:$0xff] %vm296_vm1, %v3322_v12 }
 0x4ee   :  { %v3326_v49 = vpop.f32.mrf.mxu0 }
 0x4ef   :  { %v3327_v14 = vadd.f32 %v4877_v60, %v3326_v49 }
 0x4f0   :  { %v3328_v17 = vpop.f32.mrf.mxu0 }
 0x4f1   :  { %3413 = vst.msk [vmem:[%s5236_s11 + $0x1c0] sm:$0xff] %vm296_vm1, %v3327_v14 }
 0x4f2   :  { %v3329_v18 = vpop.f32.mrf.mxu0 }
 0x4f3   :  { %v3330_v7 = vadd.f32 %v4877_v60, %v3329_v18 }
 0x4f4   :  { %v3331_v20 = vpop.f32.mrf.mxu0 }
 0x4f5   :  { %3414 = vst.msk [vmem:[%s5236_s11 + $0x1c8] sm:$0xff] %vm296_vm1, %v3330_v7 }
 0x4f6   :  { %v3334_v21 = vpop.f32.mrf.mxu0 }
 0x4f7   :  { %v3335_v16 = vadd.f32 %v4877_v60, %v3334_v21 }
 0x4f8   :  { %v3336_v15 = vpop.f32.mrf.mxu0 }
 0x4f9   :  { %3415 = vst.msk [vmem:[%s5236_s11 + $0x1d0] sm:$0xff] %vm296_vm1, %v3335_v16 }
 0x4fa   :  { %v3337_v19 = vpop.f32.mrf.mxu0 }
 0x4fb   :  { %v3338_v23 = vadd.f32 %v4877_v60, %v3337_v19 }
 0x4fc   :  { %v3339_v24 = vpop.f32.mrf.mxu0 }
 0x4fd   :  { %3416 = vst.msk [vmem:[%s5236_s11 + $0x1d8] sm:$0xff] %vm296_vm1, %v3338_v23 }
 0x4fe   :  { %v3342_v25 = vpop.f32.mrf.mxu0 }
 0x4ff   :  { %v3343_v26 = vadd.f32 %v4877_v60, %v3342_v25 }
 0x500   :  { %v3344_v27 = vpop.f32.mrf.mxu0 }
 0x501   :  { %3417 = vst.msk [vmem:[%s5236_s11 + $0x1e0] sm:$0xff] %vm296_vm1, %v3343_v26 }
 0x502   :  { %v3345_v28 = vpop.f32.mrf.mxu0 }
 0x503   :  { %v3346_v29 = vadd.f32 %v4877_v60, %v3345_v28 }
 0x504   :  { %v3347_v30 = vpop.f32.mrf.mxu0 }
 0x505   :  { %3418 = vst.msk [vmem:[%s5236_s11 + $0x1e8] sm:$0xff] %vm296_vm1, %v3346_v29 }
 0x506   :  { %v3350_v33 = vpop.f32.mrf.mxu0 }
 0x507   :  { %v3351_v34 = vadd.f32 %v4877_v60, %v3350_v33 }
 0x508   :  { %v3352_v36 = vpop.f32.mrf.mxu0 }
 0x509   :  { %3419 = vst.msk [vmem:[%s5236_s11 + $0x1f0] sm:$0xff] %vm296_vm1, %v3351_v34 }
 0x50a   :  { %v3353_v37 = vpop.f32.mrf.mxu0 }
 0x50b   :  { %v3354_v32 = vadd.f32 %v4877_v60, %v3353_v37 }
 0x50c   :  { %v3355_v3 = vpop.f32.mrf.mxu0 }
 0x50d   :  { %3420 = vst.msk [vmem:[%s5236_s11 + $0x1f8] sm:$0xff] %vm296_vm1, %v3354_v32 }
 0x50e   :  { %3425 = vsyncpa [#allocation3], 1 }

</bundles_post_ra>
